<compile_context>
chip_gen: v7x
topology: tpu7x:2x2x1
jax: 0.10.0
libtpu: 0.0.40
codegen_flags: <defaults>
</compile_context>

<pallas_src>
import math
import functools

import jax
import jax.numpy as jnp
from jax import lax
from jax.experimental import pallas as pl
from jax.experimental.pallas import tpu as pltpu

ACT_DT = jnp.bfloat16      # inter-kernel activation dtype (HBM traffic)
WGT_DT = jnp.bfloat16      # matmul weight dtype
LN_EPS = 1e-5
BN_EPS = 1e-5
NEG_INF = -1e9
MAX_BLOCK_M = 256          # row-tile size for pointwise kernels


# --------------------------------------------------------------------------
# small helpers
# --------------------------------------------------------------------------
def _f32(x):
    return x.astype(jnp.float32)


def _layernorm_f32(x, g, b):
    mu = jnp.mean(x, axis=-1, keepdims=True)
    xc = x - mu
    var = jnp.mean(xc * xc, axis=-1, keepdims=True)
    return xc * lax.rsqrt(var + LN_EPS) * g + b


def _swish(x):
    return x * jax.nn.sigmoid(x)


def _row_tile(M):
    """Pick a row block; pad M so the grid divides evenly."""
    bm = M if M <= MAX_BLOCK_M else MAX_BLOCK_M
    Mp = -(-M // bm) * bm
    return Mp, bm


def _pad_rows(x2d, Mp):
    M = x2d.shape[0]
    if Mp == M:
        return x2d
    return jnp.pad(x2d, ((0, Mp - M), (0, 0)))


def _full_spec(shape):
    n = len(shape)
    return pl.BlockSpec(shape, lambda *_: (0,) * n)


_PARALLEL = pltpu.CompilerParams(dimension_semantics=("parallel",))


# --------------------------------------------------------------------------
# Pallas kernels
# --------------------------------------------------------------------------
def _linear_kernel(x_ref, w_ref, b_ref, o_ref):
    acc = jnp.dot(x_ref[...], w_ref[...], preferred_element_type=jnp.float32)
    o_ref[...] = (acc + _f32(b_ref[...])).astype(o_ref.dtype)


def _ln_kernel(x_ref, g_ref, b_ref, o_ref):
    y = _layernorm_f32(_f32(x_ref[...]), _f32(g_ref[...]), _f32(b_ref[...]))
    o_ref[...] = y.astype(o_ref.dtype)


def _ln_dual_kernel(x_ref, g_ref, b_ref, w_ref, bias_ref, ln_ref, lin_ref):
    """LayerNorm(x) -> (LN output, LN output @ W + bias) in one pass."""
    e = _layernorm_f32(_f32(x_ref[...]), _f32(g_ref[...]), _f32(b_ref[...]))
    ln_ref[...] = e.astype(ln_ref.dtype)
    y = jnp.dot(e.astype(w_ref.dtype), w_ref[...],
                preferred_element_type=jnp.float32) + _f32(bias_ref[...])
    lin_ref[...] = y.astype(lin_ref.dtype)


def _ffn_kernel(x_ref, g_ref, b_ref, w1_ref, b1_ref, w2_ref, b2_ref, *rest,
                scale, post_ln):
    """LN -> linear -> swish -> linear -> x + scale*ff (-> optional post-LN)."""
    if post_ln:
        pg_ref, pb_ref, o_ref = rest
    else:
        (o_ref,) = rest
    x = _f32(x_ref[...])
    h = _layernorm_f32(x, _f32(g_ref[...]), _f32(b_ref[...]))
    h = jnp.dot(h.astype(w1_ref.dtype), w1_ref[...],
                preferred_element_type=jnp.float32)
    h = _swish(h + _f32(b1_ref[...]))
    h = jnp.dot(h.astype(w2_ref.dtype), w2_ref[...],
                preferred_element_type=jnp.float32)
    y = x + scale * (h + _f32(b2_ref[...]))
    if post_ln:
        y = _layernorm_f32(y, _f32(pg_ref[...]), _f32(pb_ref[...]))
    o_ref[...] = y.astype(o_ref.dtype)


def _attend_heads(qkv_or_q, k_src, v_src, bias, wo_ref, bo_ref, H, D, scale):
    """Shared per-head attention + out-projection accumulation (f32)."""
    dk = D // H
    out = _f32(bo_ref[...])                                  # (1, D) broadcast
    for hh in range(H):
        q = qkv_or_q[:, hh * dk:(hh + 1) * dk]
        k = k_src[:, hh * dk:(hh + 1) * dk]
        v = v_src[:, hh * dk:(hh + 1) * dk]
        s = lax.dot_general(q.astype(ACT_DT), k.astype(ACT_DT),
                            (((1,), (1,)), ((), ())),
                            preferred_element_type=jnp.float32)
        s = s * scale + bias
        s = s - jnp.max(s, axis=-1, keepdims=True)
        p = jnp.exp(s)
        p = p * pl.reciprocal(jnp.sum(p, axis=-1, keepdims=True), approx=True)
        ctx = jnp.dot(p.astype(ACT_DT), v.astype(ACT_DT),
                      preferred_element_type=jnp.float32)
        out = out + jnp.dot(ctx.astype(wo_ref.dtype),
                            wo_ref[hh * dk:(hh + 1) * dk, :],
                            preferred_element_type=jnp.float32)
    return out


def _self_attn_kernel(x_ref, g_ref, b_ref, wqkv_ref, bqkv_ref, wo_ref, bo_ref,
                      bias_ref, o_ref, *, H, scale):
    """LN -> merged QKV -> per-head attention -> out-proj -> residual."""
    x = _f32(x_ref[0])                                       # (T, D)
    D = x.shape[-1]
    h = _layernorm_f32(x, _f32(g_ref[...]), _f32(b_ref[...]))
    qkv = jnp.dot(h.astype(wqkv_ref.dtype), wqkv_ref[...],
                  preferred_element_type=jnp.float32) + _f32(bqkv_ref[...])
    bias = bias_ref[0]                                       # (1, Tk) f32
    out = _attend_heads(qkv[:, :D], qkv[:, D:2 * D], qkv[:, 2 * D:],
                        bias, wo_ref, bo_ref, H, D, scale)
    o_ref[0] = (x + out).astype(o_ref.dtype)


def _cross_attn_kernel(x_ref, pr_ref, g_ref, b_ref, wq_ref, bq_ref, wkv_ref,
                       bkv_ref, wo_ref, bo_ref, bias_ref, o_ref, *, H, scale):
    """LN -> Q; prompt -> merged KV; per-head attention -> out-proj -> res."""
    x = _f32(x_ref[0])                                       # (T, D)
    D = x.shape[-1]
    h = _layernorm_f32(x, _f32(g_ref[...]), _f32(b_ref[...]))
    q_all = jnp.dot(h.astype(wq_ref.dtype), wq_ref[...],
                    preferred_element_type=jnp.float32) + _f32(bq_ref[...])
    kv = jnp.dot(pr_ref[0], wkv_ref[...],
                 preferred_element_type=jnp.float32) + _f32(bkv_ref[...])
    bias = bias_ref[0]                                       # (1, Tk) f32
    out = _attend_heads(q_all, kv[:, :D], kv[:, D:],
                        bias, wo_ref, bo_ref, H, D, scale)
    o_ref[0] = (x + out).astype(o_ref.dtype)


def _conv_module_kernel(xp_ref, g_ref, b_ref, wa_ref, ba_ref, wg_ref, bg_ref,
                        dww_ref, dws_ref, dwsh_ref, w2_ref, b2_ref,
                        o_ref, glu_scr, *, T, K, pad):
    """Conformer conv-module, fully fused (grid over batch)."""
    xp = _f32(xp_ref[0])                                     # (T+2p, D)
    h = _layernorm_f32(xp, _f32(g_ref[...]), _f32(b_ref[...]))
    hb = h.astype(wa_ref.dtype)
    a = jnp.dot(hb, wa_ref[...], preferred_element_type=jnp.float32) \
        + _f32(ba_ref[...])
    gate = jnp.dot(hb, wg_ref[...], preferred_element_type=jnp.float32) \
        + _f32(bg_ref[...])
    glu = a * jax.nn.sigmoid(gate)
    # zero the artificial pad rows so the depthwise conv sees zero padding
    t_idx = lax.broadcasted_iota(jnp.int32, glu.shape, 0)
    glu = jnp.where((t_idx >= pad) & (t_idx < pad + T), glu, 0.0)
    glu_scr[...] = glu                                       # VMEM scratch
    acc = jnp.zeros((T, glu.shape[-1]), jnp.float32)
    for k in range(K):                                       # unrolled shifts
        acc = acc + glu_scr[pl.ds(k, T), :] * _f32(dww_ref[k])
    # depthwise bias + eval-mode BatchNorm folded to one scale/shift
    y = acc * _f32(dws_ref[...]) + _f32(dwsh_ref[...])
    y = _swish(y)
    y = jnp.dot(y.astype(w2_ref.dtype), w2_ref[...],
                preferred_element_type=jnp.float32) + _f32(b2_ref[...])
    o_ref[0] = (xp[pad:pad + T, :] + y).astype(o_ref.dtype)


def _conv1d_kernel(xp_ref, w_ref, b_ref, o_ref, *, K):
    """Conv1d over time via K shifted-slice matmuls on the VMEM block."""
    T_out = o_ref.shape[1]
    acc = jnp.zeros((T_out, o_ref.shape[-1]), jnp.float32)
    for k in range(K):
        acc = acc + jnp.dot(xp_ref[0, pl.ds(k, T_out), :], w_ref[k],
                            preferred_element_type=jnp.float32)
    o_ref[0] = (acc + _f32(b_ref[...])).astype(o_ref.dtype)


def _hidden_aux_kernel(enc_ref, auxp_ref, wh_ref, bh_ref, wa_ref, ba_ref,
                       o_ref, *, K):
    """hidden_proj(enc) + aux_prenet Conv1d(aux), fused."""
    T = o_ref.shape[1]
    acc = jnp.dot(enc_ref[0], wh_ref[...], preferred_element_type=jnp.float32)
    for k in range(K):
        acc = acc + jnp.dot(auxp_ref[0, pl.ds(k, T), :], wa_ref[k],
                            preferred_element_type=jnp.float32)
    o_ref[0] = (acc + _f32(bh_ref[...]) + _f32(ba_ref[...])).astype(o_ref.dtype)


# --------------------------------------------------------------------------
# wrappers (row-tiled grids for pointwise kernels, batch grids for the rest)
# --------------------------------------------------------------------------
def pallas_linear(x, w, b, out_dtype=ACT_DT):
    shp = x.shape
    K, N = shp[-1], w.shape[1]
    M = int(math.prod(shp[:-1]))
    Mp, bm = _row_tile(M)
    x2 = _pad_rows(x.reshape(M, K).astype(ACT_DT), Mp)
    out = pl.pallas_call(
        _linear_kernel,
        out_shape=jax.ShapeDtypeStruct((Mp, N), out_dtype),
        grid=(Mp // bm,),
        in_specs=[pl.BlockSpec((bm, K), lambda i: (i, 0)),
                  _full_spec(w.shape), _full_spec(b.shape)],
        out_specs=pl.BlockSpec((bm, N), lambda i: (i, 0)),
        compiler_params=_PARALLEL,
    )(x2, w, b)
    return out[:M].reshape(shp[:-1] + (N,))


def pallas_layernorm(x, g, b, out_dtype=ACT_DT):
    shp = x.shape
    D = shp[-1]
    M = int(math.prod(shp[:-1]))
    Mp, bm = _row_tile(M)
    x2 = _pad_rows(x.reshape(M, D).astype(ACT_DT), Mp)
    out = pl.pallas_call(
        _ln_kernel,
        out_shape=jax.ShapeDtypeStruct((Mp, D), out_dtype),
        grid=(Mp // bm,),
        in_specs=[pl.BlockSpec((bm, D), lambda i: (i, 0)),
                  _full_spec(g.shape), _full_spec(b.shape)],
        out_specs=pl.BlockSpec((bm, D), lambda i: (i, 0)),
        compiler_params=_PARALLEL,
    )(x2, g, b)
    return out[:M].reshape(shp)


def pallas_ln_and_linear(x, g, b, w, bias, ln_dtype=ACT_DT,
                         lin_dtype=jnp.float32):
    """Returns (LayerNorm(x), LayerNorm(x) @ W + bias) from ONE kernel."""
    shp = x.shape
    D, N = shp[-1], w.shape[1]
    M = int(math.prod(shp[:-1]))
    Mp, bm = _row_tile(M)
    x2 = _pad_rows(x.reshape(M, D).astype(ACT_DT), Mp)
    ln_out, lin_out = pl.pallas_call(
        _ln_dual_kernel,
        out_shape=(jax.ShapeDtypeStruct((Mp, D), ln_dtype),
                   jax.ShapeDtypeStruct((Mp, N), lin_dtype)),
        grid=(Mp // bm,),
        in_specs=[pl.BlockSpec((bm, D), lambda i: (i, 0)),
                  _full_spec(g.shape), _full_spec(b.shape),
                  _full_spec(w.shape), _full_spec(bias.shape)],
        out_specs=(pl.BlockSpec((bm, D), lambda i: (i, 0)),
                   pl.BlockSpec((bm, N), lambda i: (i, 0))),
        compiler_params=_PARALLEL,
    )(x2, g, b, w, bias)
    return (ln_out[:M].reshape(shp),
            lin_out[:M].reshape(shp[:-1] + (N,)))


def pallas_ffn(x, g, b, w1, b1, w2, b2, scale, post_g=None, post_b=None,
               out_dtype=ACT_DT):
    shp = x.shape
    D = shp[-1]
    M = int(math.prod(shp[:-1]))
    Mp, bm = _row_tile(M)
    x2 = _pad_rows(x.reshape(M, D).astype(ACT_DT), Mp)
    post_ln = post_g is not None
    kern = functools.partial(_ffn_kernel, scale=scale, post_ln=post_ln)
    args = [x2, g, b, w1, b1, w2, b2]
    specs = [pl.BlockSpec((bm, D), lambda i: (i, 0)),
             _full_spec(g.shape), _full_spec(b.shape),
             _full_spec(w1.shape), _full_spec(b1.shape),
             _full_spec(w2.shape), _full_spec(b2.shape)]
    if post_ln:
        args += [post_g, post_b]
        specs += [_full_spec(post_g.shape), _full_spec(post_b.shape)]
    out = pl.pallas_call(
        kern,
        out_shape=jax.ShapeDtypeStruct((Mp, D), out_dtype),
        grid=(Mp // bm,),
        in_specs=specs,
        out_specs=pl.BlockSpec((bm, D), lambda i: (i, 0)),
        compiler_params=_PARALLEL,
    )(*args)
    return out[:M].reshape(shp)


def pallas_self_attn_block(x, bias, p, H):
    """x: (B,T,D) bf16, bias: (B,1,T) f32. Fused LN+QKV+attn+out-proj+res."""
    B, T, D = x.shape
    Tk = bias.shape[-1]
    kern = functools.partial(_self_attn_kernel, H=H,
                             scale=1.0 / math.sqrt(D // H))
    return pl.pallas_call(
        kern,
        out_shape=jax.ShapeDtypeStruct((B, T, D), ACT_DT),
        grid=(B,),
        in_specs=[pl.BlockSpec((1, T, D), lambda b: (b, 0, 0)),
                  _full_spec(p["ln_sa_g"].shape), _full_spec(p["ln_sa_b"].shape),
                  _full_spec(p["sa_wqkv"].shape), _full_spec(p["sa_bqkv"].shape),
                  _full_spec(p["sa_wo"].shape), _full_spec(p["sa_bo"].shape),
                  pl.BlockSpec((1, 1, Tk), lambda b: (b, 0, 0))],
        out_specs=pl.BlockSpec((1, T, D), lambda b: (b, 0, 0)),
        compiler_params=_PARALLEL,
    )(x.astype(ACT_DT), p["ln_sa_g"], p["ln_sa_b"], p["sa_wqkv"],
      p["sa_bqkv"], p["sa_wo"], p["sa_bo"], bias)


def pallas_cross_attn_block(x, prompt, bias, p, H):
    """Fused LN + Q-proj, prompt KV-proj, attention, out-proj, residual."""
    B, T, D = x.shape
    Tk = prompt.shape[1]
    kern = functools.partial(_cross_attn_kernel, H=H,
                             scale=1.0 / math.sqrt(D // H))
    return pl.pallas_call(
        kern,
        out_shape=jax.ShapeDtypeStruct((B, T, D), ACT_DT),
        grid=(B,),
        in_specs=[pl.BlockSpec((1, T, D), lambda b: (b, 0, 0)),
                  pl.BlockSpec((1, Tk, D), lambda b: (b, 0, 0)),
                  _full_spec(p["ln_ca_g"].shape), _full_spec(p["ln_ca_b"].shape),
                  _full_spec(p["ca_wq"].shape), _full_spec(p["ca_bq"].shape),
                  _full_spec(p["ca_wkv"].shape), _full_spec(p["ca_bkv"].shape),
                  _full_spec(p["ca_wo"].shape), _full_spec(p["ca_bo"].shape),
                  pl.BlockSpec((1, 1, Tk), lambda b: (b, 0, 0))],
        out_specs=pl.BlockSpec((1, T, D), lambda b: (b, 0, 0)),
        compiler_params=_PARALLEL,
    )(x.astype(ACT_DT), prompt.astype(ACT_DT), p["ln_ca_g"], p["ln_ca_b"],
      p["ca_wq"], p["ca_bq"], p["ca_wkv"], p["ca_bkv"], p["ca_wo"],
      p["ca_bo"], bias)


def pallas_conv_module(x, p):
    B, T, D = x.shape
    K = p["dw_w"].shape[0]
    pad = (K - 1) // 2
    xp = jnp.pad(x.astype(ACT_DT), ((0, 0), (pad, pad), (0, 0)))
    Tp2 = T + 2 * pad
    kern = functools.partial(_conv_module_kernel, T=T, K=K, pad=pad)
    return pl.pallas_call(
        kern,
        out_shape=jax.ShapeDtypeStruct((B, T, D), ACT_DT),
        grid=(B,),
        in_specs=[pl.BlockSpec((1, Tp2, D), lambda b: (b, 0, 0)),
                  _full_spec(p["ln_conv_g"].shape), _full_spec(p["ln_conv_b"].shape),
                  _full_spec(p["pw1_wa"].shape), _full_spec(p["pw1_ba"].shape),
                  _full_spec(p["pw1_wg"].shape), _full_spec(p["pw1_bg"].shape),
                  _full_spec(p["dw_w"].shape),
                  _full_spec(p["dw_scale"].shape), _full_spec(p["dw_shift"].shape),
                  _full_spec(p["pw2_w"].shape), _full_spec(p["pw2_b"].shape)],
        out_specs=pl.BlockSpec((1, T, D), lambda b: (b, 0, 0)),
        scratch_shapes=[pltpu.VMEM((Tp2, D), jnp.float32)],
        compiler_params=_PARALLEL,
    )(xp, p["ln_conv_g"], p["ln_conv_b"], p["pw1_wa"], p["pw1_ba"],
      p["pw1_wg"], p["pw1_bg"], p["dw_w"], p["dw_scale"], p["dw_shift"],
      p["pw2_w"], p["pw2_b"])


def pallas_conv1d_prenet(x, w, b, padding, out_dtype=ACT_DT):
    """torch.nn.Conv1d semantics (channel-last). w: (K, Cin, Cout)."""
    B, T, Cin = x.shape
    K, _, Cout = w.shape
    T_out = T + 2 * padding - K + 1
    xb = x.astype(ACT_DT)
    if padding > 0:
        xb = jnp.pad(xb, ((0, 0), (padding, padding), (0, 0)))
    T_in = T + 2 * padding
    kern = functools.partial(_conv1d_kernel, K=K)
    return pl.pallas_call(
        kern,
        out_shape=jax.ShapeDtypeStruct((B, T_out, Cout), out_dtype),
        grid=(B,),
        in_specs=[pl.BlockSpec((1, T_in, Cin), lambda bi: (bi, 0, 0)),
                  _full_spec(w.shape), _full_spec(b.shape)],
        out_specs=pl.BlockSpec((1, T_out, Cout), lambda bi: (bi, 0, 0)),
        compiler_params=_PARALLEL,
    )(xb, w, b)


def pallas_hidden_aux(enc, aux, wh, bh, wa, ba, padding):
    """hidden_proj(enc) + aux_prenet(aux) ('same' Conv1d), one fused kernel."""
    B, T, D = enc.shape
    K = wa.shape[0]
    Ca = aux.shape[-1]
    auxp = jnp.pad(aux.astype(ACT_DT), ((0, 0), (padding, padding), (0, 0)))
    kern = functools.partial(_hidden_aux_kernel, K=K)
    return pl.pallas_call(
        kern,
        out_shape=jax.ShapeDtypeStruct((B, T, D), ACT_DT),
        grid=(B,),
        in_specs=[pl.BlockSpec((1, T, D), lambda bi: (bi, 0, 0)),
                  pl.BlockSpec((1, T + 2 * padding, Ca), lambda bi: (bi, 0, 0)),
                  _full_spec(wh.shape), _full_spec(bh.shape),
                  _full_spec(wa.shape), _full_spec(ba.shape)],
        out_specs=pl.BlockSpec((1, T, D), lambda bi: (bi, 0, 0)),
        compiler_params=_PARALLEL,
    )(enc.astype(ACT_DT), auxp, wh, bh, wa, ba)


# --------------------------------------------------------------------------
# Conformer decoder (self-attn + cross-attn to prompt + conv module)
# --------------------------------------------------------------------------
def _mask_bias(mask, B, Tk):
    if mask is None:
        return jnp.zeros((B, 1, Tk), jnp.float32)
    return jnp.where(mask[:, None, :], 0.0, NEG_INF).astype(jnp.float32)


def conformer_block(x, prompt, self_bias, cross_bias, p, H):
    # macaron feed-forward (fused LN->lin->swish->lin->half-step residual)
    x = pallas_ffn(x, p["ln_ff1_g"], p["ln_ff1_b"],
                   p["ff1_w1"], p["ff1_b1"], p["ff1_w2"], p["ff1_b2"], scale=0.5)
    # self-attention, fully fused per batch element
    x = pallas_self_attn_block(x, self_bias, p, H)
    # cross-attention to (prenet-projected) prompt, fully fused
    x = pallas_cross_attn_block(x, prompt, cross_bias, p, H)
    # convolution module (single fused kernel)
    x = pallas_conv_module(x, p)
    # feed-forward + block-final LayerNorm (fused)
    x = pallas_ffn(x, p["ln_ff2_g"], p["ln_ff2_b"],
                   p["ff2_w1"], p["ff2_b1"], p["ff2_w2"], p["ff2_b2"], scale=0.5,
                   post_g=p["ln_final_g"], post_b=p["ln_final_b"])
    return x


def conformer_decoder_body(x, mask, prompt, prompt_mask, params, num_heads):
    """Input layer + all conformer blocks. Returns the PRE-after-norm output
    (the after-norm is fused into the downstream projection kernels)."""
    if params["input_w"] is not None:      # input_layer == 'linear'
        x = pallas_linear(x, params["input_w"], params["input_b"])
    else:                                   # input_layer is None (encoder2)
        x = x.astype(ACT_DT)
    B, T, _ = x.shape
    Tk = prompt.shape[1]
    self_bias = _mask_bias(mask, B, T)
    cross_bias = _mask_bias(prompt_mask, B, Tk)
    for bp in params["blocks"]:
        x = conformer_block(x, prompt, self_bias, cross_bias, bp, num_heads)
    return x


# --------------------------------------------------------------------------
# CTXVEC2WAVFrontend forward
# --------------------------------------------------------------------------
def frontend_forward(params, vqvec, prompt, mask=None, prompt_mask=None,
                     aux=None, *, num_heads):
    # prompt_prenet: Conv1d(prompt_channels -> adim, k=5, no padding)
    prompt_h = pallas_conv1d_prenet(prompt, params["prompt_prenet_w"],
                                    params["prompt_prenet_b"], padding=0)

    # encoder1 (blocks only; its after-norm is fused with aux_proj below)
    x1 = conformer_decoder_body(vqvec, mask, prompt_h, prompt_mask,
                                params["encoder1"], num_heads)

    e1 = params["encoder1"]
    # after-norm + aux_proj in one dual-output kernel
    enc_out, aux_pred = pallas_ln_and_linear(
        x1, e1["after_g"], e1["after_b"],
        params["aux_proj_w"], params["aux_proj_b"],
        ln_dtype=ACT_DT, lin_dtype=jnp.float32)
    if aux is None:
        aux = aux_pred

    # hidden_proj(enc_out) + aux_prenet(aux) fused into one kernel
    h = pallas_hidden_aux(enc_out, aux,
                          params["hidden_proj_w"], params["hidden_proj_b"],
                          params["aux_prenet_w"], params["aux_prenet_b"],
                          padding=2)

    # encoder2 (blocks only; its after-norm is fused with mel_proj below)
    x2 = conformer_decoder_body(h, mask, prompt_h, prompt_mask,
                                params["encoder2"], num_heads)
    e2 = params["encoder2"]
    enc_out2, mel = pallas_ln_and_linear(
        x2, e2["after_g"], e2["after_b"],
        params["mel_proj_w"], params["mel_proj_b"],
        ln_dtype=jnp.float32, lin_dtype=jnp.float32)
    return enc_out2, mel, aux_pred


# --------------------------------------------------------------------------
# Deterministic parameter initialization
# --------------------------------------------------------------------------
class _KeyGen:
    def __init__(self, key):
        self.key = key
        self.i = 0

    def __call__(self):
        self.i += 1
        return jax.random.fold_in(self.key, self.i)


def _w(kg, shape, dtype=WGT_DT):
    return (0.02 * jax.random.normal(kg(), shape, dtype=jnp.float32)).astype(dtype)


def _zeros(shape):
    return jnp.zeros(shape, jnp.float32)


def _ones(shape):
    return jnp.ones(shape, jnp.float32)


def init_block_params(kg, D, U, Kc):
    # eval-mode BatchNorm1d (running_mean=0, running_var=1) folded with the
    # depthwise-conv bias into a single scale/shift applied in-kernel.
    bn_g, bn_b = _ones((1, D)), _zeros((1, D))
    dw_b = _zeros((1, D))
    running_mean, running_var = _zeros((1, D)), _ones((1, D))
    dw_scale = bn_g / jnp.sqrt(running_var + BN_EPS)
    dw_shift = (dw_b - running_mean) * dw_scale + bn_b
    return dict(
        ln_ff1_g=_ones((1, D)), ln_ff1_b=_zeros((1, D)),
        ff1_w1=_w(kg, (D, U)), ff1_b1=_zeros((1, U)),
        ff1_w2=_w(kg, (U, D)), ff1_b2=_zeros((1, D)),
        ln_sa_g=_ones((1, D)), ln_sa_b=_zeros((1, D)),
        sa_wqkv=_w(kg, (D, 3 * D)), sa_bqkv=_zeros((1, 3 * D)),
        sa_wo=_w(kg, (D, D)), sa_bo=_zeros((1, D)),
        ln_ca_g=_ones((1, D)), ln_ca_b=_zeros((1, D)),
        ca_wq=_w(kg, (D, D)), ca_bq=_zeros((1, D)),
        ca_wkv=_w(kg, (D, 2 * D)), ca_bkv=_zeros((1, 2 * D)),
        ca_wo=_w(kg, (D, D)), ca_bo=_zeros((1, D)),
        ln_conv_g=_ones((1, D)), ln_conv_b=_zeros((1, D)),
        pw1_wa=_w(kg, (D, D)), pw1_ba=_zeros((1, D)),
        pw1_wg=_w(kg, (D, D)), pw1_bg=_zeros((1, D)),
        dw_w=_w(kg, (Kc, 1, D), dtype=jnp.float32),
        dw_scale=dw_scale, dw_shift=dw_shift,
        pw2_w=_w(kg, (D, D)), pw2_b=_zeros((1, D)),
        ln_ff2_g=_ones((1, D)), ln_ff2_b=_zeros((1, D)),
        ff2_w1=_w(kg, (D, U)), ff2_b1=_zeros((1, U)),
        ff2_w2=_w(kg, (U, D)), ff2_b2=_zeros((1, D)),
        ln_final_g=_ones((1, D)), ln_final_b=_zeros((1, D)),
    )


def init_encoder_params(kg, idim, cp):
    D, U = cp["attention_dim"], cp["linear_units"]
    Kc = cp["cnn_module_kernel"]
    p = dict(
        blocks=[init_block_params(kg, D, U, Kc) for _ in range(cp["num_blocks"])],
        after_g=_ones((1, D)), after_b=_zeros((1, D)),
    )
    if idim and idim > 0:   # input_layer == 'linear'
        p["input_w"] = _w(kg, (idim, D))
        p["input_b"] = _zeros((1, D))
    else:                   # input_layer is None (encoder2)
        p["input_w"] = None
        p["input_b"] = None
    return p


def init_frontend_params(key, num_mels, aux_channels, vqvec_channels,
                         prompt_channels, cp):
    kg = _KeyGen(key)
    D = cp["attention_dim"]
    # Conv1d weights stored as (K, Cin, Cout)  (== torch (Cout,Cin,K) transposed)
    return dict(
        prompt_prenet_w=_w(kg, (5, prompt_channels, D)),
        prompt_prenet_b=_zeros((1, D)),
        aux_prenet_w=_w(kg, (5, aux_channels, D)),
        aux_prenet_b=_zeros((1, D)),
        aux_proj_w=_w(kg, (D, aux_channels)), aux_proj_b=_zeros((1, aux_channels)),
        hidden_proj_w=_w(kg, (D, D)), hidden_proj_b=_zeros((1, D)),
        mel_proj_w=_w(kg, (D, num_mels)), mel_proj_b=_zeros((1, num_mels)),
        encoder1=init_encoder_params(kg, vqvec_channels, cp),
        encoder2=init_encoder_params(kg, 0, cp),
    )


# --------------------------------------------------------------------------
if __name__ == "__main__":
    num_mels = 10
    aux_channels = 3
    vqvec_channels = 16
    prompt_channels = num_mels
    conformer_params = dict(
        attention_dim=32,
        attention_heads=2,
        linear_units=64,
        num_blocks=2,
        cnn_module_kernel=7,
    )

    B, T, Tp = 2, 8, 12   # prompt_prenet (k=5, no padding) shrinks Tp -> Tp - 4

    root = jax.random.PRNGKey(0)
    k_param, k_vq, k_pr = jax.random.split(root, 3)

    params = init_frontend_params(k_param, num_mels, aux_channels,
                                  vqvec_channels, prompt_channels,
                                  conformer_params)

    vqvec = jax.random.normal(k_vq, (B, T, vqvec_channels), jnp.float32)
    prompt = jax.random.normal(k_pr, (B, Tp, prompt_channels), jnp.float32)
    mask = jnp.ones((B, T), dtype=bool)
    prompt_mask = jnp.ones((B, Tp - 4), dtype=bool)  # matches conv-shrunk prompt

    fwd = jax.jit(functools.partial(
        frontend_forward, num_heads=conformer_params["attention_heads"]))

    enc_out, mel, aux_pred = fwd(params, vqvec, prompt, mask, prompt_mask, None)
    jax.block_until_ready((enc_out, mel, aux_pred))

    assert enc_out.shape == (B, T, conformer_params["attention_dim"])
    assert mel.shape == (B, T, num_mels)
    assert aux_pred.shape == (B, T, aux_channels)
    assert bool(jnp.all(jnp.isfinite(enc_out)))
    assert bool(jnp.all(jnp.isfinite(mel)))
    assert bool(jnp.all(jnp.isfinite(aux_pred)))
    print("KERNEL_OK")
</pallas_src>

<mosaic_0001>
module attributes {stable_mosaic.version = 11 : i64} {
  func.func @_linear_kernel(%arg0: i32, %arg1: memref<16x16xbf16, #tpu.memory_space<vmem>>, %arg2: memref<16x32xbf16, #tpu.memory_space<vmem>>, %arg3: memref<1x32xf32, #tpu.memory_space<vmem>>, %arg4: memref<16x32xbf16, #tpu.memory_space<vmem>>) attributes {dimension_semantics = [#tpu.dimension_semantics<parallel>], iteration_bounds = array<i64: 1>, scalar_prefetch = 0 : i64, scratch_operands = 0 : i64, tpu.core_type = #tpu.core_type<tc>, window_params = [{transform_indices = @transform_0, window_bounds = array<i64: 16, 16>}, {pipeline_mode = #tpu.pipeline_mode<synchronous>, transform_indices = @transform_1, window_bounds = array<i64: 16, 32>}, {pipeline_mode = #tpu.pipeline_mode<synchronous>, transform_indices = @transform_2, window_bounds = array<i64: 1, 32>}, {transform_indices = @transform_3, window_bounds = array<i64: 16, 32>}]} {
    %c0 = arith.constant 0 : index
    %c0_0 = arith.constant 0 : index
    %0 = vector.load %arg1[%c0, %c0_0] : memref<16x16xbf16, #tpu.memory_space<vmem>>, vector<16x16xbf16>
    %c0_1 = arith.constant 0 : index
    %c0_2 = arith.constant 0 : index
    %1 = vector.load %arg2[%c0_1, %c0_2] : memref<16x32xbf16, #tpu.memory_space<vmem>>, vector<16x32xbf16>
    %cst = arith.constant dense<0.000000e+00> : vector<16x32xf32>
    %2 = tpu.matmul %0, %1, %cst {dimension_numbers = #tpu.dot_dimension_numbers<[1], [0], [0], [1], [0, 0, 1, 1], [], []>} : vector<16x16xbf16>, vector<16x32xbf16>, vector<16x32xf32> -> vector<16x32xf32>
    %c0_3 = arith.constant 0 : index
    %c0_4 = arith.constant 0 : index
    %3 = vector.load %arg3[%c0_3, %c0_4] : memref<1x32xf32, #tpu.memory_space<vmem>>, vector<1x32xf32>
    %4 = vector.broadcast %3 : vector<1x32xf32> to vector<16x32xf32>
    %5 = arith.addf %2, %4 : vector<16x32xf32>
    %6 = arith.truncf %5 : vector<16x32xf32> to vector<16x32xbf16>
    %c0_5 = arith.constant 0 : index
    %c0_6 = arith.constant 0 : index
    %7 = vector.load %arg4[%c0_5, %c0_6] : memref<16x32xbf16, #tpu.memory_space<vmem>>, vector<16x32xbf16>
    tpu.vector_store %arg4[%c0_5, %c0_6], %6 {strides = array<i32>} : memref<16x32xbf16, #tpu.memory_space<vmem>>, vector<16x32xbf16>,
    return
  }
  func.func @transform_0(%arg0: i32) -> (i32, i32) {
    %c0_i32 = arith.constant 0 : i32
    %c0_i32_0 = arith.constant 0 : i32
    return %arg0, %c0_i32 : i32, i32
  }
  func.func @transform_1(%arg0: i32) -> (i32, i32) {
    %c0_i32 = arith.constant 0 : i32
    %c0_i32_0 = arith.constant 0 : i32
    %c0_i32_1 = arith.constant 0 : i32
    return %c0_i32, %c0_i32_0 : i32, i32
  }
  func.func @transform_2(%arg0: i32) -> (i32, i32) {
    %c0_i32 = arith.constant 0 : i32
    %c0_i32_0 = arith.constant 0 : i32
    %c0_i32_1 = arith.constant 0 : i32
    return %c0_i32, %c0_i32_0 : i32, i32
  }
  func.func @transform_3(%arg0: i32) -> (i32, i32) {
    %c0_i32 = arith.constant 0 : i32
    %c0_i32_0 = arith.constant 0 : i32
    return %arg0, %c0_i32 : i32, i32
  }
}

module attributes {stable_mosaic.version = 11 : i64} {
  func.func @_ffn_kernel(%arg0: i32, %arg1: memref<16x32xbf16, #tpu.memory_space<vmem>>, %arg2: memref<1x32xf32, #tpu.memory_space<vmem>>, %arg3: memref<1x32xf32, #tpu.memory_space<vmem>>, %arg4: memref<32x64xbf16, #tpu.memory_space<vmem>>, %arg5: memref<1x64xf32, #tpu.memory_space<vmem>>, %arg6: memref<64x32xbf16, #tpu.memory_space<vmem>>, %arg7: memref<1x32xf32, #tpu.memory_space<vmem>>, %arg8: memref<16x32xbf16, #tpu.memory_space<vmem>>) attributes {dimension_semantics = [#tpu.dimension_semantics<parallel>], iteration_bounds = array<i64: 1>, scalar_prefetch = 0 : i64, scratch_operands = 0 : i64, tpu.core_type = #tpu.core_type<tc>, window_params = [{transform_indices = @transform_0, window_bounds = array<i64: 16, 32>}, {pipeline_mode = #tpu.pipeline_mode<synchronous>, transform_indices = @transform_1, window_bounds = array<i64: 1, 32>}, {pipeline_mode = #tpu.pipeline_mode<synchronous>, transform_indices = @transform_2, window_bounds = array<i64: 1, 32>}, {pipeline_mode = #tpu.pipeline_mode<synchronous>, transform_indices = @transform_3, window_bounds = array<i64: 32, 64>}, {pipeline_mode = #tpu.pipeline_mode<synchronous>, transform_indices = @transform_4, window_bounds = array<i64: 1, 64>}, {pipeline_mode = #tpu.pipeline_mode<synchronous>, transform_indices = @transform_5, window_bounds = array<i64: 64, 32>}, {pipeline_mode = #tpu.pipeline_mode<synchronous>, transform_indices = @transform_6, window_bounds = array<i64: 1, 32>}, {transform_indices = @transform_7, window_bounds = array<i64: 16, 32>}]} {
    %c0 = arith.constant 0 : index
    %c0_0 = arith.constant 0 : index
    %0 = vector.load %arg1[%c0, %c0_0] : memref<16x32xbf16, #tpu.memory_space<vmem>>, vector<16x32xbf16>
    %1 = arith.extf %0 : vector<16x32xbf16> to vector<16x32xf32>
    %c0_1 = arith.constant 0 : index
    %c0_2 = arith.constant 0 : index
    %2 = vector.load %arg2[%c0_1, %c0_2] : memref<1x32xf32, #tpu.memory_space<vmem>>, vector<1x32xf32>
    %c0_3 = arith.constant 0 : index
    %c0_4 = arith.constant 0 : index
    %3 = vector.load %arg3[%c0_3, %c0_4] : memref<1x32xf32, #tpu.memory_space<vmem>>, vector<1x32xf32>
    %cst = arith.constant dense<0.000000e+00> : vector<16xf32>
    %4 = vector.multi_reduction <add>, %1, %cst [1] : vector<16x32xf32> to vector<16xf32>
    %5 = vector.shape_cast %4 : vector<16xf32> to vector<16x1xf32>
    %cst_5 = arith.constant 3.200000e+01 : f32
    %6 = vector.broadcast %cst_5 : f32 to vector<16x1xf32>
    %7 = arith.divf %5, %6 : vector<16x1xf32>
    %8 = vector.broadcast %7 : vector<16x1xf32> to vector<16x32xf32>
    %9 = arith.subf %1, %8 : vector<16x32xf32>
    %10 = arith.mulf %9, %9 : vector<16x32xf32>
    %cst_6 = arith.constant dense<0.000000e+00> : vector<16xf32>
    %11 = vector.multi_reduction <add>, %10, %cst_6 [1] : vector<16x32xf32> to vector<16xf32>
    %12 = vector.shape_cast %11 : vector<16xf32> to vector<16x1xf32>
    %cst_7 = arith.constant 3.200000e+01 : f32
    %13 = vector.broadcast %cst_7 : f32 to vector<16x1xf32>
    %14 = arith.divf %12, %13 : vector<16x1xf32>
    %cst_8 = arith.constant 9.99999974E-6 : f32
    %15 = vector.broadcast %cst_8 : f32 to vector<16x1xf32>
    %16 = arith.addf %14, %15 : vector<16x1xf32>
    %17 = math.rsqrt %16 : vector<16x1xf32>
    %18 = vector.broadcast %17 : vector<16x1xf32> to vector<16x32xf32>
    %19 = arith.mulf %9, %18 : vector<16x32xf32>
    %20 = vector.broadcast %2 : vector<1x32xf32> to vector<16x32xf32>
    %21 = arith.mulf %19, %20 : vector<16x32xf32>
    %22 = vector.broadcast %3 : vector<1x32xf32> to vector<16x32xf32>
    %23 = arith.addf %21, %22 : vector<16x32xf32>
    %24 = arith.truncf %23 : vector<16x32xf32> to vector<16x32xbf16>
    %c0_9 = arith.constant 0 : index
    %c0_10 = arith.constant 0 : index
    %25 = vector.load %arg4[%c0_9, %c0_10] : memref<32x64xbf16, #tpu.memory_space<vmem>>, vector<32x64xbf16>
    %cst_11 = arith.constant dense<0.000000e+00> : vector<16x64xf32>
    %26 = tpu.matmul %24, %25, %cst_11 {dimension_numbers = #tpu.dot_dimension_numbers<[1], [0], [0], [1], [0, 0, 1, 1], [], []>} : vector<16x32xbf16>, vector<32x64xbf16>, vector<16x64xf32> -> vector<16x64xf32>
    %c0_12 = arith.constant 0 : index
    %c0_13 = arith.constant 0 : index
    %27 = vector.load %arg5[%c0_12, %c0_13] : memref<1x64xf32, #tpu.memory_space<vmem>>, vector<1x64xf32>
    %28 = vector.broadcast %27 : vector<1x64xf32> to vector<16x64xf32>
    %29 = arith.addf %26, %28 : vector<16x64xf32>
    %30 = arith.negf %29 : vector<16x64xf32>
    %31 = math.exp %30 : vector<16x64xf32>
    %cst_14 = arith.constant 1.000000e+00 : f32
    %32 = vector.broadcast %cst_14 : f32 to vector<16x64xf32>
    %33 = arith.addf %32, %31 : vector<16x64xf32>
    %34 = arith.divf %32, %33 : vector<16x64xf32>
    %35 = arith.mulf %29, %34 : vector<16x64xf32>
    %36 = arith.truncf %35 : vector<16x64xf32> to vector<16x64xbf16>
    %c0_15 = arith.constant 0 : index
    %c0_16 = arith.constant 0 : index
    %37 = vector.load %arg6[%c0_15, %c0_16] : memref<64x32xbf16, #tpu.memory_space<vmem>>, vector<64x32xbf16>
    %cst_17 = arith.constant dense<0.000000e+00> : vector<16x32xf32>
    %38 = tpu.matmul %36, %37, %cst_17 {dimension_numbers = #tpu.dot_dimension_numbers<[1], [0], [0], [1], [0, 0, 1, 1], [], []>} : vector<16x64xbf16>, vector<64x32xbf16>, vector<16x32xf32> -> vector<16x32xf32>
    %c0_18 = arith.constant 0 : index
    %c0_19 = arith.constant 0 : index
    %39 = vector.load %arg7[%c0_18, %c0_19] : memref<1x32xf32, #tpu.memory_space<vmem>>, vector<1x32xf32>
    %40 = vector.broadcast %39 : vector<1x32xf32> to vector<16x32xf32>
    %41 = arith.addf %38, %40 : vector<16x32xf32>
    %cst_20 = arith.constant 5.000000e-01 : f32
    %42 = vector.broadcast %cst_20 : f32 to vector<16x32xf32>
    %43 = arith.mulf %42, %41 : vector<16x32xf32>
    %44 = arith.addf %1, %43 : vector<16x32xf32>
    %45 = arith.truncf %44 : vector<16x32xf32> to vector<16x32xbf16>
    %c0_21 = arith.constant 0 : index
    %c0_22 = arith.constant 0 : index
    %46 = vector.load %arg8[%c0_21, %c0_22] : memref<16x32xbf16, #tpu.memory_space<vmem>>, vector<16x32xbf16>
    tpu.vector_store %arg8[%c0_21, %c0_22], %45 {strides = array<i32>} : memref<16x32xbf16, #tpu.memory_space<vmem>>, vector<16x32xbf16>,
    return
  }
  func.func @transform_0(%arg0: i32) -> (i32, i32) {
    %c0_i32 = arith.constant 0 : i32
    %c0_i32_0 = arith.constant 0 : i32
    return %arg0, %c0_i32 : i32, i32
  }
  func.func @transform_1(%arg0: i32) -> (i32, i32) {
    %c0_i32 = arith.constant 0 : i32
    %c0_i32_0 = arith.constant 0 : i32
    %c0_i32_1 = arith.constant 0 : i32
    return %c0_i32, %c0_i32_0 : i32, i32
  }
  func.func @transform_2(%arg0: i32) -> (i32, i32) {
    %c0_i32 = arith.constant 0 : i32
    %c0_i32_0 = arith.constant 0 : i32
    %c0_i32_1 = arith.constant 0 : i32
    return %c0_i32, %c0_i32_0 : i32, i32
  }
  func.func @transform_3(%arg0: i32) -> (i32, i32) {
    %c0_i32 = arith.constant 0 : i32
    %c0_i32_0 = arith.constant 0 : i32
    %c0_i32_1 = arith.constant 0 : i32
    return %c0_i32, %c0_i32_0 : i32, i32
  }
  func.func @transform_4(%arg0: i32) -> (i32, i32) {
    %c0_i32 = arith.constant 0 : i32
    %c0_i32_0 = arith.constant 0 : i32
    %c0_i32_1 = arith.constant 0 : i32
    return %c0_i32, %c0_i32_0 : i32, i32
  }
  func.func @transform_5(%arg0: i32) -> (i32, i32) {
    %c0_i32 = arith.constant 0 : i32
    %c0_i32_0 = arith.constant 0 : i32
    %c0_i32_1 = arith.constant 0 : i32
    return %c0_i32, %c0_i32_0 : i32, i32
  }
  func.func @transform_6(%arg0: i32) -> (i32, i32) {
    %c0_i32 = arith.constant 0 : i32
    %c0_i32_0 = arith.constant 0 : i32
    %c0_i32_1 = arith.constant 0 : i32
    return %c0_i32, %c0_i32_0 : i32, i32
  }
  func.func @transform_7(%arg0: i32) -> (i32, i32) {
    %c0_i32 = arith.constant 0 : i32
    %c0_i32_0 = arith.constant 0 : i32
    return %arg0, %c0_i32 : i32, i32
  }
}

module attributes {stable_mosaic.version = 11 : i64} {
  func.func @_self_attn_kernel(%arg0: i32, %arg1: memref<1x8x32xbf16, #tpu.memory_space<vmem>>, %arg2: memref<1x32xf32, #tpu.memory_space<vmem>>, %arg3: memref<1x32xf32, #tpu.memory_space<vmem>>, %arg4: memref<32x96xbf16, #tpu.memory_space<vmem>>, %arg5: memref<1x96xf32, #tpu.memory_space<vmem>>, %arg6: memref<32x32xbf16, #tpu.memory_space<vmem>>, %arg7: memref<1x32xf32, #tpu.memory_space<vmem>>, %arg8: memref<1x1x8xf32, #tpu.memory_space<vmem>>, %arg9: memref<1x8x32xbf16, #tpu.memory_space<vmem>>) attributes {dimension_semantics = [#tpu.dimension_semantics<parallel>], iteration_bounds = array<i64: 2>, scalar_prefetch = 0 : i64, scratch_operands = 0 : i64, tpu.core_type = #tpu.core_type<tc>, window_params = [{transform_indices = @transform_0, window_bounds = array<i64: 1, 8, 32>}, {pipeline_mode = #tpu.pipeline_mode<synchronous>, transform_indices = @transform_1, window_bounds = array<i64: 1, 32>}, {pipeline_mode = #tpu.pipeline_mode<synchronous>, transform_indices = @transform_2, window_bounds = array<i64: 1, 32>}, {pipeline_mode = #tpu.pipeline_mode<synchronous>, transform_indices = @transform_3, window_bounds = array<i64: 32, 96>}, {pipeline_mode = #tpu.pipeline_mode<synchronous>, transform_indices = @transform_4, window_bounds = array<i64: 1, 96>}, {pipeline_mode = #tpu.pipeline_mode<synchronous>, transform_indices = @transform_5, window_bounds = array<i64: 32, 32>}, {pipeline_mode = #tpu.pipeline_mode<synchronous>, transform_indices = @transform_6, window_bounds = array<i64: 1, 32>}, {transform_indices = @transform_7, window_bounds = array<i64: 1, 1, 8>}, {transform_indices = @transform_8, window_bounds = array<i64: 1, 8, 32>}]} {
    %c0 = arith.constant 0 : index
    %c0_0 = arith.constant 0 : index
    %c0_1 = arith.constant 0 : index
    %0 = vector.load %arg1[%c0, %c0_0, %c0_1] : memref<1x8x32xbf16, #tpu.memory_space<vmem>>, vector<1x8x32xbf16>
    %1 = vector.shape_cast %0 : vector<1x8x32xbf16> to vector<8x32xbf16>
    %2 = arith.extf %1 : vector<8x32xbf16> to vector<8x32xf32>
    %c0_2 = arith.constant 0 : index
    %c0_3 = arith.constant 0 : index
    %3 = vector.load %arg2[%c0_2, %c0_3] : memref<1x32xf32, #tpu.memory_space<vmem>>, vector<1x32xf32>
    %c0_4 = arith.constant 0 : index
    %c0_5 = arith.constant 0 : index
    %4 = vector.load %arg3[%c0_4, %c0_5] : memref<1x32xf32, #tpu.memory_space<vmem>>, vector<1x32xf32>
    %cst = arith.constant dense<0.000000e+00> : vector<8xf32>
    %5 = vector.multi_reduction <add>, %2, %cst [1] : vector<8x32xf32> to vector<8xf32>
    %6 = vector.shape_cast %5 : vector<8xf32> to vector<8x1xf32>
    %cst_6 = arith.constant 3.200000e+01 : f32
    %7 = vector.broadcast %cst_6 : f32 to vector<8x1xf32>
    %8 = arith.divf %6, %7 : vector<8x1xf32>
    %9 = vector.broadcast %8 : vector<8x1xf32> to vector<8x32xf32>
    %10 = arith.subf %2, %9 : vector<8x32xf32>
    %11 = arith.mulf %10, %10 : vector<8x32xf32>
    %cst_7 = arith.constant dense<0.000000e+00> : vector<8xf32>
    %12 = vector.multi_reduction <add>, %11, %cst_7 [1] : vector<8x32xf32> to vector<8xf32>
    %13 = vector.shape_cast %12 : vector<8xf32> to vector<8x1xf32>
    %cst_8 = arith.constant 3.200000e+01 : f32
    %14 = vector.broadcast %cst_8 : f32 to vector<8x1xf32>
    %15 = arith.divf %13, %14 : vector<8x1xf32>
    %cst_9 = arith.constant 9.99999974E-6 : f32
    %16 = vector.broadcast %cst_9 : f32 to vector<8x1xf32>
    %17 = arith.addf %15, %16 : vector<8x1xf32>
    %18 = math.rsqrt %17 : vector<8x1xf32>
    %19 = vector.broadcast %18 : vector<8x1xf32> to vector<8x32xf32>
    %20 = arith.mulf %10, %19 : vector<8x32xf32>
    %21 = vector.broadcast %3 : vector<1x32xf32> to vector<8x32xf32>
    %22 = arith.mulf %20, %21 : vector<8x32xf32>
    %23 = vector.broadcast %4 : vector<1x32xf32> to vector<8x32xf32>
    %24 = arith.addf %22, %23 : vector<8x32xf32>
    %25 = arith.truncf %24 : vector<8x32xf32> to vector<8x32xbf16>
    %c0_10 = arith.constant 0 : index
    %c0_11 = arith.constant 0 : index
    %26 = vector.load %arg4[%c0_10, %c0_11] : memref<32x96xbf16, #tpu.memory_space<vmem>>, vector<32x96xbf16>
    %cst_12 = arith.constant dense<0.000000e+00> : vector<8x96xf32>
    %27 = tpu.matmul %25, %26, %cst_12 {dimension_numbers = #tpu.dot_dimension_numbers<[1], [0], [0], [1], [0, 0, 1, 1], [], []>} : vector<8x32xbf16>, vector<32x96xbf16>, vector<8x96xf32> -> vector<8x96xf32>
    %c0_13 = arith.constant 0 : index
    %c0_14 = arith.constant 0 : index
    %28 = vector.load %arg5[%c0_13, %c0_14] : memref<1x96xf32, #tpu.memory_space<vmem>>, vector<1x96xf32>
    %29 = vector.broadcast %28 : vector<1x96xf32> to vector<8x96xf32>
    %30 = arith.addf %27, %29 : vector<8x96xf32>
    %c0_15 = arith.constant 0 : index
    %c0_16 = arith.constant 0 : index
    %c0_17 = arith.constant 0 : index
    %31 = vector.load %arg8[%c0_15, %c0_16, %c0_17] : memref<1x1x8xf32, #tpu.memory_space<vmem>>, vector<1x1x8xf32>
    %32 = vector.shape_cast %31 : vector<1x1x8xf32> to vector<1x8xf32>
    %33 = vector.extract_strided_slice %30 {offsets = [0, 0], sizes = [8, 32], strides = [1, 1]} : vector<8x96xf32> to vector<8x32xf32>
    %34 = vector.extract_strided_slice %30 {offsets = [0, 32], sizes = [8, 32], strides = [1, 1]} : vector<8x96xf32> to vector<8x32xf32>
    %35 = vector.extract_strided_slice %30 {offsets = [0, 64], sizes = [8, 32], strides = [1, 1]} : vector<8x96xf32> to vector<8x32xf32>
    %c0_18 = arith.constant 0 : index
    %c0_19 = arith.constant 0 : index
    %36 = vector.load %arg7[%c0_18, %c0_19] : memref<1x32xf32, #tpu.memory_space<vmem>>, vector<1x32xf32>
    %37 = vector.extract_strided_slice %33 {offsets = [0, 0], sizes = [8, 16], strides = [1, 1]} : vector<8x32xf32> to vector<8x16xf32>
    %38 = vector.extract_strided_slice %34 {offsets = [0, 0], sizes = [8, 16], strides = [1, 1]} : vector<8x32xf32> to vector<8x16xf32>
    %39 = vector.extract_strided_slice %35 {offsets = [0, 0], sizes = [8, 16], strides = [1, 1]} : vector<8x32xf32> to vector<8x16xf32>
    %40 = arith.truncf %37 : vector<8x16xf32> to vector<8x16xbf16>
    %41 = arith.truncf %38 : vector<8x16xf32> to vector<8x16xbf16>
    %cst_20 = arith.constant dense<0.000000e+00> : vector<8x8xf32>
    %42 = tpu.matmul %40, %41, %cst_20 {dimension_numbers = #tpu.dot_dimension_numbers<[1], [1], [0], [0], [0, 0, 1, 0], [], []>} : vector<8x16xbf16>, vector<8x16xbf16>, vector<8x8xf32> -> vector<8x8xf32>
    %cst_21 = arith.constant 2.500000e-01 : f32
    %43 = vector.broadcast %cst_21 : f32 to vector<8x8xf32>
    %44 = arith.mulf %42, %43 : vector<8x8xf32>
    %45 = vector.broadcast %32 : vector<1x8xf32> to vector<8x8xf32>
    %46 = arith.addf %44, %45 : vector<8x8xf32>
    %cst_22 = arith.constant dense<0xFF800000> : vector<8xf32>
    %47 = vector.multi_reduction <maximumf>, %46, %cst_22 [1] : vector<8x8xf32> to vector<8xf32>
    %48 = vector.shape_cast %47 : vector<8xf32> to vector<8x1xf32>
    %49 = vector.broadcast %48 : vector<8x1xf32> to vector<8x8xf32>
    %50 = arith.subf %46, %49 : vector<8x8xf32>
    %51 = math.exp %50 : vector<8x8xf32>
    %cst_23 = arith.constant dense<0.000000e+00> : vector<8xf32>
    %52 = vector.multi_reduction <add>, %51, %cst_23 [1] : vector<8x8xf32> to vector<8xf32>
    %53 = vector.shape_cast %52 : vector<8xf32> to vector<8x1xf32>
    %54 = tpu.reciprocal %53 {approx = true} : vector<8x1xf32> -> vector<8x1xf32>
    %55 = vector.broadcast %54 : vector<8x1xf32> to vector<8x8xf32>
    %56 = arith.mulf %51, %55 : vector<8x8xf32>
    %57 = arith.truncf %56 : vector<8x8xf32> to vector<8x8xbf16>
    %58 = arith.truncf %39 : vector<8x16xf32> to vector<8x16xbf16>
    %cst_24 = arith.constant dense<0.000000e+00> : vector<8x16xf32>
    %59 = tpu.matmul %57, %58, %cst_24 {dimension_numbers = #tpu.dot_dimension_numbers<[1], [0], [0], [1], [0, 0, 1, 1], [], []>} : vector<8x8xbf16>, vector<8x16xbf16>, vector<8x16xf32> -> vector<8x16xf32>
    %60 = arith.truncf %59 : vector<8x16xf32> to vector<8x16xbf16>
    %c0_25 = arith.constant 0 : index
    %c0_26 = arith.constant 0 : index
    %61 = vector.load %arg6[%c0_25, %c0_26] : memref<32x32xbf16, #tpu.memory_space<vmem>>, vector<16x32xbf16>
    %cst_27 = arith.constant dense<0.000000e+00> : vector<8x32xf32>
    %62 = tpu.matmul %60, %61, %cst_27 {dimension_numbers = #tpu.dot_dimension_numbers<[1], [0], [0], [1], [0, 0, 1, 1], [], []>} : vector<8x16xbf16>, vector<16x32xbf16>, vector<8x32xf32> -> vector<8x32xf32>
    %63 = vector.broadcast %36 : vector<1x32xf32> to vector<8x32xf32>
    %64 = arith.addf %63, %62 : vector<8x32xf32>
    %65 = vector.extract_strided_slice %33 {offsets = [0, 16], sizes = [8, 16], strides = [1, 1]} : vector<8x32xf32> to vector<8x16xf32>
    %66 = vector.extract_strided_slice %34 {offsets = [0, 16], sizes = [8, 16], strides = [1, 1]} : vector<8x32xf32> to vector<8x16xf32>
    %67 = vector.extract_strided_slice %35 {offsets = [0, 16], sizes = [8, 16], strides = [1, 1]} : vector<8x32xf32> to vector<8x16xf32>
    %68 = arith.truncf %65 : vector<8x16xf32> to vector<8x16xbf16>
    %69 = arith.truncf %66 : vector<8x16xf32> to vector<8x16xbf16>
    %cst_28 = arith.constant dense<0.000000e+00> : vector<8x8xf32>
    %70 = tpu.matmul %68, %69, %cst_28 {dimension_numbers = #tpu.dot_dimension_numbers<[1], [1], [0], [0], [0, 0, 1, 0], [], []>} : vector<8x16xbf16>, vector<8x16xbf16>, vector<8x8xf32> -> vector<8x8xf32>
    %cst_29 = arith.constant 2.500000e-01 : f32
    %71 = vector.broadcast %cst_29 : f32 to vector<8x8xf32>
    %72 = arith.mulf %70, %71 : vector<8x8xf32>
    %73 = vector.broadcast %32 : vector<1x8xf32> to vector<8x8xf32>
    %74 = arith.addf %72, %73 : vector<8x8xf32>
    %cst_30 = arith.constant dense<0xFF800000> : vector<8xf32>
    %75 = vector.multi_reduction <maximumf>, %74, %cst_30 [1] : vector<8x8xf32> to vector<8xf32>
    %76 = vector.shape_cast %75 : vector<8xf32> to vector<8x1xf32>
    %77 = vector.broadcast %76 : vector<8x1xf32> to vector<8x8xf32>
    %78 = arith.subf %74, %77 : vector<8x8xf32>
    %79 = math.exp %78 : vector<8x8xf32>
    %cst_31 = arith.constant dense<0.000000e+00> : vector<8xf32>
    %80 = vector.multi_reduction <add>, %79, %cst_31 [1] : vector<8x8xf32> to vector<8xf32>
    %81 = vector.shape_cast %80 : vector<8xf32> to vector<8x1xf32>
    %82 = tpu.reciprocal %81 {approx = true} : vector<8x1xf32> -> vector<8x1xf32>
    %83 = vector.broadcast %82 : vector<8x1xf32> to vector<8x8xf32>
    %84 = arith.mulf %79, %83 : vector<8x8xf32>
    %85 = arith.truncf %84 : vector<8x8xf32> to vector<8x8xbf16>
    %86 = arith.truncf %67 : vector<8x16xf32> to vector<8x16xbf16>
    %cst_32 = arith.constant dense<0.000000e+00> : vector<8x16xf32>
    %87 = tpu.matmul %85, %86, %cst_32 {dimension_numbers = #tpu.dot_dimension_numbers<[1], [0], [0], [1], [0, 0, 1, 1], [], []>} : vector<8x8xbf16>, vector<8x16xbf16>, vector<8x16xf32> -> vector<8x16xf32>
    %88 = arith.truncf %87 : vector<8x16xf32> to vector<8x16xbf16>
    %c16 = arith.constant 16 : index
    %c0_33 = arith.constant 0 : index
    %89 = vector.load %arg6[%c16, %c0_33] : memref<32x32xbf16, #tpu.memory_space<vmem>>, vector<16x32xbf16>
    %cst_34 = arith.constant dense<0.000000e+00> : vector<8x32xf32>
    %90 = tpu.matmul %88, %89, %cst_34 {dimension_numbers = #tpu.dot_dimension_numbers<[1], [0], [0], [1], [0, 0, 1, 1], [], []>} : vector<8x16xbf16>, vector<16x32xbf16>, vector<8x32xf32> -> vector<8x32xf32>
    %91 = arith.addf %64, %90 : vector<8x32xf32>
    %92 = arith.addf %2, %91 : vector<8x32xf32>
    %93 = arith.truncf %92 : vector<8x32xf32> to vector<8x32xbf16>
    %c0_35 = arith.constant 0 : index
    %c0_36 = arith.constant 0 : index
    %c0_37 = arith.constant 0 : index
    %94 = vector.load %arg9[%c0_35, %c0_36, %c0_37] : memref<1x8x32xbf16, #tpu.memory_space<vmem>>, vector<1x8x32xbf16>
    %95 = vector.shape_cast %94 : vector<1x8x32xbf16> to vector<8x32xbf16>
    %96 = vector.shape_cast %93 : vector<8x32xbf16> to vector<1x8x32xbf16>
    tpu.vector_store %arg9[%c0_35, %c0_36, %c0_37], %96 {strides = array<i32>} : memref<1x8x32xbf16, #tpu.memory_space<vmem>>, vector<1x8x32xbf16>,
    return
  }
  func.func @transform_0(%arg0: i32) -> (i32, i32, i32) {
    %c0_i32 = arith.constant 0 : i32
    %c0_i32_0 = arith.constant 0 : i32
    %c0_i32_1 = arith.constant 0 : i32
    return %arg0, %c0_i32, %c0_i32_0 : i32, i32, i32
  }
  func.func @transform_1(%arg0: i32) -> (i32, i32) {
    %c0_i32 = arith.constant 0 : i32
    %c0_i32_0 = arith.constant 0 : i32
    %c0_i32_1 = arith.constant 0 : i32
    return %c0_i32, %c0_i32_0 : i32, i32
  }
  func.func @transform_2(%arg0: i32) -> (i32, i32) {
    %c0_i32 = arith.constant 0 : i32
    %c0_i32_0 = arith.constant 0 : i32
    %c0_i32_1 = arith.constant 0 : i32
    return %c0_i32, %c0_i32_0 : i32, i32
  }
  func.func @transform_3(%arg0: i32) -> (i32, i32) {
    %c0_i32 = arith.constant 0 : i32
    %c0_i32_0 = arith.constant 0 : i32
    %c0_i32_1 = arith.constant 0 : i32
    return %c0_i32, %c0_i32_0 : i32, i32
  }
  func.func @transform_4(%arg0: i32) -> (i32, i32) {
    %c0_i32 = arith.constant 0 : i32
    %c0_i32_0 = arith.constant 0 : i32
    %c0_i32_1 = arith.constant 0 : i32
    return %c0_i32, %c0_i32_0 : i32, i32
  }
  func.func @transform_5(%arg0: i32) -> (i32, i32) {
    %c0_i32 = arith.constant 0 : i32
    %c0_i32_0 = arith.constant 0 : i32
    %c0_i32_1 = arith.constant 0 : i32
    return %c0_i32, %c0_i32_0 : i32, i32
  }
  func.func @transform_6(%arg0: i32) -> (i32, i32) {
    %c0_i32 = arith.constant 0 : i32
    %c0_i32_0 = arith.constant 0 : i32
    %c0_i32_1 = arith.constant 0 : i32
    return %c0_i32, %c0_i32_0 : i32, i32
  }
  func.func @transform_7(%arg0: i32) -> (i32, i32, i32) {
    %c0_i32 = arith.constant 0 : i32
    %c0_i32_0 = arith.constant 0 : i32
    %c0_i32_1 = arith.constant 0 : i32
    return %arg0, %c0_i32, %c0_i32_0 : i32, i32, i32
  }
  func.func @transform_8(%arg0: i32) -> (i32, i32, i32) {
    %c0_i32 = arith.constant 0 : i32
    %c0_i32_0 = arith.constant 0 : i32
    %c0_i32_1 = arith.constant 0 : i32
    return %arg0, %c0_i32, %c0_i32_0 : i32, i32, i32
  }
}

module attributes {stable_mosaic.version = 11 : i64} {
  func.func @_conv1d_kernel(%arg0: i32, %arg1: memref<1x12x10xbf16, #tpu.memory_space<vmem>>, %arg2: memref<5x10x32xbf16, #tpu.memory_space<vmem>>, %arg3: memref<1x32xf32, #tpu.memory_space<vmem>>, %arg4: memref<1x8x32xbf16, #tpu.memory_space<vmem>>) attributes {dimension_semantics = [#tpu.dimension_semantics<parallel>], iteration_bounds = array<i64: 2>, scalar_prefetch = 0 : i64, scratch_operands = 0 : i64, tpu.core_type = #tpu.core_type<tc>, window_params = [{transform_indices = @transform_0, window_bounds = array<i64: 1, 12, 10>}, {pipeline_mode = #tpu.pipeline_mode<synchronous>, transform_indices = @transform_1, window_bounds = array<i64: 5, 10, 32>}, {pipeline_mode = #tpu.pipeline_mode<synchronous>, transform_indices = @transform_2, window_bounds = array<i64: 1, 32>}, {transform_indices = @transform_3, window_bounds = array<i64: 1, 8, 32>}]} {
    %cst = arith.constant 0.000000e+00 : f32
    %0 = vector.broadcast %cst : f32 to vector<8x32xf32>
    %c0 = arith.constant 0 : index
    %c0_0 = arith.constant 0 : index
    %c0_1 = arith.constant 0 : index
    %1 = vector.load %arg1[%c0, %c0_0, %c0_1] : memref<1x12x10xbf16, #tpu.memory_space<vmem>>, vector<1x8x10xbf16>
    %2 = vector.shape_cast %1 : vector<1x8x10xbf16> to vector<8x10xbf16>
    %c0_2 = arith.constant 0 : index
    %c0_3 = arith.constant 0 : index
    %c0_4 = arith.constant 0 : index
    %3 = vector.load %arg2[%c0_2, %c0_3, %c0_4] : memref<5x10x32xbf16, #tpu.memory_space<vmem>>, vector<1x10x32xbf16>
    %4 = vector.shape_cast %3 : vector<1x10x32xbf16> to vector<10x32xbf16>
    %cst_5 = arith.constant dense<0.000000e+00> : vector<8x32xf32>
    %5 = tpu.matmul %2, %4, %cst_5 {dimension_numbers = #tpu.dot_dimension_numbers<[1], [0], [0], [1], [0, 0, 1, 1], [], []>} : vector<8x10xbf16>, vector<10x32xbf16>, vector<8x32xf32> -> vector<8x32xf32>
    %6 = arith.addf %0, %5 : vector<8x32xf32>
    %c0_6 = arith.constant 0 : index
    %c1 = arith.constant 1 : index
    %c0_7 = arith.constant 0 : index
    %7 = vector.load %arg1[%c0_6, %c1, %c0_7] : memref<1x12x10xbf16, #tpu.memory_space<vmem>>, vector<1x8x10xbf16>
    %8 = vector.shape_cast %7 : vector<1x8x10xbf16> to vector<8x10xbf16>
    %c1_8 = arith.constant 1 : index
    %c0_9 = arith.constant 0 : index
    %c0_10 = arith.constant 0 : index
    %9 = vector.load %arg2[%c1_8, %c0_9, %c0_10] : memref<5x10x32xbf16, #tpu.memory_space<vmem>>, vector<1x10x32xbf16>
    %10 = vector.shape_cast %9 : vector<1x10x32xbf16> to vector<10x32xbf16>
    %cst_11 = arith.constant dense<0.000000e+00> : vector<8x32xf32>
    %11 = tpu.matmul %8, %10, %cst_11 {dimension_numbers = #tpu.dot_dimension_numbers<[1], [0], [0], [1], [0, 0, 1, 1], [], []>} : vector<8x10xbf16>, vector<10x32xbf16>, vector<8x32xf32> -> vector<8x32xf32>
    %12 = arith.addf %6, %11 : vector<8x32xf32>
    %c0_12 = arith.constant 0 : index
    %c2 = arith.constant 2 : index
    %c0_13 = arith.constant 0 : index
    %13 = vector.load %arg1[%c0_12, %c2, %c0_13] : memref<1x12x10xbf16, #tpu.memory_space<vmem>>, vector<1x8x10xbf16>
    %14 = vector.shape_cast %13 : vector<1x8x10xbf16> to vector<8x10xbf16>
    %c2_14 = arith.constant 2 : index
    %c0_15 = arith.constant 0 : index
    %c0_16 = arith.constant 0 : index
    %15 = vector.load %arg2[%c2_14, %c0_15, %c0_16] : memref<5x10x32xbf16, #tpu.memory_space<vmem>>, vector<1x10x32xbf16>
    %16 = vector.shape_cast %15 : vector<1x10x32xbf16> to vector<10x32xbf16>
    %cst_17 = arith.constant dense<0.000000e+00> : vector<8x32xf32>
    %17 = tpu.matmul %14, %16, %cst_17 {dimension_numbers = #tpu.dot_dimension_numbers<[1], [0], [0], [1], [0, 0, 1, 1], [], []>} : vector<8x10xbf16>, vector<10x32xbf16>, vector<8x32xf32> -> vector<8x32xf32>
    %18 = arith.addf %12, %17 : vector<8x32xf32>
    %c0_18 = arith.constant 0 : index
    %c3 = arith.constant 3 : index
    %c0_19 = arith.constant 0 : index
    %19 = vector.load %arg1[%c0_18, %c3, %c0_19] : memref<1x12x10xbf16, #tpu.memory_space<vmem>>, vector<1x8x10xbf16>
    %20 = vector.shape_cast %19 : vector<1x8x10xbf16> to vector<8x10xbf16>
    %c3_20 = arith.constant 3 : index
    %c0_21 = arith.constant 0 : index
    %c0_22 = arith.constant 0 : index
    %21 = vector.load %arg2[%c3_20, %c0_21, %c0_22] : memref<5x10x32xbf16, #tpu.memory_space<vmem>>, vector<1x10x32xbf16>
    %22 = vector.shape_cast %21 : vector<1x10x32xbf16> to vector<10x32xbf16>
    %cst_23 = arith.constant dense<0.000000e+00> : vector<8x32xf32>
    %23 = tpu.matmul %20, %22, %cst_23 {dimension_numbers = #tpu.dot_dimension_numbers<[1], [0], [0], [1], [0, 0, 1, 1], [], []>} : vector<8x10xbf16>, vector<10x32xbf16>, vector<8x32xf32> -> vector<8x32xf32>
    %24 = arith.addf %18, %23 : vector<8x32xf32>
    %c0_24 = arith.constant 0 : index
    %c4 = arith.constant 4 : index
    %c0_25 = arith.constant 0 : index
    %25 = vector.load %arg1[%c0_24, %c4, %c0_25] : memref<1x12x10xbf16, #tpu.memory_space<vmem>>, vector<1x8x10xbf16>
    %26 = vector.shape_cast %25 : vector<1x8x10xbf16> to vector<8x10xbf16>
    %c4_26 = arith.constant 4 : index
    %c0_27 = arith.constant 0 : index
    %c0_28 = arith.constant 0 : index
    %27 = vector.load %arg2[%c4_26, %c0_27, %c0_28] : memref<5x10x32xbf16, #tpu.memory_space<vmem>>, vector<1x10x32xbf16>
    %28 = vector.shape_cast %27 : vector<1x10x32xbf16> to vector<10x32xbf16>
    %cst_29 = arith.constant dense<0.000000e+00> : vector<8x32xf32>
    %29 = tpu.matmul %26, %28, %cst_29 {dimension_numbers = #tpu.dot_dimension_numbers<[1], [0], [0], [1], [0, 0, 1, 1], [], []>} : vector<8x10xbf16>, vector<10x32xbf16>, vector<8x32xf32> -> vector<8x32xf32>
    %30 = arith.addf %24, %29 : vector<8x32xf32>
    %c0_30 = arith.constant 0 : index
    %c0_31 = arith.constant 0 : index
    %31 = vector.load %arg3[%c0_30, %c0_31] : memref<1x32xf32, #tpu.memory_space<vmem>>, vector<1x32xf32>
    %32 = vector.broadcast %31 : vector<1x32xf32> to vector<8x32xf32>
    %33 = arith.addf %30, %32 : vector<8x32xf32>
    %34 = arith.truncf %33 : vector<8x32xf32> to vector<8x32xbf16>
    %c0_32 = arith.constant 0 : index
    %c0_33 = arith.constant 0 : index
    %c0_34 = arith.constant 0 : index
    %35 = vector.load %arg4[%c0_32, %c0_33, %c0_34] : memref<1x8x32xbf16, #tpu.memory_space<vmem>>, vector<1x8x32xbf16>
    %36 = vector.shape_cast %35 : vector<1x8x32xbf16> to vector<8x32xbf16>
    %37 = vector.shape_cast %34 : vector<8x32xbf16> to vector<1x8x32xbf16>
    tpu.vector_store %arg4[%c0_32, %c0_33, %c0_34], %37 {strides = array<i32>} : memref<1x8x32xbf16, #tpu.memory_space<vmem>>, vector<1x8x32xbf16>,
    return
  }
  func.func @transform_0(%arg0: i32) -> (i32, i32, i32) {
    %c0_i32 = arith.constant 0 : i32
    %c0_i32_0 = arith.constant 0 : i32
    %c0_i32_1 = arith.constant 0 : i32
    return %arg0, %c0_i32, %c0_i32_0 : i32, i32, i32
  }
  func.func @transform_1(%arg0: i32) -> (i32, i32, i32) {
    %c0_i32 = arith.constant 0 : i32
    %c0_i32_0 = arith.constant 0 : i32
    %c0_i32_1 = arith.constant 0 : i32
    %c0_i32_2 = arith.constant 0 : i32
    return %c0_i32, %c0_i32_0, %c0_i32_1 : i32, i32, i32
  }
  func.func @transform_2(%arg0: i32) -> (i32, i32) {
    %c0_i32 = arith.constant 0 : i32
    %c0_i32_0 = arith.constant 0 : i32
    %c0_i32_1 = arith.constant 0 : i32
    return %c0_i32, %c0_i32_0 : i32, i32
  }
  func.func @transform_3(%arg0: i32) -> (i32, i32, i32) {
    %c0_i32 = arith.constant 0 : i32
    %c0_i32_0 = arith.constant 0 : i32
    %c0_i32_1 = arith.constant 0 : i32
    return %arg0, %c0_i32, %c0_i32_0 : i32, i32, i32
  }
}

module attributes {stable_mosaic.version = 11 : i64} {
  func.func @_conv_module_kernel(%arg0: i32, %arg1: memref<1x14x32xbf16, #tpu.memory_space<vmem>>, %arg2: memref<1x32xf32, #tpu.memory_space<vmem>>, %arg3: memref<1x32xf32, #tpu.memory_space<vmem>>, %arg4: memref<32x32xbf16, #tpu.memory_space<vmem>>, %arg5: memref<1x32xf32, #tpu.memory_space<vmem>>, %arg6: memref<32x32xbf16, #tpu.memory_space<vmem>>, %arg7: memref<1x32xf32, #tpu.memory_space<vmem>>, %arg8: memref<7x1x32xf32, #tpu.memory_space<vmem>>, %arg9: memref<1x32xf32, #tpu.memory_space<vmem>>, %arg10: memref<1x32xf32, #tpu.memory_space<vmem>>, %arg11: memref<32x32xbf16, #tpu.memory_space<vmem>>, %arg12: memref<1x32xf32, #tpu.memory_space<vmem>>, %arg13: memref<1x8x32xbf16, #tpu.memory_space<vmem>>, %arg14: memref<14x32xf32, #tpu.memory_space<vmem>>) attributes {dimension_semantics = [#tpu.dimension_semantics<parallel>], iteration_bounds = array<i64: 2>, scalar_prefetch = 0 : i64, scratch_operands = 1 : i64, tpu.core_type = #tpu.core_type<tc>, window_params = [{transform_indices = @transform_0, window_bounds = array<i64: 1, 14, 32>}, {pipeline_mode = #tpu.pipeline_mode<synchronous>, transform_indices = @transform_1, window_bounds = array<i64: 1, 32>}, {pipeline_mode = #tpu.pipeline_mode<synchronous>, transform_indices = @transform_2, window_bounds = array<i64: 1, 32>}, {pipeline_mode = #tpu.pipeline_mode<synchronous>, transform_indices = @transform_3, window_bounds = array<i64: 32, 32>}, {pipeline_mode = #tpu.pipeline_mode<synchronous>, transform_indices = @transform_4, window_bounds = array<i64: 1, 32>}, {pipeline_mode = #tpu.pipeline_mode<synchronous>, transform_indices = @transform_5, window_bounds = array<i64: 32, 32>}, {pipeline_mode = #tpu.pipeline_mode<synchronous>, transform_indices = @transform_6, window_bounds = array<i64: 1, 32>}, {pipeline_mode = #tpu.pipeline_mode<synchronous>, transform_indices = @transform_7, window_bounds = array<i64: 7, 1, 32>}, {pipeline_mode = #tpu.pipeline_mode<synchronous>, transform_indices = @transform_8, window_bounds = array<i64: 1, 32>}, {pipeline_mode = #tpu.pipeline_mode<synchronous>, transform_indices = @transform_9, window_bounds = array<i64: 1, 32>}, {pipeline_mode = #tpu.pipeline_mode<synchronous>, transform_indices = @transform_10, window_bounds = array<i64: 32, 32>}, {pipeline_mode = #tpu.pipeline_mode<synchronous>, transform_indices = @transform_11, window_bounds = array<i64: 1, 32>}, {transform_indices = @transform_12, window_bounds = array<i64: 1, 8, 32>}]} {
    %c0 = arith.constant 0 : index
    %c0_0 = arith.constant 0 : index
    %c0_1 = arith.constant 0 : index
    %0 = vector.load %arg1[%c0, %c0_0, %c0_1] : memref<1x14x32xbf16, #tpu.memory_space<vmem>>, vector<1x14x32xbf16>
    %1 = vector.shape_cast %0 : vector<1x14x32xbf16> to vector<14x32xbf16>
    %2 = arith.extf %1 : vector<14x32xbf16> to vector<14x32xf32>
    %c0_2 = arith.constant 0 : index
    %c0_3 = arith.constant 0 : index
    %3 = vector.load %arg2[%c0_2, %c0_3] : memref<1x32xf32, #tpu.memory_space<vmem>>, vector<1x32xf32>
    %c0_4 = arith.constant 0 : index
    %c0_5 = arith.constant 0 : index
    %4 = vector.load %arg3[%c0_4, %c0_5] : memref<1x32xf32, #tpu.memory_space<vmem>>, vector<1x32xf32>
    %cst = arith.constant dense<0.000000e+00> : vector<14xf32>
    %5 = vector.multi_reduction <add>, %2, %cst [1] : vector<14x32xf32> to vector<14xf32>
    %6 = vector.shape_cast %5 : vector<14xf32> to vector<14x1xf32>
    %cst_6 = arith.constant 3.200000e+01 : f32
    %7 = vector.broadcast %cst_6 : f32 to vector<14x1xf32>
    %8 = arith.divf %6, %7 : vector<14x1xf32>
    %9 = vector.broadcast %8 : vector<14x1xf32> to vector<14x32xf32>
    %10 = arith.subf %2, %9 : vector<14x32xf32>
    %11 = arith.mulf %10, %10 : vector<14x32xf32>
    %cst_7 = arith.constant dense<0.000000e+00> : vector<14xf32>
    %12 = vector.multi_reduction <add>, %11, %cst_7 [1] : vector<14x32xf32> to vector<14xf32>
    %13 = vector.shape_cast %12 : vector<14xf32> to vector<14x1xf32>
    %cst_8 = arith.constant 3.200000e+01 : f32
    %14 = vector.broadcast %cst_8 : f32 to vector<14x1xf32>
    %15 = arith.divf %13, %14 : vector<14x1xf32>
    %cst_9 = arith.constant 9.99999974E-6 : f32
    %16 = vector.broadcast %cst_9 : f32 to vector<14x1xf32>
    %17 = arith.addf %15, %16 : vector<14x1xf32>
    %18 = math.rsqrt %17 : vector<14x1xf32>
    %19 = vector.broadcast %18 : vector<14x1xf32> to vector<14x32xf32>
    %20 = arith.mulf %10, %19 : vector<14x32xf32>
    %21 = vector.broadcast %3 : vector<1x32xf32> to vector<14x32xf32>
    %22 = arith.mulf %20, %21 : vector<14x32xf32>
    %23 = vector.broadcast %4 : vector<1x32xf32> to vector<14x32xf32>
    %24 = arith.addf %22, %23 : vector<14x32xf32>
    %25 = arith.truncf %24 : vector<14x32xf32> to vector<14x32xbf16>
    %c0_10 = arith.constant 0 : index
    %c0_11 = arith.constant 0 : index
    %26 = vector.load %arg4[%c0_10, %c0_11] : memref<32x32xbf16, #tpu.memory_space<vmem>>, vector<32x32xbf16>
    %cst_12 = arith.constant dense<0.000000e+00> : vector<14x32xf32>
    %27 = tpu.matmul %25, %26, %cst_12 {dimension_numbers = #tpu.dot_dimension_numbers<[1], [0], [0], [1], [0, 0, 1, 1], [], []>} : vector<14x32xbf16>, vector<32x32xbf16>, vector<14x32xf32> -> vector<14x32xf32>
    %c0_13 = arith.constant 0 : index
    %c0_14 = arith.constant 0 : index
    %28 = vector.load %arg5[%c0_13, %c0_14] : memref<1x32xf32, #tpu.memory_space<vmem>>, vector<1x32xf32>
    %29 = vector.broadcast %28 : vector<1x32xf32> to vector<14x32xf32>
    %30 = arith.addf %27, %29 : vector<14x32xf32>
    %c0_15 = arith.constant 0 : index
    %c0_16 = arith.constant 0 : index
    %31 = vector.load %arg6[%c0_15, %c0_16] : memref<32x32xbf16, #tpu.memory_space<vmem>>, vector<32x32xbf16>
    %cst_17 = arith.constant dense<0.000000e+00> : vector<14x32xf32>
    %32 = tpu.matmul %25, %31, %cst_17 {dimension_numbers = #tpu.dot_dimension_numbers<[1], [0], [0], [1], [0, 0, 1, 1], [], []>} : vector<14x32xbf16>, vector<32x32xbf16>, vector<14x32xf32> -> vector<14x32xf32>
    %c0_18 = arith.constant 0 : index
    %c0_19 = arith.constant 0 : index
    %33 = vector.load %arg7[%c0_18, %c0_19] : memref<1x32xf32, #tpu.memory_space<vmem>>, vector<1x32xf32>
    %34 = vector.broadcast %33 : vector<1x32xf32> to vector<14x32xf32>
    %35 = arith.addf %32, %34 : vector<14x32xf32>
    %36 = arith.negf %35 : vector<14x32xf32>
    %37 = math.exp %36 : vector<14x32xf32>
    %cst_20 = arith.constant 1.000000e+00 : f32
    %38 = vector.broadcast %cst_20 : f32 to vector<14x32xf32>
    %39 = arith.addf %38, %37 : vector<14x32xf32>
    %40 = arith.divf %38, %39 : vector<14x32xf32>
    %41 = arith.mulf %30, %40 : vector<14x32xf32>
    %42 = tpu.iota {dimensions = array<i32: 0>} : vector<14x32xi32>
    %c3_i32 = arith.constant 3 : i32
    %43 = vector.broadcast %c3_i32 : i32 to vector<14x32xi32>
    %44 = arith.cmpi sge, %42, %43 : vector<14x32xi32>
    %c11_i32 = arith.constant 11 : i32
    %45 = vector.broadcast %c11_i32 : i32 to vector<14x32xi32>
    %46 = arith.cmpi slt, %42, %45 : vector<14x32xi32>
    %47 = arith.andi %44, %46 : vector<14x32xi1>
    %cst_21 = arith.constant 0.000000e+00 : f32
    %48 = vector.broadcast %cst_21 : f32 to vector<14x32xf32>
    %49 = arith.select %47, %41, %48 : vector<14x32xi1>, vector<14x32xf32>
    %c0_22 = arith.constant 0 : index
    %c0_23 = arith.constant 0 : index
    %50 = vector.load %arg14[%c0_22, %c0_23] : memref<14x32xf32, #tpu.memory_space<vmem>>, vector<14x32xf32>
    tpu.vector_store %arg14[%c0_22, %c0_23], %49 {strides = array<i32>} : memref<14x32xf32, #tpu.memory_space<vmem>>, vector<14x32xf32>,
    %cst_24 = arith.constant 0.000000e+00 : f32
    %51 = vector.broadcast %cst_24 : f32 to vector<8x32xf32>
    %c0_25 = arith.constant 0 : index
    %c0_26 = arith.constant 0 : index
    %52 = vector.load %arg14[%c0_25, %c0_26] : memref<14x32xf32, #tpu.memory_space<vmem>>, vector<8x32xf32>
    %c0_27 = arith.constant 0 : index
    %c0_28 = arith.constant 0 : index
    %c0_29 = arith.constant 0 : index
    %53 = vector.load %arg8[%c0_27, %c0_28, %c0_29] : memref<7x1x32xf32, #tpu.memory_space<vmem>>, vector<1x1x32xf32>
    %54 = vector.shape_cast %53 : vector<1x1x32xf32> to vector<1x32xf32>
    %55 = vector.broadcast %54 : vector<1x32xf32> to vector<8x32xf32>
    %56 = arith.mulf %52, %55 : vector<8x32xf32>
    %57 = arith.addf %51, %56 : vector<8x32xf32>
    %c1 = arith.constant 1 : index
    %c0_30 = arith.constant 0 : index
    %58 = vector.load %arg14[%c1, %c0_30] : memref<14x32xf32, #tpu.memory_space<vmem>>, vector<8x32xf32>
    %c1_31 = arith.constant 1 : index
    %c0_32 = arith.constant 0 : index
    %c0_33 = arith.constant 0 : index
    %59 = vector.load %arg8[%c1_31, %c0_32, %c0_33] : memref<7x1x32xf32, #tpu.memory_space<vmem>>, vector<1x1x32xf32>
    %60 = vector.shape_cast %59 : vector<1x1x32xf32> to vector<1x32xf32>
    %61 = vector.broadcast %60 : vector<1x32xf32> to vector<8x32xf32>
    %62 = arith.mulf %58, %61 : vector<8x32xf32>
    %63 = arith.addf %57, %62 : vector<8x32xf32>
    %c2 = arith.constant 2 : index
    %c0_34 = arith.constant 0 : index
    %64 = vector.load %arg14[%c2, %c0_34] : memref<14x32xf32, #tpu.memory_space<vmem>>, vector<8x32xf32>
    %c2_35 = arith.constant 2 : index
    %c0_36 = arith.constant 0 : index
    %c0_37 = arith.constant 0 : index
    %65 = vector.load %arg8[%c2_35, %c0_36, %c0_37] : memref<7x1x32xf32, #tpu.memory_space<vmem>>, vector<1x1x32xf32>
    %66 = vector.shape_cast %65 : vector<1x1x32xf32> to vector<1x32xf32>
    %67 = vector.broadcast %66 : vector<1x32xf32> to vector<8x32xf32>
    %68 = arith.mulf %64, %67 : vector<8x32xf32>
    %69 = arith.addf %63, %68 : vector<8x32xf32>
    %c3 = arith.constant 3 : index
    %c0_38 = arith.constant 0 : index
    %70 = vector.load %arg14[%c3, %c0_38] : memref<14x32xf32, #tpu.memory_space<vmem>>, vector<8x32xf32>
    %c3_39 = arith.constant 3 : index
    %c0_40 = arith.constant 0 : index
    %c0_41 = arith.constant 0 : index
    %71 = vector.load %arg8[%c3_39, %c0_40, %c0_41] : memref<7x1x32xf32, #tpu.memory_space<vmem>>, vector<1x1x32xf32>
    %72 = vector.shape_cast %71 : vector<1x1x32xf32> to vector<1x32xf32>
    %73 = vector.broadcast %72 : vector<1x32xf32> to vector<8x32xf32>
    %74 = arith.mulf %70, %73 : vector<8x32xf32>
    %75 = arith.addf %69, %74 : vector<8x32xf32>
    %c4 = arith.constant 4 : index
    %c0_42 = arith.constant 0 : index
    %76 = vector.load %arg14[%c4, %c0_42] : memref<14x32xf32, #tpu.memory_space<vmem>>, vector<8x32xf32>
    %c4_43 = arith.constant 4 : index
    %c0_44 = arith.constant 0 : index
    %c0_45 = arith.constant 0 : index
    %77 = vector.load %arg8[%c4_43, %c0_44, %c0_45] : memref<7x1x32xf32, #tpu.memory_space<vmem>>, vector<1x1x32xf32>
    %78 = vector.shape_cast %77 : vector<1x1x32xf32> to vector<1x32xf32>
    %79 = vector.broadcast %78 : vector<1x32xf32> to vector<8x32xf32>
    %80 = arith.mulf %76, %79 : vector<8x32xf32>
    %81 = arith.addf %75, %80 : vector<8x32xf32>
    %c5 = arith.constant 5 : index
    %c0_46 = arith.constant 0 : index
    %82 = vector.load %arg14[%c5, %c0_46] : memref<14x32xf32, #tpu.memory_space<vmem>>, vector<8x32xf32>
    %c5_47 = arith.constant 5 : index
    %c0_48 = arith.constant 0 : index
    %c0_49 = arith.constant 0 : index
    %83 = vector.load %arg8[%c5_47, %c0_48, %c0_49] : memref<7x1x32xf32, #tpu.memory_space<vmem>>, vector<1x1x32xf32>
    %84 = vector.shape_cast %83 : vector<1x1x32xf32> to vector<1x32xf32>
    %85 = vector.broadcast %84 : vector<1x32xf32> to vector<8x32xf32>
    %86 = arith.mulf %82, %85 : vector<8x32xf32>
    %87 = arith.addf %81, %86 : vector<8x32xf32>
    %c6 = arith.constant 6 : index
    %c0_50 = arith.constant 0 : index
    %88 = vector.load %arg14[%c6, %c0_50] : memref<14x32xf32, #tpu.memory_space<vmem>>, vector<8x32xf32>
    %c6_51 = arith.constant 6 : index
    %c0_52 = arith.constant 0 : index
    %c0_53 = arith.constant 0 : index
    %89 = vector.load %arg8[%c6_51, %c0_52, %c0_53] : memref<7x1x32xf32, #tpu.memory_space<vmem>>, vector<1x1x32xf32>
    %90 = vector.shape_cast %89 : vector<1x1x32xf32> to vector<1x32xf32>
    %91 = vector.broadcast %90 : vector<1x32xf32> to vector<8x32xf32>
    %92 = arith.mulf %88, %91 : vector<8x32xf32>
    %93 = arith.addf %87, %92 : vector<8x32xf32>
    %c0_54 = arith.constant 0 : index
    %c0_55 = arith.constant 0 : index
    %94 = vector.load %arg9[%c0_54, %c0_55] : memref<1x32xf32, #tpu.memory_space<vmem>>, vector<1x32xf32>
    %95 = vector.broadcast %94 : vector<1x32xf32> to vector<8x32xf32>
    %96 = arith.mulf %93, %95 : vector<8x32xf32>
    %c0_56 = arith.constant 0 : index
    %c0_57 = arith.constant 0 : index
    %97 = vector.load %arg10[%c0_56, %c0_57] : memref<1x32xf32, #tpu.memory_space<vmem>>, vector<1x32xf32>
    %98 = vector.broadcast %97 : vector<1x32xf32> to vector<8x32xf32>
    %99 = arith.addf %96, %98 : vector<8x32xf32>
    %100 = arith.negf %99 : vector<8x32xf32>
    %101 = math.exp %100 : vector<8x32xf32>
    %cst_58 = arith.constant 1.000000e+00 : f32
    %102 = vector.broadcast %cst_58 : f32 to vector<8x32xf32>
    %103 = arith.addf %102, %101 : vector<8x32xf32>
    %104 = arith.divf %102, %103 : vector<8x32xf32>
    %105 = arith.mulf %99, %104 : vector<8x32xf32>
    %106 = arith.truncf %105 : vector<8x32xf32> to vector<8x32xbf16>
    %c0_59 = arith.constant 0 : index
    %c0_60 = arith.constant 0 : index
    %107 = vector.load %arg11[%c0_59, %c0_60] : memref<32x32xbf16, #tpu.memory_space<vmem>>, vector<32x32xbf16>
    %cst_61 = arith.constant dense<0.000000e+00> : vector<8x32xf32>
    %108 = tpu.matmul %106, %107, %cst_61 {dimension_numbers = #tpu.dot_dimension_numbers<[1], [0], [0], [1], [0, 0, 1, 1], [], []>} : vector<8x32xbf16>, vector<32x32xbf16>, vector<8x32xf32> -> vector<8x32xf32>
    %c0_62 = arith.constant 0 : index
    %c0_63 = arith.constant 0 : index
    %109 = vector.load %arg12[%c0_62, %c0_63] : memref<1x32xf32, #tpu.memory_space<vmem>>, vector<1x32xf32>
    %110 = vector.broadcast %109 : vector<1x32xf32> to vector<8x32xf32>
    %111 = arith.addf %108, %110 : vector<8x32xf32>
    %112 = vector.extract_strided_slice %2 {offsets = [3, 0], sizes = [8, 32], strides = [1, 1]} : vector<14x32xf32> to vector<8x32xf32>
    %113 = arith.addf %112, %111 : vector<8x32xf32>
    %114 = arith.truncf %113 : vector<8x32xf32> to vector<8x32xbf16>
    %c0_64 = arith.constant 0 : index
    %c0_65 = arith.constant 0 : index
    %c0_66 = arith.constant 0 : index
    %115 = vector.load %arg13[%c0_64, %c0_65, %c0_66] : memref<1x8x32xbf16, #tpu.memory_space<vmem>>, vector<1x8x32xbf16>
    %116 = vector.shape_cast %115 : vector<1x8x32xbf16> to vector<8x32xbf16>
    %117 = vector.shape_cast %114 : vector<8x32xbf16> to vector<1x8x32xbf16>
    tpu.vector_store %arg13[%c0_64, %c0_65, %c0_66], %117 {strides = array<i32>} : memref<1x8x32xbf16, #tpu.memory_space<vmem>>, vector<1x8x32xbf16>,
    return
  }
  func.func @transform_0(%arg0: i32) -> (i32, i32, i32) {
    %c0_i32 = arith.constant 0 : i32
    %c0_i32_0 = arith.constant 0 : i32
    %c0_i32_1 = arith.constant 0 : i32
    return %arg0, %c0_i32, %c0_i32_0 : i32, i32, i32
  }
  func.func @transform_1(%arg0: i32) -> (i32, i32) {
    %c0_i32 = arith.constant 0 : i32
    %c0_i32_0 = arith.constant 0 : i32
    %c0_i32_1 = arith.constant 0 : i32
    return %c0_i32, %c0_i32_0 : i32, i32
  }
  func.func @transform_2(%arg0: i32) -> (i32, i32) {
    %c0_i32 = arith.constant 0 : i32
    %c0_i32_0 = arith.constant 0 : i32
    %c0_i32_1 = arith.constant 0 : i32
    return %c0_i32, %c0_i32_0 : i32, i32
  }
  func.func @transform_3(%arg0: i32) -> (i32, i32) {
    %c0_i32 = arith.constant 0 : i32
    %c0_i32_0 = arith.constant 0 : i32
    %c0_i32_1 = arith.constant 0 : i32
    return %c0_i32, %c0_i32_0 : i32, i32
  }
  func.func @transform_4(%arg0: i32) -> (i32, i32) {
    %c0_i32 = arith.constant 0 : i32
    %c0_i32_0 = arith.constant 0 : i32
    %c0_i32_1 = arith.constant 0 : i32
    return %c0_i32, %c0_i32_0 : i32, i32
  }
  func.func @transform_5(%arg0: i32) -> (i32, i32) {
    %c0_i32 = arith.constant 0 : i32
    %c0_i32_0 = arith.constant 0 : i32
    %c0_i32_1 = arith.constant 0 : i32
    return %c0_i32, %c0_i32_0 : i32, i32
  }
  func.func @transform_6(%arg0: i32) -> (i32, i32) {
    %c0_i32 = arith.constant 0 : i32
    %c0_i32_0 = arith.constant 0 : i32
    %c0_i32_1 = arith.constant 0 : i32
    return %c0_i32, %c0_i32_0 : i32, i32
  }
  func.func @transform_7(%arg0: i32) -> (i32, i32, i32) {
    %c0_i32 = arith.constant 0 : i32
    %c0_i32_0 = arith.constant 0 : i32
    %c0_i32_1 = arith.constant 0 : i32
    %c0_i32_2 = arith.constant 0 : i32
    return %c0_i32, %c0_i32_0, %c0_i32_1 : i32, i32, i32
  }
  func.func @transform_8(%arg0: i32) -> (i32, i32) {
    %c0_i32 = arith.constant 0 : i32
    %c0_i32_0 = arith.constant 0 : i32
    %c0_i32_1 = arith.constant 0 : i32
    return %c0_i32, %c0_i32_0 : i32, i32
  }
  func.func @transform_9(%arg0: i32) -> (i32, i32) {
    %c0_i32 = arith.constant 0 : i32
    %c0_i32_0 = arith.constant 0 : i32
    %c0_i32_1 = arith.constant 0 : i32
    return %c0_i32, %c0_i32_0 : i32, i32
  }
  func.func @transform_10(%arg0: i32) -> (i32, i32) {
    %c0_i32 = arith.constant 0 : i32
    %c0_i32_0 = arith.constant 0 : i32
    %c0_i32_1 = arith.constant 0 : i32
    return %c0_i32, %c0_i32_0 : i32, i32
  }
  func.func @transform_11(%arg0: i32) -> (i32, i32) {
    %c0_i32 = arith.constant 0 : i32
    %c0_i32_0 = arith.constant 0 : i32
    %c0_i32_1 = arith.constant 0 : i32
    return %c0_i32, %c0_i32_0 : i32, i32
  }
  func.func @transform_12(%arg0: i32) -> (i32, i32, i32) {
    %c0_i32 = arith.constant 0 : i32
    %c0_i32_0 = arith.constant 0 : i32
    %c0_i32_1 = arith.constant 0 : i32
    return %arg0, %c0_i32, %c0_i32_0 : i32, i32, i32
  }
}

module attributes {stable_mosaic.version = 11 : i64} {
  func.func @_cross_attn_kernel(%arg0: i32, %arg1: memref<1x8x32xbf16, #tpu.memory_space<vmem>>, %arg2: memref<1x8x32xbf16, #tpu.memory_space<vmem>>, %arg3: memref<1x32xf32, #tpu.memory_space<vmem>>, %arg4: memref<1x32xf32, #tpu.memory_space<vmem>>, %arg5: memref<32x32xbf16, #tpu.memory_space<vmem>>, %arg6: memref<1x32xf32, #tpu.memory_space<vmem>>, %arg7: memref<32x64xbf16, #tpu.memory_space<vmem>>, %arg8: memref<1x64xf32, #tpu.memory_space<vmem>>, %arg9: memref<32x32xbf16, #tpu.memory_space<vmem>>, %arg10: memref<1x32xf32, #tpu.memory_space<vmem>>, %arg11: memref<1x1x8xf32, #tpu.memory_space<vmem>>, %arg12: memref<1x8x32xbf16, #tpu.memory_space<vmem>>) attributes {dimension_semantics = [#tpu.dimension_semantics<parallel>], iteration_bounds = array<i64: 2>, scalar_prefetch = 0 : i64, scratch_operands = 0 : i64, tpu.core_type = #tpu.core_type<tc>, window_params = [{transform_indices = @transform_0, window_bounds = array<i64: 1, 8, 32>}, {transform_indices = @transform_1, window_bounds = array<i64: 1, 8, 32>}, {pipeline_mode = #tpu.pipeline_mode<synchronous>, transform_indices = @transform_2, window_bounds = array<i64: 1, 32>}, {pipeline_mode = #tpu.pipeline_mode<synchronous>, transform_indices = @transform_3, window_bounds = array<i64: 1, 32>}, {pipeline_mode = #tpu.pipeline_mode<synchronous>, transform_indices = @transform_4, window_bounds = array<i64: 32, 32>}, {pipeline_mode = #tpu.pipeline_mode<synchronous>, transform_indices = @transform_5, window_bounds = array<i64: 1, 32>}, {pipeline_mode = #tpu.pipeline_mode<synchronous>, transform_indices = @transform_6, window_bounds = array<i64: 32, 64>}, {pipeline_mode = #tpu.pipeline_mode<synchronous>, transform_indices = @transform_7, window_bounds = array<i64: 1, 64>}, {pipeline_mode = #tpu.pipeline_mode<synchronous>, transform_indices = @transform_8, window_bounds = array<i64: 32, 32>}, {pipeline_mode = #tpu.pipeline_mode<synchronous>, transform_indices = @transform_9, window_bounds = array<i64: 1, 32>}, {transform_indices = @transform_10, window_bounds = array<i64: 1, 1, 8>}, {transform_indices = @transform_11, window_bounds = array<i64: 1, 8, 32>}]} {
    %c0 = arith.constant 0 : index
    %c0_0 = arith.constant 0 : index
    %c0_1 = arith.constant 0 : index
    %0 = vector.load %arg1[%c0, %c0_0, %c0_1] : memref<1x8x32xbf16, #tpu.memory_space<vmem>>, vector<1x8x32xbf16>
    %1 = vector.shape_cast %0 : vector<1x8x32xbf16> to vector<8x32xbf16>
    %2 = arith.extf %1 : vector<8x32xbf16> to vector<8x32xf32>
    %c0_2 = arith.constant 0 : index
    %c0_3 = arith.constant 0 : index
    %3 = vector.load %arg3[%c0_2, %c0_3] : memref<1x32xf32, #tpu.memory_space<vmem>>, vector<1x32xf32>
    %c0_4 = arith.constant 0 : index
    %c0_5 = arith.constant 0 : index
    %4 = vector.load %arg4[%c0_4, %c0_5] : memref<1x32xf32, #tpu.memory_space<vmem>>, vector<1x32xf32>
    %cst = arith.constant dense<0.000000e+00> : vector<8xf32>
    %5 = vector.multi_reduction <add>, %2, %cst [1] : vector<8x32xf32> to vector<8xf32>
    %6 = vector.shape_cast %5 : vector<8xf32> to vector<8x1xf32>
    %cst_6 = arith.constant 3.200000e+01 : f32
    %7 = vector.broadcast %cst_6 : f32 to vector<8x1xf32>
    %8 = arith.divf %6, %7 : vector<8x1xf32>
    %9 = vector.broadcast %8 : vector<8x1xf32> to vector<8x32xf32>
    %10 = arith.subf %2, %9 : vector<8x32xf32>
    %11 = arith.mulf %10, %10 : vector<8x32xf32>
    %cst_7 = arith.constant dense<0.000000e+00> : vector<8xf32>
    %12 = vector.multi_reduction <add>, %11, %cst_7 [1] : vector<8x32xf32> to vector<8xf32>
    %13 = vector.shape_cast %12 : vector<8xf32> to vector<8x1xf32>
    %cst_8 = arith.constant 3.200000e+01 : f32
    %14 = vector.broadcast %cst_8 : f32 to vector<8x1xf32>
    %15 = arith.divf %13, %14 : vector<8x1xf32>
    %cst_9 = arith.constant 9.99999974E-6 : f32
    %16 = vector.broadcast %cst_9 : f32 to vector<8x1xf32>
    %17 = arith.addf %15, %16 : vector<8x1xf32>
    %18 = math.rsqrt %17 : vector<8x1xf32>
    %19 = vector.broadcast %18 : vector<8x1xf32> to vector<8x32xf32>
    %20 = arith.mulf %10, %19 : vector<8x32xf32>
    %21 = vector.broadcast %3 : vector<1x32xf32> to vector<8x32xf32>
    %22 = arith.mulf %20, %21 : vector<8x32xf32>
    %23 = vector.broadcast %4 : vector<1x32xf32> to vector<8x32xf32>
    %24 = arith.addf %22, %23 : vector<8x32xf32>
    %25 = arith.truncf %24 : vector<8x32xf32> to vector<8x32xbf16>
    %c0_10 = arith.constant 0 : index
    %c0_11 = arith.constant 0 : index
    %26 = vector.load %arg5[%c0_10, %c0_11] : memref<32x32xbf16, #tpu.memory_space<vmem>>, vector<32x32xbf16>
    %cst_12 = arith.constant dense<0.000000e+00> : vector<8x32xf32>
    %27 = tpu.matmul %25, %26, %cst_12 {dimension_numbers = #tpu.dot_dimension_numbers<[1], [0], [0], [1], [0, 0, 1, 1], [], []>} : vector<8x32xbf16>, vector<32x32xbf16>, vector<8x32xf32> -> vector<8x32xf32>
    %c0_13 = arith.constant 0 : index
    %c0_14 = arith.constant 0 : index
    %28 = vector.load %arg6[%c0_13, %c0_14] : memref<1x32xf32, #tpu.memory_space<vmem>>, vector<1x32xf32>
    %29 = vector.broadcast %28 : vector<1x32xf32> to vector<8x32xf32>
    %30 = arith.addf %27, %29 : vector<8x32xf32>
    %c0_15 = arith.constant 0 : index
    %c0_16 = arith.constant 0 : index
    %c0_17 = arith.constant 0 : index
    %31 = vector.load %arg2[%c0_15, %c0_16, %c0_17] : memref<1x8x32xbf16, #tpu.memory_space<vmem>>, vector<1x8x32xbf16>
    %32 = vector.shape_cast %31 : vector<1x8x32xbf16> to vector<8x32xbf16>
    %c0_18 = arith.constant 0 : index
    %c0_19 = arith.constant 0 : index
    %33 = vector.load %arg7[%c0_18, %c0_19] : memref<32x64xbf16, #tpu.memory_space<vmem>>, vector<32x64xbf16>
    %cst_20 = arith.constant dense<0.000000e+00> : vector<8x64xf32>
    %34 = tpu.matmul %32, %33, %cst_20 {dimension_numbers = #tpu.dot_dimension_numbers<[1], [0], [0], [1], [0, 0, 1, 1], [], []>} : vector<8x32xbf16>, vector<32x64xbf16>, vector<8x64xf32> -> vector<8x64xf32>
    %c0_21 = arith.constant 0 : index
    %c0_22 = arith.constant 0 : index
    %35 = vector.load %arg8[%c0_21, %c0_22] : memref<1x64xf32, #tpu.memory_space<vmem>>, vector<1x64xf32>
    %36 = vector.broadcast %35 : vector<1x64xf32> to vector<8x64xf32>
    %37 = arith.addf %34, %36 : vector<8x64xf32>
    %c0_23 = arith.constant 0 : index
    %c0_24 = arith.constant 0 : index
    %c0_25 = arith.constant 0 : index
    %38 = vector.load %arg11[%c0_23, %c0_24, %c0_25] : memref<1x1x8xf32, #tpu.memory_space<vmem>>, vector<1x1x8xf32>
    %39 = vector.shape_cast %38 : vector<1x1x8xf32> to vector<1x8xf32>
    %40 = vector.extract_strided_slice %37 {offsets = [0, 0], sizes = [8, 32], strides = [1, 1]} : vector<8x64xf32> to vector<8x32xf32>
    %41 = vector.extract_strided_slice %37 {offsets = [0, 32], sizes = [8, 32], strides = [1, 1]} : vector<8x64xf32> to vector<8x32xf32>
    %c0_26 = arith.constant 0 : index
    %c0_27 = arith.constant 0 : index
    %42 = vector.load %arg10[%c0_26, %c0_27] : memref<1x32xf32, #tpu.memory_space<vmem>>, vector<1x32xf32>
    %43 = vector.extract_strided_slice %30 {offsets = [0, 0], sizes = [8, 16], strides = [1, 1]} : vector<8x32xf32> to vector<8x16xf32>
    %44 = vector.extract_strided_slice %40 {offsets = [0, 0], sizes = [8, 16], strides = [1, 1]} : vector<8x32xf32> to vector<8x16xf32>
    %45 = vector.extract_strided_slice %41 {offsets = [0, 0], sizes = [8, 16], strides = [1, 1]} : vector<8x32xf32> to vector<8x16xf32>
    %46 = arith.truncf %43 : vector<8x16xf32> to vector<8x16xbf16>
    %47 = arith.truncf %44 : vector<8x16xf32> to vector<8x16xbf16>
    %cst_28 = arith.constant dense<0.000000e+00> : vector<8x8xf32>
    %48 = tpu.matmul %46, %47, %cst_28 {dimension_numbers = #tpu.dot_dimension_numbers<[1], [1], [0], [0], [0, 0, 1, 0], [], []>} : vector<8x16xbf16>, vector<8x16xbf16>, vector<8x8xf32> -> vector<8x8xf32>
    %cst_29 = arith.constant 2.500000e-01 : f32
    %49 = vector.broadcast %cst_29 : f32 to vector<8x8xf32>
    %50 = arith.mulf %48, %49 : vector<8x8xf32>
    %51 = vector.broadcast %39 : vector<1x8xf32> to vector<8x8xf32>
    %52 = arith.addf %50, %51 : vector<8x8xf32>
    %cst_30 = arith.constant dense<0xFF800000> : vector<8xf32>
    %53 = vector.multi_reduction <maximumf>, %52, %cst_30 [1] : vector<8x8xf32> to vector<8xf32>
    %54 = vector.shape_cast %53 : vector<8xf32> to vector<8x1xf32>
    %55 = vector.broadcast %54 : vector<8x1xf32> to vector<8x8xf32>
    %56 = arith.subf %52, %55 : vector<8x8xf32>
    %57 = math.exp %56 : vector<8x8xf32>
    %cst_31 = arith.constant dense<0.000000e+00> : vector<8xf32>
    %58 = vector.multi_reduction <add>, %57, %cst_31 [1] : vector<8x8xf32> to vector<8xf32>
    %59 = vector.shape_cast %58 : vector<8xf32> to vector<8x1xf32>
    %60 = tpu.reciprocal %59 {approx = true} : vector<8x1xf32> -> vector<8x1xf32>
    %61 = vector.broadcast %60 : vector<8x1xf32> to vector<8x8xf32>
    %62 = arith.mulf %57, %61 : vector<8x8xf32>
    %63 = arith.truncf %62 : vector<8x8xf32> to vector<8x8xbf16>
    %64 = arith.truncf %45 : vector<8x16xf32> to vector<8x16xbf16>
    %cst_32 = arith.constant dense<0.000000e+00> : vector<8x16xf32>
    %65 = tpu.matmul %63, %64, %cst_32 {dimension_numbers = #tpu.dot_dimension_numbers<[1], [0], [0], [1], [0, 0, 1, 1], [], []>} : vector<8x8xbf16>, vector<8x16xbf16>, vector<8x16xf32> -> vector<8x16xf32>
    %66 = arith.truncf %65 : vector<8x16xf32> to vector<8x16xbf16>
    %c0_33 = arith.constant 0 : index
    %c0_34 = arith.constant 0 : index
    %67 = vector.load %arg9[%c0_33, %c0_34] : memref<32x32xbf16, #tpu.memory_space<vmem>>, vector<16x32xbf16>
    %cst_35 = arith.constant dense<0.000000e+00> : vector<8x32xf32>
    %68 = tpu.matmul %66, %67, %cst_35 {dimension_numbers = #tpu.dot_dimension_numbers<[1], [0], [0], [1], [0, 0, 1, 1], [], []>} : vector<8x16xbf16>, vector<16x32xbf16>, vector<8x32xf32> -> vector<8x32xf32>
    %69 = vector.broadcast %42 : vector<1x32xf32> to vector<8x32xf32>
    %70 = arith.addf %69, %68 : vector<8x32xf32>
    %71 = vector.extract_strided_slice %30 {offsets = [0, 16], sizes = [8, 16], strides = [1, 1]} : vector<8x32xf32> to vector<8x16xf32>
    %72 = vector.extract_strided_slice %40 {offsets = [0, 16], sizes = [8, 16], strides = [1, 1]} : vector<8x32xf32> to vector<8x16xf32>
    %73 = vector.extract_strided_slice %41 {offsets = [0, 16], sizes = [8, 16], strides = [1, 1]} : vector<8x32xf32> to vector<8x16xf32>
    %74 = arith.truncf %71 : vector<8x16xf32> to vector<8x16xbf16>
    %75 = arith.truncf %72 : vector<8x16xf32> to vector<8x16xbf16>
    %cst_36 = arith.constant dense<0.000000e+00> : vector<8x8xf32>
    %76 = tpu.matmul %74, %75, %cst_36 {dimension_numbers = #tpu.dot_dimension_numbers<[1], [1], [0], [0], [0, 0, 1, 0], [], []>} : vector<8x16xbf16>, vector<8x16xbf16>, vector<8x8xf32> -> vector<8x8xf32>
    %cst_37 = arith.constant 2.500000e-01 : f32
    %77 = vector.broadcast %cst_37 : f32 to vector<8x8xf32>
    %78 = arith.mulf %76, %77 : vector<8x8xf32>
    %79 = vector.broadcast %39 : vector<1x8xf32> to vector<8x8xf32>
    %80 = arith.addf %78, %79 : vector<8x8xf32>
    %cst_38 = arith.constant dense<0xFF800000> : vector<8xf32>
    %81 = vector.multi_reduction <maximumf>, %80, %cst_38 [1] : vector<8x8xf32> to vector<8xf32>
    %82 = vector.shape_cast %81 : vector<8xf32> to vector<8x1xf32>
    %83 = vector.broadcast %82 : vector<8x1xf32> to vector<8x8xf32>
    %84 = arith.subf %80, %83 : vector<8x8xf32>
    %85 = math.exp %84 : vector<8x8xf32>
    %cst_39 = arith.constant dense<0.000000e+00> : vector<8xf32>
    %86 = vector.multi_reduction <add>, %85, %cst_39 [1] : vector<8x8xf32> to vector<8xf32>
    %87 = vector.shape_cast %86 : vector<8xf32> to vector<8x1xf32>
    %88 = tpu.reciprocal %87 {approx = true} : vector<8x1xf32> -> vector<8x1xf32>
    %89 = vector.broadcast %88 : vector<8x1xf32> to vector<8x8xf32>
    %90 = arith.mulf %85, %89 : vector<8x8xf32>
    %91 = arith.truncf %90 : vector<8x8xf32> to vector<8x8xbf16>
    %92 = arith.truncf %73 : vector<8x16xf32> to vector<8x16xbf16>
    %cst_40 = arith.constant dense<0.000000e+00> : vector<8x16xf32>
    %93 = tpu.matmul %91, %92, %cst_40 {dimension_numbers = #tpu.dot_dimension_numbers<[1], [0], [0], [1], [0, 0, 1, 1], [], []>} : vector<8x8xbf16>, vector<8x16xbf16>, vector<8x16xf32> -> vector<8x16xf32>
    %94 = arith.truncf %93 : vector<8x16xf32> to vector<8x16xbf16>
    %c16 = arith.constant 16 : index
    %c0_41 = arith.constant 0 : index
    %95 = vector.load %arg9[%c16, %c0_41] : memref<32x32xbf16, #tpu.memory_space<vmem>>, vector<16x32xbf16>
    %cst_42 = arith.constant dense<0.000000e+00> : vector<8x32xf32>
    %96 = tpu.matmul %94, %95, %cst_42 {dimension_numbers = #tpu.dot_dimension_numbers<[1], [0], [0], [1], [0, 0, 1, 1], [], []>} : vector<8x16xbf16>, vector<16x32xbf16>, vector<8x32xf32> -> vector<8x32xf32>
    %97 = arith.addf %70, %96 : vector<8x32xf32>
    %98 = arith.addf %2, %97 : vector<8x32xf32>
    %99 = arith.truncf %98 : vector<8x32xf32> to vector<8x32xbf16>
    %c0_43 = arith.constant 0 : index
    %c0_44 = arith.constant 0 : index
    %c0_45 = arith.constant 0 : index
    %100 = vector.load %arg12[%c0_43, %c0_44, %c0_45] : memref<1x8x32xbf16, #tpu.memory_space<vmem>>, vector<1x8x32xbf16>
    %101 = vector.shape_cast %100 : vector<1x8x32xbf16> to vector<8x32xbf16>
    %102 = vector.shape_cast %99 : vector<8x32xbf16> to vector<1x8x32xbf16>
    tpu.vector_store %arg12[%c0_43, %c0_44, %c0_45], %102 {strides = array<i32>} : memref<1x8x32xbf16, #tpu.memory_space<vmem>>, vector<1x8x32xbf16>,
    return
  }
  func.func @transform_0(%arg0: i32) -> (i32, i32, i32) {
    %c0_i32 = arith.constant 0 : i32
    %c0_i32_0 = arith.constant 0 : i32
    %c0_i32_1 = arith.constant 0 : i32
    return %arg0, %c0_i32, %c0_i32_0 : i32, i32, i32
  }
  func.func @transform_1(%arg0: i32) -> (i32, i32, i32) {
    %c0_i32 = arith.constant 0 : i32
    %c0_i32_0 = arith.constant 0 : i32
    %c0_i32_1 = arith.constant 0 : i32
    return %arg0, %c0_i32, %c0_i32_0 : i32, i32, i32
  }
  func.func @transform_2(%arg0: i32) -> (i32, i32) {
    %c0_i32 = arith.constant 0 : i32
    %c0_i32_0 = arith.constant 0 : i32
    %c0_i32_1 = arith.constant 0 : i32
    return %c0_i32, %c0_i32_0 : i32, i32
  }
  func.func @transform_3(%arg0: i32) -> (i32, i32) {
    %c0_i32 = arith.constant 0 : i32
    %c0_i32_0 = arith.constant 0 : i32
    %c0_i32_1 = arith.constant 0 : i32
    return %c0_i32, %c0_i32_0 : i32, i32
  }
  func.func @transform_4(%arg0: i32) -> (i32, i32) {
    %c0_i32 = arith.constant 0 : i32
    %c0_i32_0 = arith.constant 0 : i32
    %c0_i32_1 = arith.constant 0 : i32
    return %c0_i32, %c0_i32_0 : i32, i32
  }
  func.func @transform_5(%arg0: i32) -> (i32, i32) {
    %c0_i32 = arith.constant 0 : i32
    %c0_i32_0 = arith.constant 0 : i32
    %c0_i32_1 = arith.constant 0 : i32
    return %c0_i32, %c0_i32_0 : i32, i32
  }
  func.func @transform_6(%arg0: i32) -> (i32, i32) {
    %c0_i32 = arith.constant 0 : i32
    %c0_i32_0 = arith.constant 0 : i32
    %c0_i32_1 = arith.constant 0 : i32
    return %c0_i32, %c0_i32_0 : i32, i32
  }
  func.func @transform_7(%arg0: i32) -> (i32, i32) {
    %c0_i32 = arith.constant 0 : i32
    %c0_i32_0 = arith.constant 0 : i32
    %c0_i32_1 = arith.constant 0 : i32
    return %c0_i32, %c0_i32_0 : i32, i32
  }
  func.func @transform_8(%arg0: i32) -> (i32, i32) {
    %c0_i32 = arith.constant 0 : i32
    %c0_i32_0 = arith.constant 0 : i32
    %c0_i32_1 = arith.constant 0 : i32
    return %c0_i32, %c0_i32_0 : i32, i32
  }
  func.func @transform_9(%arg0: i32) -> (i32, i32) {
    %c0_i32 = arith.constant 0 : i32
    %c0_i32_0 = arith.constant 0 : i32
    %c0_i32_1 = arith.constant 0 : i32
    return %c0_i32, %c0_i32_0 : i32, i32
  }
  func.func @transform_10(%arg0: i32) -> (i32, i32, i32) {
    %c0_i32 = arith.constant 0 : i32
    %c0_i32_0 = arith.constant 0 : i32
    %c0_i32_1 = arith.constant 0 : i32
    return %arg0, %c0_i32, %c0_i32_0 : i32, i32, i32
  }
  func.func @transform_11(%arg0: i32) -> (i32, i32, i32) {
    %c0_i32 = arith.constant 0 : i32
    %c0_i32_0 = arith.constant 0 : i32
    %c0_i32_1 = arith.constant 0 : i32
    return %arg0, %c0_i32, %c0_i32_0 : i32, i32, i32
  }
}

module attributes {stable_mosaic.version = 11 : i64} {
  func.func @_ffn_kernel(%arg0: i32, %arg1: memref<16x32xbf16, #tpu.memory_space<vmem>>, %arg2: memref<1x32xf32, #tpu.memory_space<vmem>>, %arg3: memref<1x32xf32, #tpu.memory_space<vmem>>, %arg4: memref<32x64xbf16, #tpu.memory_space<vmem>>, %arg5: memref<1x64xf32, #tpu.memory_space<vmem>>, %arg6: memref<64x32xbf16, #tpu.memory_space<vmem>>, %arg7: memref<1x32xf32, #tpu.memory_space<vmem>>, %arg8: memref<1x32xf32, #tpu.memory_space<vmem>>, %arg9: memref<1x32xf32, #tpu.memory_space<vmem>>, %arg10: memref<16x32xbf16, #tpu.memory_space<vmem>>) attributes {dimension_semantics = [#tpu.dimension_semantics<parallel>], iteration_bounds = array<i64: 1>, scalar_prefetch = 0 : i64, scratch_operands = 0 : i64, tpu.core_type = #tpu.core_type<tc>, window_params = [{transform_indices = @transform_0, window_bounds = array<i64: 16, 32>}, {pipeline_mode = #tpu.pipeline_mode<synchronous>, transform_indices = @transform_1, window_bounds = array<i64: 1, 32>}, {pipeline_mode = #tpu.pipeline_mode<synchronous>, transform_indices = @transform_2, window_bounds = array<i64: 1, 32>}, {pipeline_mode = #tpu.pipeline_mode<synchronous>, transform_indices = @transform_3, window_bounds = array<i64: 32, 64>}, {pipeline_mode = #tpu.pipeline_mode<synchronous>, transform_indices = @transform_4, window_bounds = array<i64: 1, 64>}, {pipeline_mode = #tpu.pipeline_mode<synchronous>, transform_indices = @transform_5, window_bounds = array<i64: 64, 32>}, {pipeline_mode = #tpu.pipeline_mode<synchronous>, transform_indices = @transform_6, window_bounds = array<i64: 1, 32>}, {pipeline_mode = #tpu.pipeline_mode<synchronous>, transform_indices = @transform_7, window_bounds = array<i64: 1, 32>}, {pipeline_mode = #tpu.pipeline_mode<synchronous>, transform_indices = @transform_8, window_bounds = array<i64: 1, 32>}, {transform_indices = @transform_9, window_bounds = array<i64: 16, 32>}]} {
    %c0 = arith.constant 0 : index
    %c0_0 = arith.constant 0 : index
    %0 = vector.load %arg1[%c0, %c0_0] : memref<16x32xbf16, #tpu.memory_space<vmem>>, vector<16x32xbf16>
    %1 = arith.extf %0 : vector<16x32xbf16> to vector<16x32xf32>
    %c0_1 = arith.constant 0 : index
    %c0_2 = arith.constant 0 : index
    %2 = vector.load %arg2[%c0_1, %c0_2] : memref<1x32xf32, #tpu.memory_space<vmem>>, vector<1x32xf32>
    %c0_3 = arith.constant 0 : index
    %c0_4 = arith.constant 0 : index
    %3 = vector.load %arg3[%c0_3, %c0_4] : memref<1x32xf32, #tpu.memory_space<vmem>>, vector<1x32xf32>
    %cst = arith.constant dense<0.000000e+00> : vector<16xf32>
    %4 = vector.multi_reduction <add>, %1, %cst [1] : vector<16x32xf32> to vector<16xf32>
    %5 = vector.shape_cast %4 : vector<16xf32> to vector<16x1xf32>
    %cst_5 = arith.constant 3.200000e+01 : f32
    %6 = vector.broadcast %cst_5 : f32 to vector<16x1xf32>
    %7 = arith.divf %5, %6 : vector<16x1xf32>
    %8 = vector.broadcast %7 : vector<16x1xf32> to vector<16x32xf32>
    %9 = arith.subf %1, %8 : vector<16x32xf32>
    %10 = arith.mulf %9, %9 : vector<16x32xf32>
    %cst_6 = arith.constant dense<0.000000e+00> : vector<16xf32>
    %11 = vector.multi_reduction <add>, %10, %cst_6 [1] : vector<16x32xf32> to vector<16xf32>
    %12 = vector.shape_cast %11 : vector<16xf32> to vector<16x1xf32>
    %cst_7 = arith.constant 3.200000e+01 : f32
    %13 = vector.broadcast %cst_7 : f32 to vector<16x1xf32>
    %14 = arith.divf %12, %13 : vector<16x1xf32>
    %cst_8 = arith.constant 9.99999974E-6 : f32
    %15 = vector.broadcast %cst_8 : f32 to vector<16x1xf32>
    %16 = arith.addf %14, %15 : vector<16x1xf32>
    %17 = math.rsqrt %16 : vector<16x1xf32>
    %18 = vector.broadcast %17 : vector<16x1xf32> to vector<16x32xf32>
    %19 = arith.mulf %9, %18 : vector<16x32xf32>
    %20 = vector.broadcast %2 : vector<1x32xf32> to vector<16x32xf32>
    %21 = arith.mulf %19, %20 : vector<16x32xf32>
    %22 = vector.broadcast %3 : vector<1x32xf32> to vector<16x32xf32>
    %23 = arith.addf %21, %22 : vector<16x32xf32>
    %24 = arith.truncf %23 : vector<16x32xf32> to vector<16x32xbf16>
    %c0_9 = arith.constant 0 : index
    %c0_10 = arith.constant 0 : index
    %25 = vector.load %arg4[%c0_9, %c0_10] : memref<32x64xbf16, #tpu.memory_space<vmem>>, vector<32x64xbf16>
    %cst_11 = arith.constant dense<0.000000e+00> : vector<16x64xf32>
    %26 = tpu.matmul %24, %25, %cst_11 {dimension_numbers = #tpu.dot_dimension_numbers<[1], [0], [0], [1], [0, 0, 1, 1], [], []>} : vector<16x32xbf16>, vector<32x64xbf16>, vector<16x64xf32> -> vector<16x64xf32>
    %c0_12 = arith.constant 0 : index
    %c0_13 = arith.constant 0 : index
    %27 = vector.load %arg5[%c0_12, %c0_13] : memref<1x64xf32, #tpu.memory_space<vmem>>, vector<1x64xf32>
    %28 = vector.broadcast %27 : vector<1x64xf32> to vector<16x64xf32>
    %29 = arith.addf %26, %28 : vector<16x64xf32>
    %30 = arith.negf %29 : vector<16x64xf32>
    %31 = math.exp %30 : vector<16x64xf32>
    %cst_14 = arith.constant 1.000000e+00 : f32
    %32 = vector.broadcast %cst_14 : f32 to vector<16x64xf32>
    %33 = arith.addf %32, %31 : vector<16x64xf32>
    %34 = arith.divf %32, %33 : vector<16x64xf32>
    %35 = arith.mulf %29, %34 : vector<16x64xf32>
    %36 = arith.truncf %35 : vector<16x64xf32> to vector<16x64xbf16>
    %c0_15 = arith.constant 0 : index
    %c0_16 = arith.constant 0 : index
    %37 = vector.load %arg6[%c0_15, %c0_16] : memref<64x32xbf16, #tpu.memory_space<vmem>>, vector<64x32xbf16>
    %cst_17 = arith.constant dense<0.000000e+00> : vector<16x32xf32>
    %38 = tpu.matmul %36, %37, %cst_17 {dimension_numbers = #tpu.dot_dimension_numbers<[1], [0], [0], [1], [0, 0, 1, 1], [], []>} : vector<16x64xbf16>, vector<64x32xbf16>, vector<16x32xf32> -> vector<16x32xf32>
    %c0_18 = arith.constant 0 : index
    %c0_19 = arith.constant 0 : index
    %39 = vector.load %arg7[%c0_18, %c0_19] : memref<1x32xf32, #tpu.memory_space<vmem>>, vector<1x32xf32>
    %40 = vector.broadcast %39 : vector<1x32xf32> to vector<16x32xf32>
    %41 = arith.addf %38, %40 : vector<16x32xf32>
    %cst_20 = arith.constant 5.000000e-01 : f32
    %42 = vector.broadcast %cst_20 : f32 to vector<16x32xf32>
    %43 = arith.mulf %42, %41 : vector<16x32xf32>
    %44 = arith.addf %1, %43 : vector<16x32xf32>
    %c0_21 = arith.constant 0 : index
    %c0_22 = arith.constant 0 : index
    %45 = vector.load %arg8[%c0_21, %c0_22] : memref<1x32xf32, #tpu.memory_space<vmem>>, vector<1x32xf32>
    %c0_23 = arith.constant 0 : index
    %c0_24 = arith.constant 0 : index
    %46 = vector.load %arg9[%c0_23, %c0_24] : memref<1x32xf32, #tpu.memory_space<vmem>>, vector<1x32xf32>
    %cst_25 = arith.constant dense<0.000000e+00> : vector<16xf32>
    %47 = vector.multi_reduction <add>, %44, %cst_25 [1] : vector<16x32xf32> to vector<16xf32>
    %48 = vector.shape_cast %47 : vector<16xf32> to vector<16x1xf32>
    %cst_26 = arith.constant 3.200000e+01 : f32
    %49 = vector.broadcast %cst_26 : f32 to vector<16x1xf32>
    %50 = arith.divf %48, %49 : vector<16x1xf32>
    %51 = vector.broadcast %50 : vector<16x1xf32> to vector<16x32xf32>
    %52 = arith.subf %44, %51 : vector<16x32xf32>
    %53 = arith.mulf %52, %52 : vector<16x32xf32>
    %cst_27 = arith.constant dense<0.000000e+00> : vector<16xf32>
    %54 = vector.multi_reduction <add>, %53, %cst_27 [1] : vector<16x32xf32> to vector<16xf32>
    %55 = vector.shape_cast %54 : vector<16xf32> to vector<16x1xf32>
    %cst_28 = arith.constant 3.200000e+01 : f32
    %56 = vector.broadcast %cst_28 : f32 to vector<16x1xf32>
    %57 = arith.divf %55, %56 : vector<16x1xf32>
    %cst_29 = arith.constant 9.99999974E-6 : f32
    %58 = vector.broadcast %cst_29 : f32 to vector<16x1xf32>
    %59 = arith.addf %57, %58 : vector<16x1xf32>
    %60 = math.rsqrt %59 : vector<16x1xf32>
    %61 = vector.broadcast %60 : vector<16x1xf32> to vector<16x32xf32>
    %62 = arith.mulf %52, %61 : vector<16x32xf32>
    %63 = vector.broadcast %45 : vector<1x32xf32> to vector<16x32xf32>
    %64 = arith.mulf %62, %63 : vector<16x32xf32>
    %65 = vector.broadcast %46 : vector<1x32xf32> to vector<16x32xf32>
    %66 = arith.addf %64, %65 : vector<16x32xf32>
    %67 = arith.truncf %66 : vector<16x32xf32> to vector<16x32xbf16>
    %c0_30 = arith.constant 0 : index
    %c0_31 = arith.constant 0 : index
    %68 = vector.load %arg10[%c0_30, %c0_31] : memref<16x32xbf16, #tpu.memory_space<vmem>>, vector<16x32xbf16>
    tpu.vector_store %arg10[%c0_30, %c0_31], %67 {strides = array<i32>} : memref<16x32xbf16, #tpu.memory_space<vmem>>, vector<16x32xbf16>,
    return
  }
  func.func @transform_0(%arg0: i32) -> (i32, i32) {
    %c0_i32 = arith.constant 0 : i32
    %c0_i32_0 = arith.constant 0 : i32
    return %arg0, %c0_i32 : i32, i32
  }
  func.func @transform_1(%arg0: i32) -> (i32, i32) {
    %c0_i32 = arith.constant 0 : i32
    %c0_i32_0 = arith.constant 0 : i32
    %c0_i32_1 = arith.constant 0 : i32
    return %c0_i32, %c0_i32_0 : i32, i32
  }
  func.func @transform_2(%arg0: i32) -> (i32, i32) {
    %c0_i32 = arith.constant 0 : i32
    %c0_i32_0 = arith.constant 0 : i32
    %c0_i32_1 = arith.constant 0 : i32
    return %c0_i32, %c0_i32_0 : i32, i32
  }
  func.func @transform_3(%arg0: i32) -> (i32, i32) {
    %c0_i32 = arith.constant 0 : i32
    %c0_i32_0 = arith.constant 0 : i32
    %c0_i32_1 = arith.constant 0 : i32
    return %c0_i32, %c0_i32_0 : i32, i32
  }
  func.func @transform_4(%arg0: i32) -> (i32, i32) {
    %c0_i32 = arith.constant 0 : i32
    %c0_i32_0 = arith.constant 0 : i32
    %c0_i32_1 = arith.constant 0 : i32
    return %c0_i32, %c0_i32_0 : i32, i32
  }
  func.func @transform_5(%arg0: i32) -> (i32, i32) {
    %c0_i32 = arith.constant 0 : i32
    %c0_i32_0 = arith.constant 0 : i32
    %c0_i32_1 = arith.constant 0 : i32
    return %c0_i32, %c0_i32_0 : i32, i32
  }
  func.func @transform_6(%arg0: i32) -> (i32, i32) {
    %c0_i32 = arith.constant 0 : i32
    %c0_i32_0 = arith.constant 0 : i32
    %c0_i32_1 = arith.constant 0 : i32
    return %c0_i32, %c0_i32_0 : i32, i32
  }
  func.func @transform_7(%arg0: i32) -> (i32, i32) {
    %c0_i32 = arith.constant 0 : i32
    %c0_i32_0 = arith.constant 0 : i32
    %c0_i32_1 = arith.constant 0 : i32
    return %c0_i32, %c0_i32_0 : i32, i32
  }
  func.func @transform_8(%arg0: i32) -> (i32, i32) {
    %c0_i32 = arith.constant 0 : i32
    %c0_i32_0 = arith.constant 0 : i32
    %c0_i32_1 = arith.constant 0 : i32
    return %c0_i32, %c0_i32_0 : i32, i32
  }
  func.func @transform_9(%arg0: i32) -> (i32, i32) {
    %c0_i32 = arith.constant 0 : i32
    %c0_i32_0 = arith.constant 0 : i32
    return %arg0, %c0_i32 : i32, i32
  }
}

module attributes {stable_mosaic.version = 11 : i64} {
  func.func @_ln_dual_kernel(%arg0: i32, %arg1: memref<16x32xbf16, #tpu.memory_space<vmem>>, %arg2: memref<1x32xf32, #tpu.memory_space<vmem>>, %arg3: memref<1x32xf32, #tpu.memory_space<vmem>>, %arg4: memref<32x3xbf16, #tpu.memory_space<vmem>>, %arg5: memref<1x3xf32, #tpu.memory_space<vmem>>, %arg6: memref<16x32xbf16, #tpu.memory_space<vmem>>, %arg7: memref<16x3xf32, #tpu.memory_space<vmem>>) attributes {dimension_semantics = [#tpu.dimension_semantics<parallel>], iteration_bounds = array<i64: 1>, scalar_prefetch = 0 : i64, scratch_operands = 0 : i64, tpu.core_type = #tpu.core_type<tc>, window_params = [{transform_indices = @transform_0, window_bounds = array<i64: 16, 32>}, {pipeline_mode = #tpu.pipeline_mode<synchronous>, transform_indices = @transform_1, window_bounds = array<i64: 1, 32>}, {pipeline_mode = #tpu.pipeline_mode<synchronous>, transform_indices = @transform_2, window_bounds = array<i64: 1, 32>}, {pipeline_mode = #tpu.pipeline_mode<synchronous>, transform_indices = @transform_3, window_bounds = array<i64: 32, 3>}, {pipeline_mode = #tpu.pipeline_mode<synchronous>, transform_indices = @transform_4, window_bounds = array<i64: 1, 3>}, {transform_indices = @transform_5, window_bounds = array<i64: 16, 32>}, {transform_indices = @transform_6, window_bounds = array<i64: 16, 3>}]} {
    %c0 = arith.constant 0 : index
    %c0_0 = arith.constant 0 : index
    %0 = vector.load %arg1[%c0, %c0_0] : memref<16x32xbf16, #tpu.memory_space<vmem>>, vector<16x32xbf16>
    %1 = arith.extf %0 : vector<16x32xbf16> to vector<16x32xf32>
    %c0_1 = arith.constant 0 : index
    %c0_2 = arith.constant 0 : index
    %2 = vector.load %arg2[%c0_1, %c0_2] : memref<1x32xf32, #tpu.memory_space<vmem>>, vector<1x32xf32>
    %c0_3 = arith.constant 0 : index
    %c0_4 = arith.constant 0 : index
    %3 = vector.load %arg3[%c0_3, %c0_4] : memref<1x32xf32, #tpu.memory_space<vmem>>, vector<1x32xf32>
    %cst = arith.constant dense<0.000000e+00> : vector<16xf32>
    %4 = vector.multi_reduction <add>, %1, %cst [1] : vector<16x32xf32> to vector<16xf32>
    %5 = vector.shape_cast %4 : vector<16xf32> to vector<16x1xf32>
    %cst_5 = arith.constant 3.200000e+01 : f32
    %6 = vector.broadcast %cst_5 : f32 to vector<16x1xf32>
    %7 = arith.divf %5, %6 : vector<16x1xf32>
    %8 = vector.broadcast %7 : vector<16x1xf32> to vector<16x32xf32>
    %9 = arith.subf %1, %8 : vector<16x32xf32>
    %10 = arith.mulf %9, %9 : vector<16x32xf32>
    %cst_6 = arith.constant dense<0.000000e+00> : vector<16xf32>
    %11 = vector.multi_reduction <add>, %10, %cst_6 [1] : vector<16x32xf32> to vector<16xf32>
    %12 = vector.shape_cast %11 : vector<16xf32> to vector<16x1xf32>
    %cst_7 = arith.constant 3.200000e+01 : f32
    %13 = vector.broadcast %cst_7 : f32 to vector<16x1xf32>
    %14 = arith.divf %12, %13 : vector<16x1xf32>
    %cst_8 = arith.constant 9.99999974E-6 : f32
    %15 = vector.broadcast %cst_8 : f32 to vector<16x1xf32>
    %16 = arith.addf %14, %15 : vector<16x1xf32>
    %17 = math.rsqrt %16 : vector<16x1xf32>
    %18 = vector.broadcast %17 : vector<16x1xf32> to vector<16x32xf32>
    %19 = arith.mulf %9, %18 : vector<16x32xf32>
    %20 = vector.broadcast %2 : vector<1x32xf32> to vector<16x32xf32>
    %21 = arith.mulf %19, %20 : vector<16x32xf32>
    %22 = vector.broadcast %3 : vector<1x32xf32> to vector<16x32xf32>
    %23 = arith.addf %21, %22 : vector<16x32xf32>
    %24 = arith.truncf %23 : vector<16x32xf32> to vector<16x32xbf16>
    %c0_9 = arith.constant 0 : index
    %c0_10 = arith.constant 0 : index
    %25 = vector.load %arg6[%c0_9, %c0_10] : memref<16x32xbf16, #tpu.memory_space<vmem>>, vector<16x32xbf16>
    tpu.vector_store %arg6[%c0_9, %c0_10], %24 {strides = array<i32>} : memref<16x32xbf16, #tpu.memory_space<vmem>>, vector<16x32xbf16>,
    %26 = arith.truncf %23 : vector<16x32xf32> to vector<16x32xbf16>
    %c0_11 = arith.constant 0 : index
    %c0_12 = arith.constant 0 : index
    %27 = vector.load %arg4[%c0_11, %c0_12] : memref<32x3xbf16, #tpu.memory_space<vmem>>, vector<32x3xbf16>
    %cst_13 = arith.constant dense<0.000000e+00> : vector<16x3xf32>
    %28 = tpu.matmul %26, %27, %cst_13 {dimension_numbers = #tpu.dot_dimension_numbers<[1], [0], [0], [1], [0, 0, 1, 1], [], []>} : vector<16x32xbf16>, vector<32x3xbf16>, vector<16x3xf32> -> vector<16x3xf32>
    %c0_14 = arith.constant 0 : index
    %c0_15 = arith.constant 0 : index
    %29 = vector.load %arg5[%c0_14, %c0_15] : memref<1x3xf32, #tpu.memory_space<vmem>>, vector<1x3xf32>
    %30 = vector.broadcast %29 : vector<1x3xf32> to vector<16x3xf32>
    %31 = arith.addf %28, %30 : vector<16x3xf32>
    %c0_16 = arith.constant 0 : index
    %c0_17 = arith.constant 0 : index
    %32 = vector.load %arg7[%c0_16, %c0_17] : memref<16x3xf32, #tpu.memory_space<vmem>>, vector<16x3xf32>
    tpu.vector_store %arg7[%c0_16, %c0_17], %31 {strides = array<i32>} : memref<16x3xf32, #tpu.memory_space<vmem>>, vector<16x3xf32>,
    return
  }
  func.func @transform_0(%arg0: i32) -> (i32, i32) {
    %c0_i32 = arith.constant 0 : i32
    %c0_i32_0 = arith.constant 0 : i32
    return %arg0, %c0_i32 : i32, i32
  }
  func.func @transform_1(%arg0: i32) -> (i32, i32) {
    %c0_i32 = arith.constant 0 : i32
    %c0_i32_0 = arith.constant 0 : i32
    %c0_i32_1 = arith.constant 0 : i32
    return %c0_i32, %c0_i32_0 : i32, i32
  }
  func.func @transform_2(%arg0: i32) -> (i32, i32) {
    %c0_i32 = arith.constant 0 : i32
    %c0_i32_0 = arith.constant 0 : i32
    %c0_i32_1 = arith.constant 0 : i32
    return %c0_i32, %c0_i32_0 : i32, i32
  }
  func.func @transform_3(%arg0: i32) -> (i32, i32) {
    %c0_i32 = arith.constant 0 : i32
    %c0_i32_0 = arith.constant 0 : i32
    %c0_i32_1 = arith.constant 0 : i32
    return %c0_i32, %c0_i32_0 : i32, i32
  }
  func.func @transform_4(%arg0: i32) -> (i32, i32) {
    %c0_i32 = arith.constant 0 : i32
    %c0_i32_0 = arith.constant 0 : i32
    %c0_i32_1 = arith.constant 0 : i32
    return %c0_i32, %c0_i32_0 : i32, i32
  }
  func.func @transform_5(%arg0: i32) -> (i32, i32) {
    %c0_i32 = arith.constant 0 : i32
    %c0_i32_0 = arith.constant 0 : i32
    return %arg0, %c0_i32 : i32, i32
  }
  func.func @transform_6(%arg0: i32) -> (i32, i32) {
    %c0_i32 = arith.constant 0 : i32
    %c0_i32_0 = arith.constant 0 : i32
    return %arg0, %c0_i32 : i32, i32
  }
}

module attributes {stable_mosaic.version = 11 : i64} {
  func.func @_hidden_aux_kernel(%arg0: i32, %arg1: memref<1x8x32xbf16, #tpu.memory_space<vmem>>, %arg2: memref<1x12x3xbf16, #tpu.memory_space<vmem>>, %arg3: memref<32x32xbf16, #tpu.memory_space<vmem>>, %arg4: memref<1x32xf32, #tpu.memory_space<vmem>>, %arg5: memref<5x3x32xbf16, #tpu.memory_space<vmem>>, %arg6: memref<1x32xf32, #tpu.memory_space<vmem>>, %arg7: memref<1x8x32xbf16, #tpu.memory_space<vmem>>) attributes {dimension_semantics = [#tpu.dimension_semantics<parallel>], iteration_bounds = array<i64: 2>, scalar_prefetch = 0 : i64, scratch_operands = 0 : i64, tpu.core_type = #tpu.core_type<tc>, window_params = [{transform_indices = @transform_0, window_bounds = array<i64: 1, 8, 32>}, {transform_indices = @transform_1, window_bounds = array<i64: 1, 12, 3>}, {pipeline_mode = #tpu.pipeline_mode<synchronous>, transform_indices = @transform_2, window_bounds = array<i64: 32, 32>}, {pipeline_mode = #tpu.pipeline_mode<synchronous>, transform_indices = @transform_3, window_bounds = array<i64: 1, 32>}, {pipeline_mode = #tpu.pipeline_mode<synchronous>, transform_indices = @transform_4, window_bounds = array<i64: 5, 3, 32>}, {pipeline_mode = #tpu.pipeline_mode<synchronous>, transform_indices = @transform_5, window_bounds = array<i64: 1, 32>}, {transform_indices = @transform_6, window_bounds = array<i64: 1, 8, 32>}]} {
    %c0 = arith.constant 0 : index
    %c0_0 = arith.constant 0 : index
    %c0_1 = arith.constant 0 : index
    %0 = vector.load %arg1[%c0, %c0_0, %c0_1] : memref<1x8x32xbf16, #tpu.memory_space<vmem>>, vector<1x8x32xbf16>
    %1 = vector.shape_cast %0 : vector<1x8x32xbf16> to vector<8x32xbf16>
    %c0_2 = arith.constant 0 : index
    %c0_3 = arith.constant 0 : index
    %2 = vector.load %arg3[%c0_2, %c0_3] : memref<32x32xbf16, #tpu.memory_space<vmem>>, vector<32x32xbf16>
    %cst = arith.constant dense<0.000000e+00> : vector<8x32xf32>
    %3 = tpu.matmul %1, %2, %cst {dimension_numbers = #tpu.dot_dimension_numbers<[1], [0], [0], [1], [0, 0, 1, 1], [], []>} : vector<8x32xbf16>, vector<32x32xbf16>, vector<8x32xf32> -> vector<8x32xf32>
    %c0_4 = arith.constant 0 : index
    %c0_5 = arith.constant 0 : index
    %c0_6 = arith.constant 0 : index
    %4 = vector.load %arg2[%c0_4, %c0_5, %c0_6] : memref<1x12x3xbf16, #tpu.memory_space<vmem>>, vector<1x8x3xbf16>
    %5 = vector.shape_cast %4 : vector<1x8x3xbf16> to vector<8x3xbf16>
    %c0_7 = arith.constant 0 : index
    %c0_8 = arith.constant 0 : index
    %c0_9 = arith.constant 0 : index
    %6 = vector.load %arg5[%c0_7, %c0_8, %c0_9] : memref<5x3x32xbf16, #tpu.memory_space<vmem>>, vector<1x3x32xbf16>
    %7 = vector.shape_cast %6 : vector<1x3x32xbf16> to vector<3x32xbf16>
    %cst_10 = arith.constant dense<0.000000e+00> : vector<8x32xf32>
    %8 = tpu.matmul %5, %7, %cst_10 {dimension_numbers = #tpu.dot_dimension_numbers<[1], [0], [0], [1], [0, 0, 1, 1], [], []>} : vector<8x3xbf16>, vector<3x32xbf16>, vector<8x32xf32> -> vector<8x32xf32>
    %9 = arith.addf %3, %8 : vector<8x32xf32>
    %c0_11 = arith.constant 0 : index
    %c1 = arith.constant 1 : index
    %c0_12 = arith.constant 0 : index
    %10 = vector.load %arg2[%c0_11, %c1, %c0_12] : memref<1x12x3xbf16, #tpu.memory_space<vmem>>, vector<1x8x3xbf16>
    %11 = vector.shape_cast %10 : vector<1x8x3xbf16> to vector<8x3xbf16>
    %c1_13 = arith.constant 1 : index
    %c0_14 = arith.constant 0 : index
    %c0_15 = arith.constant 0 : index
    %12 = vector.load %arg5[%c1_13, %c0_14, %c0_15] : memref<5x3x32xbf16, #tpu.memory_space<vmem>>, vector<1x3x32xbf16>
    %13 = vector.shape_cast %12 : vector<1x3x32xbf16> to vector<3x32xbf16>
    %cst_16 = arith.constant dense<0.000000e+00> : vector<8x32xf32>
    %14 = tpu.matmul %11, %13, %cst_16 {dimension_numbers = #tpu.dot_dimension_numbers<[1], [0], [0], [1], [0, 0, 1, 1], [], []>} : vector<8x3xbf16>, vector<3x32xbf16>, vector<8x32xf32> -> vector<8x32xf32>
    %15 = arith.addf %9, %14 : vector<8x32xf32>
    %c0_17 = arith.constant 0 : index
    %c2 = arith.constant 2 : index
    %c0_18 = arith.constant 0 : index
    %16 = vector.load %arg2[%c0_17, %c2, %c0_18] : memref<1x12x3xbf16, #tpu.memory_space<vmem>>, vector<1x8x3xbf16>
    %17 = vector.shape_cast %16 : vector<1x8x3xbf16> to vector<8x3xbf16>
    %c2_19 = arith.constant 2 : index
    %c0_20 = arith.constant 0 : index
    %c0_21 = arith.constant 0 : index
    %18 = vector.load %arg5[%c2_19, %c0_20, %c0_21] : memref<5x3x32xbf16, #tpu.memory_space<vmem>>, vector<1x3x32xbf16>
    %19 = vector.shape_cast %18 : vector<1x3x32xbf16> to vector<3x32xbf16>
    %cst_22 = arith.constant dense<0.000000e+00> : vector<8x32xf32>
    %20 = tpu.matmul %17, %19, %cst_22 {dimension_numbers = #tpu.dot_dimension_numbers<[1], [0], [0], [1], [0, 0, 1, 1], [], []>} : vector<8x3xbf16>, vector<3x32xbf16>, vector<8x32xf32> -> vector<8x32xf32>
    %21 = arith.addf %15, %20 : vector<8x32xf32>
    %c0_23 = arith.constant 0 : index
    %c3 = arith.constant 3 : index
    %c0_24 = arith.constant 0 : index
    %22 = vector.load %arg2[%c0_23, %c3, %c0_24] : memref<1x12x3xbf16, #tpu.memory_space<vmem>>, vector<1x8x3xbf16>
    %23 = vector.shape_cast %22 : vector<1x8x3xbf16> to vector<8x3xbf16>
    %c3_25 = arith.constant 3 : index
    %c0_26 = arith.constant 0 : index
    %c0_27 = arith.constant 0 : index
    %24 = vector.load %arg5[%c3_25, %c0_26, %c0_27] : memref<5x3x32xbf16, #tpu.memory_space<vmem>>, vector<1x3x32xbf16>
    %25 = vector.shape_cast %24 : vector<1x3x32xbf16> to vector<3x32xbf16>
    %cst_28 = arith.constant dense<0.000000e+00> : vector<8x32xf32>
    %26 = tpu.matmul %23, %25, %cst_28 {dimension_numbers = #tpu.dot_dimension_numbers<[1], [0], [0], [1], [0, 0, 1, 1], [], []>} : vector<8x3xbf16>, vector<3x32xbf16>, vector<8x32xf32> -> vector<8x32xf32>
    %27 = arith.addf %21, %26 : vector<8x32xf32>
    %c0_29 = arith.constant 0 : index
    %c4 = arith.constant 4 : index
    %c0_30 = arith.constant 0 : index
    %28 = vector.load %arg2[%c0_29, %c4, %c0_30] : memref<1x12x3xbf16, #tpu.memory_space<vmem>>, vector<1x8x3xbf16>
    %29 = vector.shape_cast %28 : vector<1x8x3xbf16> to vector<8x3xbf16>
    %c4_31 = arith.constant 4 : index
    %c0_32 = arith.constant 0 : index
    %c0_33 = arith.constant 0 : index
    %30 = vector.load %arg5[%c4_31, %c0_32, %c0_33] : memref<5x3x32xbf16, #tpu.memory_space<vmem>>, vector<1x3x32xbf16>
    %31 = vector.shape_cast %30 : vector<1x3x32xbf16> to vector<3x32xbf16>
    %cst_34 = arith.constant dense<0.000000e+00> : vector<8x32xf32>
    %32 = tpu.matmul %29, %31, %cst_34 {dimension_numbers = #tpu.dot_dimension_numbers<[1], [0], [0], [1], [0, 0, 1, 1], [], []>} : vector<8x3xbf16>, vector<3x32xbf16>, vector<8x32xf32> -> vector<8x32xf32>
    %33 = arith.addf %27, %32 : vector<8x32xf32>
    %c0_35 = arith.constant 0 : index
    %c0_36 = arith.constant 0 : index
    %34 = vector.load %arg4[%c0_35, %c0_36] : memref<1x32xf32, #tpu.memory_space<vmem>>, vector<1x32xf32>
    %35 = vector.broadcast %34 : vector<1x32xf32> to vector<8x32xf32>
    %36 = arith.addf %33, %35 : vector<8x32xf32>
    %c0_37 = arith.constant 0 : index
    %c0_38 = arith.constant 0 : index
    %37 = vector.load %arg6[%c0_37, %c0_38] : memref<1x32xf32, #tpu.memory_space<vmem>>, vector<1x32xf32>
    %38 = vector.broadcast %37 : vector<1x32xf32> to vector<8x32xf32>
    %39 = arith.addf %36, %38 : vector<8x32xf32>
    %40 = arith.truncf %39 : vector<8x32xf32> to vector<8x32xbf16>
    %c0_39 = arith.constant 0 : index
    %c0_40 = arith.constant 0 : index
    %c0_41 = arith.constant 0 : index
    %41 = vector.load %arg7[%c0_39, %c0_40, %c0_41] : memref<1x8x32xbf16, #tpu.memory_space<vmem>>, vector<1x8x32xbf16>
    %42 = vector.shape_cast %41 : vector<1x8x32xbf16> to vector<8x32xbf16>
    %43 = vector.shape_cast %40 : vector<8x32xbf16> to vector<1x8x32xbf16>
    tpu.vector_store %arg7[%c0_39, %c0_40, %c0_41], %43 {strides = array<i32>} : memref<1x8x32xbf16, #tpu.memory_space<vmem>>, vector<1x8x32xbf16>,
    return
  }
  func.func @transform_0(%arg0: i32) -> (i32, i32, i32) {
    %c0_i32 = arith.constant 0 : i32
    %c0_i32_0 = arith.constant 0 : i32
    %c0_i32_1 = arith.constant 0 : i32
    return %arg0, %c0_i32, %c0_i32_0 : i32, i32, i32
  }
  func.func @transform_1(%arg0: i32) -> (i32, i32, i32) {
    %c0_i32 = arith.constant 0 : i32
    %c0_i32_0 = arith.constant 0 : i32
    %c0_i32_1 = arith.constant 0 : i32
    return %arg0, %c0_i32, %c0_i32_0 : i32, i32, i32
  }
  func.func @transform_2(%arg0: i32) -> (i32, i32) {
    %c0_i32 = arith.constant 0 : i32
    %c0_i32_0 = arith.constant 0 : i32
    %c0_i32_1 = arith.constant 0 : i32
    return %c0_i32, %c0_i32_0 : i32, i32
  }
  func.func @transform_3(%arg0: i32) -> (i32, i32) {
    %c0_i32 = arith.constant 0 : i32
    %c0_i32_0 = arith.constant 0 : i32
    %c0_i32_1 = arith.constant 0 : i32
    return %c0_i32, %c0_i32_0 : i32, i32
  }
  func.func @transform_4(%arg0: i32) -> (i32, i32, i32) {
    %c0_i32 = arith.constant 0 : i32
    %c0_i32_0 = arith.constant 0 : i32
    %c0_i32_1 = arith.constant 0 : i32
    %c0_i32_2 = arith.constant 0 : i32
    return %c0_i32, %c0_i32_0, %c0_i32_1 : i32, i32, i32
  }
  func.func @transform_5(%arg0: i32) -> (i32, i32) {
    %c0_i32 = arith.constant 0 : i32
    %c0_i32_0 = arith.constant 0 : i32
    %c0_i32_1 = arith.constant 0 : i32
    return %c0_i32, %c0_i32_0 : i32, i32
  }
  func.func @transform_6(%arg0: i32) -> (i32, i32, i32) {
    %c0_i32 = arith.constant 0 : i32
    %c0_i32_0 = arith.constant 0 : i32
    %c0_i32_1 = arith.constant 0 : i32
    return %arg0, %c0_i32, %c0_i32_0 : i32, i32, i32
  }
}

module attributes {stable_mosaic.version = 11 : i64} {
  func.func @_ln_dual_kernel(%arg0: i32, %arg1: memref<16x32xbf16, #tpu.memory_space<vmem>>, %arg2: memref<1x32xf32, #tpu.memory_space<vmem>>, %arg3: memref<1x32xf32, #tpu.memory_space<vmem>>, %arg4: memref<32x10xbf16, #tpu.memory_space<vmem>>, %arg5: memref<1x10xf32, #tpu.memory_space<vmem>>, %arg6: memref<16x32xf32, #tpu.memory_space<vmem>>, %arg7: memref<16x10xf32, #tpu.memory_space<vmem>>) attributes {dimension_semantics = [#tpu.dimension_semantics<parallel>], iteration_bounds = array<i64: 1>, scalar_prefetch = 0 : i64, scratch_operands = 0 : i64, tpu.core_type = #tpu.core_type<tc>, window_params = [{transform_indices = @transform_0, window_bounds = array<i64: 16, 32>}, {pipeline_mode = #tpu.pipeline_mode<synchronous>, transform_indices = @transform_1, window_bounds = array<i64: 1, 32>}, {pipeline_mode = #tpu.pipeline_mode<synchronous>, transform_indices = @transform_2, window_bounds = array<i64: 1, 32>}, {pipeline_mode = #tpu.pipeline_mode<synchronous>, transform_indices = @transform_3, window_bounds = array<i64: 32, 10>}, {pipeline_mode = #tpu.pipeline_mode<synchronous>, transform_indices = @transform_4, window_bounds = array<i64: 1, 10>}, {transform_indices = @transform_5, window_bounds = array<i64: 16, 32>}, {transform_indices = @transform_6, window_bounds = array<i64: 16, 10>}]} {
    %c0 = arith.constant 0 : index
    %c0_0 = arith.constant 0 : index
    %0 = vector.load %arg1[%c0, %c0_0] : memref<16x32xbf16, #tpu.memory_space<vmem>>, vector<16x32xbf16>
    %1 = arith.extf %0 : vector<16x32xbf16> to vector<16x32xf32>
    %c0_1 = arith.constant 0 : index
    %c0_2 = arith.constant 0 : index
    %2 = vector.load %arg2[%c0_1, %c0_2] : memref<1x32xf32, #tpu.memory_space<vmem>>, vector<1x32xf32>
    %c0_3 = arith.constant 0 : index
    %c0_4 = arith.constant 0 : index
    %3 = vector.load %arg3[%c0_3, %c0_4] : memref<1x32xf32, #tpu.memory_space<vmem>>, vector<1x32xf32>
    %cst = arith.constant dense<0.000000e+00> : vector<16xf32>
    %4 = vector.multi_reduction <add>, %1, %cst [1] : vector<16x32xf32> to vector<16xf32>
    %5 = vector.shape_cast %4 : vector<16xf32> to vector<16x1xf32>
    %cst_5 = arith.constant 3.200000e+01 : f32
    %6 = vector.broadcast %cst_5 : f32 to vector<16x1xf32>
    %7 = arith.divf %5, %6 : vector<16x1xf32>
    %8 = vector.broadcast %7 : vector<16x1xf32> to vector<16x32xf32>
    %9 = arith.subf %1, %8 : vector<16x32xf32>
    %10 = arith.mulf %9, %9 : vector<16x32xf32>
    %cst_6 = arith.constant dense<0.000000e+00> : vector<16xf32>
    %11 = vector.multi_reduction <add>, %10, %cst_6 [1] : vector<16x32xf32> to vector<16xf32>
    %12 = vector.shape_cast %11 : vector<16xf32> to vector<16x1xf32>
    %cst_7 = arith.constant 3.200000e+01 : f32
    %13 = vector.broadcast %cst_7 : f32 to vector<16x1xf32>
    %14 = arith.divf %12, %13 : vector<16x1xf32>
    %cst_8 = arith.constant 9.99999974E-6 : f32
    %15 = vector.broadcast %cst_8 : f32 to vector<16x1xf32>
    %16 = arith.addf %14, %15 : vector<16x1xf32>
    %17 = math.rsqrt %16 : vector<16x1xf32>
    %18 = vector.broadcast %17 : vector<16x1xf32> to vector<16x32xf32>
    %19 = arith.mulf %9, %18 : vector<16x32xf32>
    %20 = vector.broadcast %2 : vector<1x32xf32> to vector<16x32xf32>
    %21 = arith.mulf %19, %20 : vector<16x32xf32>
    %22 = vector.broadcast %3 : vector<1x32xf32> to vector<16x32xf32>
    %23 = arith.addf %21, %22 : vector<16x32xf32>
    %c0_9 = arith.constant 0 : index
    %c0_10 = arith.constant 0 : index
    %24 = vector.load %arg6[%c0_9, %c0_10] : memref<16x32xf32, #tpu.memory_space<vmem>>, vector<16x32xf32>
    tpu.vector_store %arg6[%c0_9, %c0_10], %23 {strides = array<i32>} : memref<16x32xf32, #tpu.memory_space<vmem>>, vector<16x32xf32>,
    %25 = arith.truncf %23 : vector<16x32xf32> to vector<16x32xbf16>
    %c0_11 = arith.constant 0 : index
    %c0_12 = arith.constant 0 : index
    %26 = vector.load %arg4[%c0_11, %c0_12] : memref<32x10xbf16, #tpu.memory_space<vmem>>, vector<32x10xbf16>
    %cst_13 = arith.constant dense<0.000000e+00> : vector<16x10xf32>
    %27 = tpu.matmul %25, %26, %cst_13 {dimension_numbers = #tpu.dot_dimension_numbers<[1], [0], [0], [1], [0, 0, 1, 1], [], []>} : vector<16x32xbf16>, vector<32x10xbf16>, vector<16x10xf32> -> vector<16x10xf32>
    %c0_14 = arith.constant 0 : index
    %c0_15 = arith.constant 0 : index
    %28 = vector.load %arg5[%c0_14, %c0_15] : memref<1x10xf32, #tpu.memory_space<vmem>>, vector<1x10xf32>
    %29 = vector.broadcast %28 : vector<1x10xf32> to vector<16x10xf32>
    %30 = arith.addf %27, %29 : vector<16x10xf32>
    %c0_16 = arith.constant 0 : index
    %c0_17 = arith.constant 0 : index
    %31 = vector.load %arg7[%c0_16, %c0_17] : memref<16x10xf32, #tpu.memory_space<vmem>>, vector<16x10xf32>
    tpu.vector_store %arg7[%c0_16, %c0_17], %30 {strides = array<i32>} : memref<16x10xf32, #tpu.memory_space<vmem>>, vector<16x10xf32>,
    return
  }
  func.func @transform_0(%arg0: i32) -> (i32, i32) {
    %c0_i32 = arith.constant 0 : i32
    %c0_i32_0 = arith.constant 0 : i32
    return %arg0, %c0_i32 : i32, i32
  }
  func.func @transform_1(%arg0: i32) -> (i32, i32) {
    %c0_i32 = arith.constant 0 : i32
    %c0_i32_0 = arith.constant 0 : i32
    %c0_i32_1 = arith.constant 0 : i32
    return %c0_i32, %c0_i32_0 : i32, i32
  }
  func.func @transform_2(%arg0: i32) -> (i32, i32) {
    %c0_i32 = arith.constant 0 : i32
    %c0_i32_0 = arith.constant 0 : i32
    %c0_i32_1 = arith.constant 0 : i32
    return %c0_i32, %c0_i32_0 : i32, i32
  }
  func.func @transform_3(%arg0: i32) -> (i32, i32) {
    %c0_i32 = arith.constant 0 : i32
    %c0_i32_0 = arith.constant 0 : i32
    %c0_i32_1 = arith.constant 0 : i32
    return %c0_i32, %c0_i32_0 : i32, i32
  }
  func.func @transform_4(%arg0: i32) -> (i32, i32) {
    %c0_i32 = arith.constant 0 : i32
    %c0_i32_0 = arith.constant 0 : i32
    %c0_i32_1 = arith.constant 0 : i32
    return %c0_i32, %c0_i32_0 : i32, i32
  }
  func.func @transform_5(%arg0: i32) -> (i32, i32) {
    %c0_i32 = arith.constant 0 : i32
    %c0_i32_0 = arith.constant 0 : i32
    return %arg0, %c0_i32 : i32, i32
  }
  func.func @transform_6(%arg0: i32) -> (i32, i32) {
    %c0_i32 = arith.constant 0 : i32
    %c0_i32_0 = arith.constant 0 : i32
    return %arg0, %c0_i32 : i32, i32
  }
}

</mosaic_0001>

<bundles_post_ra>
// kernel: frontend_forward.26
= control target key start
LH: loop header
LB: loop body
LE: loop exit
PB: predicated region body
PF: predicated region fallthrough
CT: control target
= control target key end

     0   :  { %v117_v0 = vmov 0.0   ;;  %vm118_vm0 = vmmov 0   ;;  %vm37_vm1 = vcmask 130048   ;;  %vm90_vm2 = vcmask 257024   ;;  %s154_s1 = inlined_call_operand.vmem [shape: bf16[16,32], index: 1, kind: input, shape index: {}]   ;;  %s155_s0 = inlined_call_operand.vmem [shape: bf16[16,16], index: 0, kind: input, shape index: {}]   ;;  %s156_s2 = inlined_call_operand.vmem [shape: f32[1,32], index: 2, kind: input, shape index: {}]   ;;  %s157_s3 = inlined_call_operand.vmem [shape: bf16[16,32], index: 3, kind: output, shape index: {}]  }
   0x1   :  { %107 = vmatprep.subr.bf16.mxu0 %v117_v0  ;;  %v115_v1 = vld [vmem:[%s154_s1] sm:$0xff]   ;;  %109 = vmatprep.mubr.msk.bf16.mxu0 %vm118_vm0, %v117_v0 }
   0x2   :  { %v116_v2 = vld [vmem:[%s155_s0] sm:$0xff]   ;;  %108 = vmatpush3.bf16.msra.mxu0 %v115_v1 }
   0x3   :  { %v97_v3 = vld [vmem:[%s156_s2] ss:$0 sm:$0xff] }
   0x5   :  { %110 = vmatmul.mubr.msk.bf16.vlgmr.msra.gmra.mrb[0].mxu0 %vm37_vm1, %v116_v2 }
  0xd8   :  { %v75_v4 = vpop.f32.mrb[0].mxu0 }
  0xd9   :  { %v76_v5 = vadd.f32 %v97_v3, %v75_v4  ;;  %v111_v6 = vpop.f32.mrb[1].mxu0 }
  0xda   :  { %v78_v7 = vpop.f32.mrb[2].mxu0 }
  0xdb   :  { %v103_v8 = vpack.c.bf16 %v76_v5, %v76_v5  ;;  %v79_v9 = vadd.f32 %v97_v3, %v78_v7  ;;  %v112_v10 = vpop.f32.mrb[3].mxu0 }
  0xdd   :  { %91 = vst.msk [vmem:[%s157_s3] sm:$0xf] %vm90_vm2, %v103_v8  ;;  %v104_v11 = vpack.c.bf16 %v79_v9, %v79_v9 }
  0xdf   :  { %92 = vst.msk [vmem:[%s157_s3 + $0x4] sm:$0xf] %vm90_vm2, %v104_v11 }

// kernel: frontend_forward.27
= control target key start
LH: loop header
LB: loop body
LE: loop exit
PB: predicated region body
PF: predicated region fallthrough
CT: control target
= control target key end

     0   :  { %vm33_vm0 = vcmask 261120   ;;  %v333_v16 = vmov 0.0   ;;  %vm334_vm1 = vmmov 0   ;;  %vm199_vm2 = vcmask 523264   ;;  %s429_s0 = inlined_call_operand.vmem [shape: bf16[16,32], index: 0, kind: input, shape index: {}]   ;;  %s430_s3 = inlined_call_operand.vmem [shape: bf16[32,64], index: 3, kind: input, shape index: {}]   ;;  %s431_s1 = inlined_call_operand.vmem [shape: f32[1,32], index: 1, kind: input, shape index: {}]   ;;  %s432_s2 = inlined_call_operand.vmem [shape: f32[1,32], index: 2, kind: input, shape index: {}]   ;;  %s433_s5 = inlined_call_operand.vmem [shape: bf16[64,32], index: 5, kind: input, shape index: {}]   ;;  %s434_s4 = inlined_call_operand.vmem [shape: f32[1,64], index: 4, kind: input, shape index: {}]   ;;  %s435_s6 = inlined_call_operand.vmem [shape: f32[1,32], index: 6, kind: input, shape index: {}]   ;;  %s436_s7 = inlined_call_operand.vmem [shape: bf16[16,32], index: 7, kind: output, shape index: {}]  }
   0x1   :  { %v282_v0 = vld [vmem:[%s429_s0] sm:$0xff]   ;;  %293 = vmatprep.subr.bf16.mxu0 %v333_v16  ;;  %301 = vmatprep.subr.bf16.mxu1 %v333_v16  ;;  %v316_v17 = vld [vmem:[%s430_s3 + $0x8] sm:$0xff]   ;;  %v319_v37 = vld [vmem:[%s433_s5 + $0x10] sm:$0xff]   ;;  %vm256_vm3 = vcmask 257024  }
   0x2   :  { %v378_v1 = vunpack.c.l.bf16 %v282_v0  ;;  %v380_v2 = vunpack.c.h.bf16 %v282_v0  ;;  %v315_v15 = vld [vmem:[%s430_s3] sm:$0xff]   ;;  %297 = vmatprep.mubr.msk.bf16.mxu0 %vm334_vm1, %v333_v16  ;;  %309 = vmatprep.mubr.msk.bf16.mxu1 %vm334_vm1, %v333_v16  ;;  %v318_v36 = vld [vmem:[%s433_s5 + $0x8] sm:$0xff]   ;;  %v320_v38 = vld [vmem:[%s433_s5 + $0x18] sm:$0xff]  }
   0x3   :  { %294 = vmatpush3.bf16.msra.mxu0 %v315_v15  ;;  %v263_v26 = vld [vmem:[%s431_s1] ss:$0 sm:$0xff] }
   0x4   :  { %v34_v3 = vsel %vm33_vm0, %v378_v1, 0.0  ;;  %v37_v4 = vsel %vm33_vm0, %v380_v2, 0.0  ;;  %295 = vmatprep.subr.bf16.mxu0 %v333_v16  ;;  %v264_v30 = vld [vmem:[%s432_s2] ss:$0 sm:$0xff] }
   0x5   :  { %35 = vadd.xlane.f32.xlu0 %v34_v3  ;;  %v317_v35 = vld [vmem:[%s433_s5] sm:$0xff]  }
   0x6   :  { %302 = vmatpush3.bf16.msra.mxu1 %v317_v35  ;;  %v265_v39 = vld [vmem:[%s434_s4] ss:$0 sm:$0xff] }
   0x7   :  { %296 = vmatpush3.bf16.msra.mxu0 %v316_v17  ;;  %303 = vmatprep.subr.bf16.mxu1 %v333_v16  ;;  %v271_v57 = vld [vmem:[%s435_s6] ss:$0 sm:$0xff] }
   0x9   :  { %38 = vadd.xlane.f32.xlu0 %v37_v4 }
   0xa   :  { %304 = vmatpush3.bf16.msra.mxu1 %v318_v36 }
   0xb   :  { %305 = vmatprep.subr.bf16.mxu1 %v333_v16 }
   0xe   :  { %306 = vmatpush3.bf16.msra.mxu1 %v319_v37 }
   0xf   :  { %307 = vmatprep.subr.bf16.mxu1 %v333_v16 }
  0x12   :  { %308 = vmatpush3.bf16.msra.mxu1 %v320_v38 }
  0x92   :  { %v36_v5 = vpop.xlane.xlu0 %35 }
  0x93   :  { %v41_v6 = vmul.f32 0.03125, %v36_v5 }
  0x95   :  { %v43_v7 = vsub.f32 %v378_v1, %v41_v6 }
  0x96   :  { %v39_v8 = vpop.xlane.xlu0 %38 }
  0x97   :  { %v42_v9 = vmul.f32 0.03125, %v39_v8  ;;  %v45_v10 = vmul.f32 %v43_v7, %v43_v7 }
  0x99   :  { %v44_v11 = vsub.f32 %v380_v2, %v42_v9  ;;  %v47_v12 = vsel %vm33_vm0, %v45_v10, 0.0 }
  0x9a   :  { %48 = vadd.xlane.f32.xlu1 %v47_v12 }
  0x9b   :  { %v46_v13 = vmul.f32 %v44_v11, %v44_v11 }
  0x9d   :  { %v50_v14 = vsel %vm33_vm0, %v46_v13, 0.0 }
  0x9e   :  { %51 = vadd.xlane.f32.xlu1 %v50_v14 }
 0x127   :  { %v49_v18 = vpop.xlane.xlu1 %48 }
 0x128   :  { %v53_v19 = vmul.f32 0.03125, %v49_v18 }
 0x12a   :  { %v55_v20 = vadd.f32 1e-05, %v53_v19 }
 0x12b   :  { %v52_v21 = vpop.xlane.xlu1 %51 }
 0x12c   :  { %321 = vrsqrt.f32 %v55_v20  ;;  %v54_v22 = vmul.f32 0.03125, %v52_v21 }
 0x12e   :  { %v56_v23 = vadd.f32 1e-05, %v54_v22 }
 0x130   :  { %323 = vrsqrt.f32 %v56_v23 }
 0x136   :  { %v322_v24 = vpop.eup %321 }
 0x137   :  { %v59_v25 = vmul.f32 %v322_v24, %v43_v7 }
 0x139   :  { %v67_v29 = vmul.f32 %v263_v26, %v59_v25 }
 0x13a   :  { %v324_v27 = vpop.eup %323 }
 0x13b   :  { %v60_v28 = vmul.f32 %v324_v27, %v44_v11  ;;  %v75_v32 = vadd.f32 %v264_v30, %v67_v29 }
 0x13d   :  { %v68_v31 = vmul.f32 %v263_v26, %v60_v28 }
 0x13f   :  { %v76_v33 = vadd.f32 %v264_v30, %v68_v31 }
 0x141   :  { %v77_v34 = vpack.c.bf16 %v76_v33, %v75_v32 }
 0x143   :  { %298 = vmatmul.mubr.msk.bf16.vlgmr.msra.gmra.mrb[0].mxu0 %vm33_vm0, %v77_v34 }
 0x216   :  { %v138_v40 = vpop.f32.mrb[0].mxu0 }
 0x217   :  { %v139_v41 = vadd.f32 %v265_v39, %v138_v40  ;;  %v299_v42 = vpop.f32.mrb[1].mxu0 }
 0x218   :  { %v141_v43 = vpop.f32.mrb[2].mxu0 }
 0x219   :  { %v269_v44 = vmul.f32 -1.442695, %v139_v41  ;;  %v142_v45 = vadd.f32 %v265_v39, %v141_v43  ;;  %v300_v46 = vpop.f32.mrb[3].mxu0 }
 0x21b   :  { %325 = vpow2.f32 %v269_v44  ;;  %v270_v47 = vmul.f32 -1.442695, %v142_v45 }
 0x21d   :  { %327 = vpow2.f32 %v270_v47 }
 0x225   :  { %v326_v48 = vpop.eup %325 }
 0x226   :  { %v151_v49 = vadd.f32 1.0, %v326_v48 }
 0x227   :  { %v328_v50 = vpop.eup %327 }
 0x228   :  { %329 = vrcp.f32 %v151_v49  ;;  %v152_v51 = vadd.f32 1.0, %v328_v50 }
 0x22a   :  { %331 = vrcp.f32 %v152_v51 }
 0x232   :  { %v330_v52 = vpop.eup %329 }
 0x233   :  { %v157_v54 = vmul.f32 %v330_v52, %v139_v41 }
 0x234   :  { %v332_v53 = vpop.eup %331 }
 0x235   :  { %v158_v55 = vmul.f32 %v332_v53, %v142_v45 }
 0x237   :  { %v159_v56 = vpack.c.bf16 %v158_v55, %v157_v54 }
 0x239   :  { %310 = vmatmul.mubr.msk.bf16.vlgmr.msra.gmra.mrb[0].mxu1 %vm199_vm2, %v159_v56 }
 0x30c   :  { %v237_v58 = vpop.f32.mrb[0].mxu1 }
 0x30d   :  { %v238_v59 = vadd.f32 %v271_v57, %v237_v58  ;;  %v311_v60 = vpop.f32.mrb[1].mxu1 }
 0x30e   :  { %v240_v61 = vpop.f32.mrb[2].mxu1 }
 0x30f   :  { %v244_v62 = vmul.f32 0.5, %v238_v59  ;;  %v241_v63 = vadd.f32 %v271_v57, %v240_v61  ;;  %v312_v0 = vpop.f32.mrb[3].mxu1 }
 0x311   :  { %v246_v3 = vadd.f32 %v378_v1, %v244_v62  ;;  %v245_v4 = vmul.f32 0.5, %v241_v63 }
 0x313   :  { %v279_v5 = vpack.c.bf16 %v246_v3, %v246_v3  ;;  %v247_v6 = vadd.f32 %v380_v2, %v245_v4 }
 0x315   :  { %257 = vst.msk [vmem:[%s436_s7] sm:$0xf] %vm256_vm3, %v279_v5  ;;  %v280_v7 = vpack.c.bf16 %v247_v6, %v247_v6 }
 0x317   :  { %258 = vst.msk [vmem:[%s436_s7 + $0x4] sm:$0xf] %vm256_vm3, %v280_v7 }

// kernel: frontend_forward.28
= control target key start
LH: loop header
LB: loop body
LE: loop exit
PB: predicated region body
PF: predicated region fallthrough
CT: control target
= control target key end

     0   :  { %s1002_s27 = smov 0   ;;  %s1106_s0 = inlined_call_operand.vmem [shape: bf16[2,8,32], index: 0, kind: input, shape index: {}]   ;;  %s1107_s1 = inlined_call_operand.vmem [shape: f32[1,32], index: 1, kind: input, shape index: {}]   ;;  %s1108_s2 = inlined_call_operand.vmem [shape: f32[1,32], index: 2, kind: input, shape index: {}]   ;;  %s1109_s3 = inlined_call_operand.vmem [shape: bf16[32,96], index: 3, kind: input, shape index: {}]   ;;  %s1110_s4 = inlined_call_operand.vmem [shape: f32[1,96], index: 4, kind: input, shape index: {}]   ;;  %s1111_s5 = inlined_call_operand.vmem [shape: bf16[32,32], index: 5, kind: input, shape index: {}]   ;;  %s1112_s6 = inlined_call_operand.vmem [shape: f32[1,32], index: 6, kind: input, shape index: {}]   ;;  %s1113_s7 = inlined_call_operand.vmem [shape: f32[2,1,8], index: 7, kind: input, shape index: {}]   ;;  %s1114_s8 = inlined_call_operand.vmem [shape: bf16[2,8,32], index: 8, kind: output, shape index: {}]  }
   0x1 LB: > { %s829_s28 = sadd.s32 4294967295, %s948_s27   ;;  %p833_p0 = scmp.ge.s32.totalorder %s948_s27, 1  ;;  %s948_s27 = sphi %s1002_s27, %s18_s27  }
   0x2   : > { %p269_p1 = scmp.lt.s32.totalorder %s948_s27, 3 }
   0x4   : > { %p270_p2 = pnand %p833_p0, %p269_p1 }
   0x5   : > { %p304_p3 = scmp.lt.s32.totalorder (!%p270_p2), %s829_s28, 1  ;;  %vm320_vm0 = vcmask (!%p270_p2), 261120   ;;  %v928_v8 = vld [vmem:[%s1109_s3] sm:$0xff] (!%p270_p2)   ;;  %v950_v9 = vmov (!%p270_p2), 0.0   ;;  %vm951_vm1 = vmmov (!%p270_p2), 0   ;;  %v929_v10 = vld [vmem:[%s1109_s3 + $0x8] sm:$0xff] (!%p270_p2)  }
   0x6   : > { %273 = sbr.rel (%p270_p2) target bundleno = 2178 (0x882), region = 52  ;;  %869 = vmatprep.subr.bf16.mxu0 (!%p270_p2), %v950_v9  ;;  %873 = vmatprep.mubr.msk.bf16.mxu0 (!%p270_p2), %vm951_vm1, %v950_v9  ;;  %v836_v15 = vld [vmem:[%s1107_s1] ss:$0 sm:$0xff] (!%p270_p2)  ;;  %s952_s21 = smov (!%p270_p2), 64   ;;  %vm495_vm2 = vcmask (!%p270_p2), 1043456   ;;  %vm422_vm3 = vcmask (!%p270_p2), 130048  }
   0x7   : > { %870 = vmatpush3.bf16.msra.mxu0 (!%p270_p2), %v928_v8  ;;  %877 = vmatprep.subr.bf16.mxu1 (!%p270_p2), %v950_v9  ;;  %v837_v17 = vld [vmem:[%s1108_s2] ss:$0 sm:$0xff] (!%p270_p2)  ;;  %s953_s22 = smov (!%p270_p2), 96   ;;  %vm477_vm4 = vcmask (!%p270_p2), 64512   ;;  %s954_s26 = smov (!%p270_p2), 80   ;;  %vm765_vm5 = vcmask (!%p270_p2), 257024  }
   0x8   : > { %871 = vmatprep.subr.bf16.mxu0 (!%p270_p2), %v950_v9  ;;  %879 = vmatprep.mubr.msk.bf16.mxu1 (!%p270_p2), %vm951_vm1, %v950_v9  ;;  %v838_v21 = vld [vmem:[%s1110_s4] ss:$0 sm:$0xff] (!%p270_p2)  ;;  %s955_s30 = smov (!%p270_p2), 112   ;;  %s956_s11 = smov (!%p270_p2), 48  }
   0x9   : > { %v930_v52 = vld [vmem:[%s1111_s5] sm:$0xff] (!%p270_p2)  }
   0xb   : > { %872 = vmatpush3.bf16.msra.mxu0 (!%p270_p2), %v929_v10 }
   0xc   : > { %883 = vmatprep.subr.bf16.mxu0 (!%p270_p2), %v950_v9 }
   0xd   : > { %s1116_s28 = smov (!%p304_p3, %s829_s28), 1 }
   0xe   : > { %s834_s29 = sshll.u32 %s1116_s28, 2  ;;  %s310_s25 = scalar_lea.vmem %s1113_s7, %s1116_s28 }
   0xf   : > { %s307_s10 = scalar_lea.vmem %s1106_s0, %s834_s29  ;;  %v843_v33 = vld [vmem:[%s310_s25] ss:$0 sm:$0xff]  ;;  %s314_s18 = scalar_lea.vmem %s1114_s8, %s834_s29 }
  0x10   : > { %v316_v0 = vld [vmem:[%s307_s10] sm:$0xf] }
  0x11   : > { %v1018_v1 = vunpack.c.l.bf16 %v316_v0 }
  0x13   : > { %v321_v2 = vsel %vm320_vm0, %v1018_v1, 0.0 }
  0x14   : > { %322 = vadd.xlane.f32.xlu0 %v321_v2 }
  0xa1   : > { %v323_v3 = vpop.xlane.xlu0 %322 }
  0xa2   : > { %v325_v4 = vmul.f32 0.03125, %v323_v3 }
  0xa4   : > { %v326_v5 = vsub.f32 %v1018_v1, %v325_v4 }
  0xa6   : > { %v327_v6 = vmul.f32 %v326_v5, %v326_v5 }
  0xa8   : > { %v328_v7 = vsel %vm320_vm0, %v327_v6, 0.0 }
  0xa9   : > { %329 = vadd.xlane.f32.xlu0 %v328_v7 }
 0x136   : > { %v330_v11 = vpop.xlane.xlu0 %329 }
 0x137   : > { %v331_v12 = vmul.f32 0.03125, %v330_v11 }
 0x139   : > { %v332_v13 = vadd.f32 1e-05, %v331_v12 }
 0x13b   : > { %932 = vrsqrt.f32 %v332_v13 }
 0x145   : > { %v933_v14 = vpop.eup %932 }
 0x146   : > { %v334_v16 = vmul.f32 %v933_v14, %v326_v5 }
 0x148   : > { %v341_v18 = vmul.f32 %v836_v15, %v334_v16 }
 0x14a   : > { %v348_v19 = vadd.f32 %v837_v17, %v341_v18 }
 0x14c   : > { %v349_v20 = vpack.c.bf16 %v348_v19, %v348_v19 }
 0x14e   : > { %874 = vmatmul.mubr.msk.bf16.vlgmr.msra.gmra.mrb[0].mxu0 %vm320_vm0, %v349_v20 }
 0x14f   : > { %885 = vmatprep.mubr.msk.bf16.mxu0 %vm951_vm1, %v950_v9 }
 0x221   : > { %v410_v22 = vpop.f32.mrb[0].mxu0 }
 0x222   : > { %v411_v23 = vadd.f32 %v838_v21, %v410_v22  ;;  %v875_v24 = vpop.f32.mrb[1].mxu0 }
 0x223   : > { %v413_v25 = vpop.f32.mrb[2].mxu0 }
 0x224   : > { %v1050_v26 = vpack.c.bf16 %v411_v23, %v411_v23  ;;  %v876_v27 = vpop.f32.mrb[3].mxu0  ;;  %v847_v23 = vld [vmem:[%s1112_s6] ss:$0 sm:$0xff] }
 0x226   : > { %490 = vrot.lane.b32.xlu0 %v1050_v26, %s952_s21  ;;  %420 = vrot.lane.b32.xlu1 %v1050_v26, %s953_s22 }
 0x298   : > { %v491_v28 = vpop.permute.xlu0 %490  ;;  %v421_v29 = vpop.permute.xlu1 %420 }
 0x299   : > { %v497_v30 = vsel %vm495_vm2, %v491_v28, 0  ;;  %v427_v31 = vsel %vm422_vm3, %v421_v29, 0 }
 0x29a   : > { %878 = vmatpush3.bf16.xpose.msra.mxu1 %v427_v31  ;;  %884 = vmatpush3.bf16.msra.mxu0 %v497_v30 }
 0x29b   : > { %895 = vmatprep.subr.bf16.mxu0 %v950_v9  ;;  %889 = vmatprep.subr.bf16.mxu1 %v950_v9 }
 0x2a1   : > { %880 = vmatmul.mubr.msk.bf16.vlgmr.msra.gmra.mrb[0].mxu1 %vm422_vm3, %v1050_v26 }
 0x2a2   : > { %891 = vmatprep.mubr.msk.bf16.mxu1 %vm951_vm1, %v950_v9  ;;  %890 = vmatpush3.bf16.msra.mxu1 %v930_v52 }
 0x2a3   : > { %901 = vmatprep.subr.bf16.mxu1 %v950_v9 }
 0x374   : > { %v463_v32 = vpop.f32.mrb[0].mxu1 }
 0x375   : > { %v469_v34 = vmul.f32 0.25, %v463_v32  ;;  %v881_v35 = vpop.f32.mrb[1].mxu1 }
 0x376   : > { %v466_v36 = vpop.f32.mrb[2].mxu1 }
 0x377   : > { %v882_v37 = vpop.f32.mrb[3].mxu1  ;;  %v476_v38 = vadd.f32 %v843_v33, %v469_v34 }
 0x379   : > { %v478_v39 = vsel %vm477_vm4, %v476_v38, -inf }
 0x37a   : > { %479 = vmax.xlane.f32.xlu1 %v478_v39 }
 0x407   : > { %v480_v40 = vpop.xlane.xlu1 %479 }
 0x408   : > { %v481_v41 = vsub.f32 %v476_v38, %v480_v40 }
 0x40a   : > { %v482_v42 = vmul.f32 1.442695, %v481_v41 }
 0x40c   : > { %934 = vpow2.f32 %v482_v42 }
 0x416   : > { %v935_v43 = vpop.eup %934 }
 0x417   : > { %v484_v44 = vsel %vm477_vm4, %v935_v43, 0.0 }
 0x418   : > { %485 = vadd.xlane.f32.xlu0 %v484_v44 }
 0x42e   : > { %600 = vrot.lane.b32.xlu0 %v1050_v26, %s954_s26 }
 0x432   : > { %598 = vrot.lane.b32.xlu0 %v1050_v26, %s955_s30 }
 0x4a5   : > { %v486_v45 = vpop.xlane.xlu0 %485 }
 0x4a6   : > { %936 = vrcp.f32 %v486_v45 }
 0x4a9   : > { %v601_v48 = vpop.permute.xlu0 %600 }
 0x4aa   : > { %v606_v50 = vsel %vm422_vm3, %v601_v48, 0 }
 0x4ad   : > { %v599_v51 = vpop.permute.xlu0 %598 }
 0x4b0   : > { %v937_v46 = vpop.eup %936 }
 0x4b1   : > { %v488_v47 = vmul.f32 %v937_v46, %v935_v43 }
 0x4b3   : > { %v489_v49 = vpack.c.bf16 %v488_v47, %v488_v47 }
 0x4b5   : > { %886 = vmatmul.mubr.msk.bf16.vlgmr.msra.gmra.mrb[4].mxu0 %vm477_vm4, %v489_v49 }
 0x4b6   : > { %896 = vmatpush3.bf16.xpose.msra.mxu0 %v606_v50  ;;  %897 = vmatprep.mubr.msk.bf16.mxu0 %vm951_vm1, %v950_v9 }
 0x4b7   : > { %907 = vmatprep.subr.bf16.mxu0 %v950_v9 }
 0x4bd   : > { %898 = vmatmul.mubr.msk.bf16.vlgmr.msra.gmra.mrb[8].mxu0 %vm422_vm3, %v599_v51 }
 0x4be   : > { %909 = vmatprep.mubr.msk.bf16.mxu0 %vm951_vm1, %v950_v9 }
 0x588   : > { %v533_v53 = vpop.f32.mrb[4].mxu0 }
 0x589   : > { %v539_v54 = vpack.c.bf16 %v533_v53, %v533_v53  ;;  %v887_v55 = vpop.f32.mrb[5].mxu0 }
 0x58a   : > { %v536_v56 = vpop.f32.mrb[6].mxu0 }
 0x58b   : > { %v888_v57 = vpop.f32.mrb[7].mxu0  ;;  %892 = vmatmul.mubr.msk.bf16.vlgmr.msra.gmra.mrb[4].mxu1 %vm422_vm3, %v539_v54 }
 0x58c   : > { %903 = vmatprep.mubr.msk.bf16.mxu1 %vm951_vm1, %v950_v9  ;;  %v931_v9 = vld [vmem:[%s1111_s5 + $0x8] sm:$0xff]  }
 0x58d   : > { %908 = vmatpush3.bf16.msra.mxu0 %v931_v9 }
 0x590   : > { %v642_v58 = vpop.f32.mrb[8].mxu0 }
 0x591   : > { %v648_v59 = vmul.f32 0.25, %v642_v58  ;;  %v899_v60 = vpop.f32.mrb[9].mxu0 }
 0x592   : > { %v645_v61 = vpop.f32.mrb[10].mxu0 }
 0x593   : > { %v900_v62 = vpop.f32.mrb[11].mxu0  ;;  %v649_v63 = vadd.f32 %v843_v33, %v648_v59 }
 0x595   : > { %v650_v0 = vsel %vm477_vm4, %v649_v63, -inf }
 0x596   : > { %651 = vmax.xlane.f32.xlu1 %v650_v0 }
 0x5a7   : > { %662 = vrot.lane.b32.xlu1 %v1050_v26, %s956_s11 }
 0x623   : > { %v652_v2 = vpop.xlane.xlu1 %651 }
 0x624   : > { %v653_v3 = vsub.f32 %v649_v63, %v652_v2 }
 0x626   : > { %v654_v4 = vmul.f32 1.442695, %v653_v3 }
 0x627   : > { %v663_v5 = vpop.permute.xlu1 %662 }
 0x628   : > { %938 = vpow2.f32 %v654_v4  ;;  %v668_v6 = vsel %vm495_vm2, %v663_v5, 0 }
 0x629   : > { %902 = vmatpush3.bf16.msra.mxu1 %v668_v6 }
 0x632   : > { %v939_v7 = vpop.eup %938 }
 0x633   : > { %v656_v8 = vsel %vm477_vm4, %v939_v7, 0.0 }
 0x634   : > { %657 = vadd.xlane.f32.xlu0 %v656_v8 }
 0x65e   : > { %v585_v10 = vpop.f32.mrb[4].mxu1 }
 0x65f   : > { %v893_v11 = vpop.f32.mrb[5].mxu1  ;;  %v597_v24 = vadd.f32 %v847_v23, %v585_v10 }
 0x660   : > { %v588_v12 = vpop.f32.mrb[6].mxu1 }
 0x661   : > { %v894_v13 = vpop.f32.mrb[7].mxu1 }
 0x6c1   : > { %v658_v14 = vpop.xlane.xlu0 %657 }
 0x6c2   : > { %940 = vrcp.f32 %v658_v14 }
 0x6cc   : > { %v941_v15 = vpop.eup %940 }
 0x6cd   : > { %v660_v16 = vmul.f32 %v941_v15, %v939_v7 }
 0x6cf   : > { %v661_v17 = vpack.c.bf16 %v660_v16, %v660_v16 }
 0x6d1   : > { %904 = vmatmul.mubr.msk.bf16.vlgmr.msra.gmra.mrb[8].mxu1 %vm477_vm4, %v661_v17 }
 0x7a4   : > { %v704_v18 = vpop.f32.mrb[8].mxu1 }
 0x7a5   : > { %v710_v19 = vpack.c.bf16 %v704_v18, %v704_v18  ;;  %v905_v20 = vpop.f32.mrb[9].mxu1 }
 0x7a6   : > { %v707_v21 = vpop.f32.mrb[10].mxu1 }
 0x7a7   : > { %v906_v22 = vpop.f32.mrb[11].mxu1  ;;  %910 = vmatmul.mubr.msk.bf16.vlgmr.msra.gmra.mrb[12].mxu0 %vm422_vm3, %v710_v19 }
 0x87a   : > { %v756_v25 = vpop.f32.mrb[12].mxu0 }
 0x87b   : > { %v762_v26 = vadd.f32 %v756_v25, %v597_v24  ;;  %v911_v27 = vpop.f32.mrb[13].mxu0 }
 0x87c   : > { %v759_v28 = vpop.f32.mrb[14].mxu0 }
 0x87d   : > { %v763_v29 = vadd.f32 %v762_v26, %v1018_v1  ;;  %v912_v30 = vpop.f32.mrb[15].mxu0 }
 0x87f   : > { %v764_v31 = vpack.c.bf16 %v763_v29, %v763_v29 }
 0x881   : > { %766 = vst.msk [vmem:[%s314_s18] sm:$0xf] %vm765_vm5, %v764_v31 }
 0x882 PF: > { %s18_s27 = sadd.s32 1, %s948_s27  }
 0x883   : > { %p15_p4 = scmp.ge.s32.totalorder %s18_s27, 4  }
 0x885   :  { %17 = sbr.rel (!%p15_p4) target bundleno = 1 (0x1), region = 85 }

// kernel: frontend_forward.25
= control target key start
LH: loop header
LB: loop body
LE: loop exit
PB: predicated region body
PF: predicated region fallthrough
CT: control target
= control target key end

     0   :  { %s667_s12 = smov 0   ;;  %s721_s0 = inlined_call_operand.vmem [shape: bf16[2,12,10], index: 0, kind: input, shape index: {}]   ;;  %s722_s1 = inlined_call_operand.vmem [shape: bf16[5,10,32], index: 1, kind: input, shape index: {}]   ;;  %s723_s2 = inlined_call_operand.vmem [shape: f32[1,32], index: 2, kind: input, shape index: {}]   ;;  %s724_s3 = inlined_call_operand.vmem [shape: bf16[2,8,32], index: 3, kind: output, shape index: {}]  }
   0x1 LB: > { %s544_s13 = sadd.s32 4294967295, %s643_s12   ;;  %p548_p0 = scmp.ge.s32.totalorder %s643_s12, 1  ;;  %s643_s12 = sphi %s667_s12, %s13_s12  }
   0x2   : > { %p137_p1 = scmp.lt.s32.totalorder %s643_s12, 3 }
   0x4   : > { %p138_p2 = pnand %p548_p0, %p137_p1 }
   0x5   : > { %vm198_vm0 = vcmask (!%p138_p2), 1044480   ;;  %v645_v0 = vmov (!%p138_p2), 0.0   ;;  %v628_v1 = vld [vmem:[%s722_s1 + $0x8] sm:$0x1f] (!%p138_p2)   ;;  %v629_v2 = vld [vmem:[%s722_s1] sm:$0x1f] (!%p138_p2)  }
   0x6   : > { %141 = sbr.rel (%p138_p2) target bundleno = 260 (0x104), region = 32  ;;  %588 = vmatprep.subr.bf16.mxu0 (!%p138_p2), %v645_v0  ;;  %594 = vmatprep.subr.bf16.mxu1 (!%p138_p2), %v645_v0  ;;  %p160_p3 = scmp.lt.s32.totalorder (!%p138_p2), %s544_s13, 1  ;;  %v200_v3 = vsel (!%p138_p2), %vm198_vm0, %v628_v1, 0  ;;  %vm646_vm1 = vmmov (!%p138_p2), 0   ;;  %v251_v4 = vsel (!%p138_p2), %vm198_vm0, %v629_v2, 0  ;;  %vm194_vm2 = vcmask (!%p138_p2), 80896  }
   0x7   : > { %590 = vmatprep.mubr.msk.bf16.mxu0 (!%p138_p2), %vm646_vm1, %v645_v0  ;;  %596 = vmatprep.mubr.msk.bf16.mxu1 (!%p138_p2), %vm646_vm1, %v645_v0  ;;  %v632_v5 = vld [vmem:[%s722_s1 + $0x18] sm:$0x1f] (!%p138_p2)   ;;  %v631_v15 = vld [vmem:[%s722_s1 + $0x10] sm:$0x1f] (!%p138_p2)   ;;  %v635_v25 = vld [vmem:[%s722_s1 + $0x20] sm:$0x1f] (!%p138_p2)  }
   0x8   : > { %589 = vmatpush3.bf16.msra.mxu0 (!%p138_p2), %v200_v3  ;;  %595 = vmatpush3.bf16.msra.mxu1 (!%p138_p2), %v251_v4  ;;  %v377_v6 = vsel (!%p138_p2), %vm198_vm0, %v632_v5, 0  ;;  %v310_v22 = vsel (!%p138_p2), %vm198_vm0, %v631_v15, 0  ;;  %v437_v28 = vsel (!%p138_p2), %vm198_vm0, %v635_v25, 0  ;;  %v574_v51 = vld [vmem:[%s723_s2] ss:$0 sm:$0xff] (!%p138_p2)  ;;  %vm489_vm3 = vcmask (!%p138_p2), 257024  }
   0x9   : > { %600 = vmatprep.subr.bf16.mxu0 (!%p138_p2), %v645_v0  ;;  %606 = vmatprep.subr.bf16.mxu1 (!%p138_p2), %v645_v0 }
   0xd   : > { %s726_s13 = smov (!%p160_p3, %s544_s13), 1 }
   0xe   : > { %s577_s20 = sshll.u32 %s726_s13, 3  ;;  %s551_s30 = sshll.u32 %s726_s13, 2 }
   0xf   : > { %s164_s23 = scalar_lea.vmem %s721_s0, %s577_s20  ;;  %s168_s6 = scalar_lea.vmem %s724_s3, %s551_s30 }
  0x10   : > { %v170_v7 = vld [vmem:[%s164_s23] sm:$0xf]  ;;  %v173_v8 = vld [vmem:[%s164_s23 + $0x4] sm:$0x1] }
  0x11   : > { %v293_v9 = vld [vmem:[%s164_s23] sm:$0xe]  ;;  %v554_v10 = vcombine.low %v170_v7, %v173_v8  ;;  %597 = vmatmul.mubr.msk.bf16.vlgmr.msra.gmra.mrb[0].mxu1 %vm194_vm2, %v170_v7  ;;  %v353_v11 = vld [vmem:[%s164_s23 + $0x4] sm:$0x3] }
  0x12   : > { %607 = vmatpush3.bf16.msra.mxu1 %v377_v6  ;;  %v566_v12 = vcombine.low %v293_v9, %v353_v11  ;;  %608 = vmatprep.mubr.msk.bf16.mxu1 %vm646_vm1, %v645_v0  ;;  %v561_v24 = vcombine.low %v293_v9, %v173_v8  ;;  %v420_v27 = vld [vmem:[%s164_s23] sm:$0xc] }
  0x13   : > { %v183_v13 = vshrl.u32 %v554_v10, 16  ;;  %v185_v14 = vshll.u32 %v554_v10, 16  ;;  %v571_v29 = vcombine.low %v420_v27, %v353_v11 }
  0x14   : > { %v361_v16 = vshrl.u32 %v566_v12, 16  ;;  %v364_v17 = vshll.u32 %v566_v12, 16  ;;  %v300_v26 = vrot.slane %v561_v24, 1 }
  0x15   : > { %v187_v18 = vrot.slane %v185_v14, 1  ;;  %v427_v30 = vrot.slane %v571_v29, 2 }
  0x16   : > { %v363_v19 = vrot.slane %v361_v16, 1  ;;  %v366_v20 = vrot.slane %v364_v17, 2 }
  0x17   : > { %v188_v21 = vor.u32 %v187_v18, %v183_v13 }
  0x18   : > { %v367_v23 = vor.u32 %v366_v20, %v363_v19 }
  0x19   : > { %591 = vmatmul.mubr.msk.bf16.vlgmr.msra.gmra.mrb[0].mxu0 %vm194_vm2, %v188_v21 }
  0x1a   : > { %601 = vmatpush3.bf16.msra.mxu0 %v310_v22  ;;  %602 = vmatprep.mubr.msk.bf16.mxu0 %vm646_vm1, %v645_v0 }
  0x1b   : > { %612 = vmatprep.subr.bf16.mxu0 %v645_v0  ;;  %609 = vmatmul.mubr.msk.bf16.vlgmr.msra.gmra.mrb[4].mxu1 %vm194_vm2, %v367_v23 }
  0x21   : > { %603 = vmatmul.mubr.msk.bf16.vlgmr.msra.gmra.mrb[4].mxu0 %vm194_vm2, %v300_v26 }
  0x22   : > { %613 = vmatpush3.bf16.msra.mxu0 %v437_v28  ;;  %614 = vmatprep.mubr.msk.bf16.mxu0 %vm646_vm1, %v645_v0 }
  0x29   : > { %615 = vmatmul.mubr.msk.bf16.vlgmr.msra.gmra.mrb[8].mxu0 %vm194_vm2, %v427_v30 }
  0xe4   : > { %v287_v31 = vpop.f32.mrb[0].mxu1 }
  0xe5   : > { %v598_v32 = vpop.f32.mrb[1].mxu1 }
  0xe6   : > { %v290_v33 = vpop.f32.mrb[2].mxu1 }
  0xe7   : > { %v599_v34 = vpop.f32.mrb[3].mxu1 }
  0xec   : > { %v236_v35 = vpop.f32.mrb[0].mxu0 }
  0xed   : > { %v288_v36 = vadd.f32 %v287_v31, %v236_v35  ;;  %v592_v37 = vpop.f32.mrb[1].mxu0 }
  0xee   : > { %v239_v38 = vpop.f32.mrb[2].mxu0  ;;  %v413_v39 = vpop.f32.mrb[4].mxu1 }
  0xef   : > { %v593_v40 = vpop.f32.mrb[3].mxu0  ;;  %v610_v41 = vpop.f32.mrb[5].mxu1 }
  0xf0   : > { %v416_v42 = vpop.f32.mrb[6].mxu1 }
  0xf1   : > { %v611_v43 = vpop.f32.mrb[7].mxu1 }
  0xf4   : > { %v346_v44 = vpop.f32.mrb[4].mxu0 }
  0xf5   : > { %v352_v45 = vadd.f32 %v346_v44, %v288_v36  ;;  %v604_v46 = vpop.f32.mrb[5].mxu0 }
  0xf6   : > { %v349_v47 = vpop.f32.mrb[6].mxu0 }
  0xf7   : > { %v419_v48 = vadd.f32 %v413_v39, %v352_v45  ;;  %v605_v49 = vpop.f32.mrb[7].mxu0 }
  0xfc   : > { %v473_v50 = vpop.f32.mrb[8].mxu0 }
  0xfd   : > { %v479_v52 = vadd.f32 %v473_v50, %v419_v48  ;;  %v616_v53 = vpop.f32.mrb[9].mxu0 }
  0xfe   : > { %v476_v54 = vpop.f32.mrb[10].mxu0 }
  0xff   : > { %v487_v55 = vadd.f32 %v574_v51, %v479_v52  ;;  %v617_v56 = vpop.f32.mrb[11].mxu0 }
 0x101   : > { %v488_v57 = vpack.c.bf16 %v487_v55, %v487_v55 }
 0x103   : > { %490 = vst.msk [vmem:[%s168_s6] sm:$0xf] %vm489_vm3, %v488_v57 }
 0x104 PF: > { %s13_s12 = sadd.s32 1, %s643_s12  }
 0x105   : > { %p10_p4 = scmp.ge.s32.totalorder %s13_s12, 4  }
 0x107   :  { %12 = sbr.rel (!%p10_p4) target bundleno = 1 (0x1), region = 66 }

// kernel: frontend_forward.31
= control target key start
LH: loop header
LB: loop body
LE: loop exit
PB: predicated region body
PF: predicated region fallthrough
CT: control target
= control target key end

     0   :  { %vm39_vm0 = vcmask 261120   ;;  %v389_v16 = vmov 0.0   ;;  %vm390_vm1 = vmmov 0   ;;  %vm205_vm2 = vcmask 523264   ;;  %s505_s0 = inlined_call_operand.vmem [shape: bf16[16,32], index: 0, kind: input, shape index: {}]   ;;  %s506_s3 = inlined_call_operand.vmem [shape: bf16[32,64], index: 3, kind: input, shape index: {}]   ;;  %s507_s1 = inlined_call_operand.vmem [shape: f32[1,32], index: 1, kind: input, shape index: {}]   ;;  %s508_s2 = inlined_call_operand.vmem [shape: f32[1,32], index: 2, kind: input, shape index: {}]   ;;  %s509_s5 = inlined_call_operand.vmem [shape: bf16[64,32], index: 5, kind: input, shape index: {}]   ;;  %s510_s4 = inlined_call_operand.vmem [shape: f32[1,64], index: 4, kind: input, shape index: {}]   ;;  %s511_s6 = inlined_call_operand.vmem [shape: f32[1,32], index: 6, kind: input, shape index: {}]   ;;  %s512_s7 = inlined_call_operand.vmem [shape: f32[1,32], index: 7, kind: input, shape index: {}]   ;;  %s513_s8 = inlined_call_operand.vmem [shape: f32[1,32], index: 8, kind: input, shape index: {}]   ;;  %s514_s9 = inlined_call_operand.vmem [shape: bf16[16,32], index: 9, kind: output, shape index: {}]  }
   0x1   :  { %v334_v0 = vld [vmem:[%s505_s0] sm:$0xff]   ;;  %345 = vmatprep.subr.bf16.mxu0 %v389_v16  ;;  %353 = vmatprep.subr.bf16.mxu1 %v389_v16  ;;  %v368_v17 = vld [vmem:[%s506_s3 + $0x8] sm:$0xff]   ;;  %v371_v37 = vld [vmem:[%s509_s5 + $0x10] sm:$0xff]   ;;  %vm306_vm3 = vcmask 257024  }
   0x2   :  { %v444_v1 = vunpack.c.l.bf16 %v334_v0  ;;  %v446_v2 = vunpack.c.h.bf16 %v334_v0  ;;  %v367_v15 = vld [vmem:[%s506_s3] sm:$0xff]   ;;  %349 = vmatprep.mubr.msk.bf16.mxu0 %vm390_vm1, %v389_v16  ;;  %361 = vmatprep.mubr.msk.bf16.mxu1 %vm390_vm1, %v389_v16  ;;  %v370_v36 = vld [vmem:[%s509_s5 + $0x8] sm:$0xff]   ;;  %v372_v38 = vld [vmem:[%s509_s5 + $0x18] sm:$0xff]  }
   0x3   :  { %346 = vmatpush3.bf16.msra.mxu0 %v367_v15  ;;  %v313_v26 = vld [vmem:[%s507_s1] ss:$0 sm:$0xff] }
   0x4   :  { %v40_v3 = vsel %vm39_vm0, %v444_v1, 0.0  ;;  %v43_v4 = vsel %vm39_vm0, %v446_v2, 0.0  ;;  %347 = vmatprep.subr.bf16.mxu0 %v389_v16  ;;  %v314_v30 = vld [vmem:[%s508_s2] ss:$0 sm:$0xff] }
   0x5   :  { %41 = vadd.xlane.f32.xlu0 %v40_v3  ;;  %v369_v35 = vld [vmem:[%s509_s5] sm:$0xff]  }
   0x6   :  { %354 = vmatpush3.bf16.msra.mxu1 %v369_v35  ;;  %v315_v39 = vld [vmem:[%s510_s4] ss:$0 sm:$0xff] }
   0x7   :  { %348 = vmatpush3.bf16.msra.mxu0 %v368_v17  ;;  %355 = vmatprep.subr.bf16.mxu1 %v389_v16  ;;  %v321_v57 = vld [vmem:[%s511_s6] ss:$0 sm:$0xff] }
   0x9   :  { %44 = vadd.xlane.f32.xlu0 %v43_v4 }
   0xa   :  { %356 = vmatpush3.bf16.msra.mxu1 %v370_v36 }
   0xb   :  { %357 = vmatprep.subr.bf16.mxu1 %v389_v16 }
   0xe   :  { %358 = vmatpush3.bf16.msra.mxu1 %v371_v37 }
   0xf   :  { %359 = vmatprep.subr.bf16.mxu1 %v389_v16 }
  0x12   :  { %360 = vmatpush3.bf16.msra.mxu1 %v372_v38 }
  0x92   :  { %v42_v5 = vpop.xlane.xlu0 %41 }
  0x93   :  { %v47_v6 = vmul.f32 0.03125, %v42_v5 }
  0x95   :  { %v49_v7 = vsub.f32 %v444_v1, %v47_v6 }
  0x96   :  { %v45_v8 = vpop.xlane.xlu0 %44 }
  0x97   :  { %v48_v9 = vmul.f32 0.03125, %v45_v8  ;;  %v51_v10 = vmul.f32 %v49_v7, %v49_v7 }
  0x99   :  { %v50_v11 = vsub.f32 %v446_v2, %v48_v9  ;;  %v53_v12 = vsel %vm39_vm0, %v51_v10, 0.0 }
  0x9a   :  { %54 = vadd.xlane.f32.xlu1 %v53_v12 }
  0x9b   :  { %v52_v13 = vmul.f32 %v50_v11, %v50_v11 }
  0x9d   :  { %v56_v14 = vsel %vm39_vm0, %v52_v13, 0.0 }
  0x9e   :  { %57 = vadd.xlane.f32.xlu1 %v56_v14 }
 0x127   :  { %v55_v18 = vpop.xlane.xlu1 %54 }
 0x128   :  { %v59_v19 = vmul.f32 0.03125, %v55_v18 }
 0x12a   :  { %v61_v20 = vadd.f32 1e-05, %v59_v19 }
 0x12b   :  { %v58_v21 = vpop.xlane.xlu1 %57 }
 0x12c   :  { %373 = vrsqrt.f32 %v61_v20  ;;  %v60_v22 = vmul.f32 0.03125, %v58_v21 }
 0x12e   :  { %v62_v23 = vadd.f32 1e-05, %v60_v22 }
 0x130   :  { %375 = vrsqrt.f32 %v62_v23  ;;  %v327_v23 = vld [vmem:[%s512_s7] ss:$0 sm:$0xff] }
 0x136   :  { %v374_v24 = vpop.eup %373 }
 0x137   :  { %v65_v25 = vmul.f32 %v374_v24, %v49_v7 }
 0x139   :  { %v73_v29 = vmul.f32 %v313_v26, %v65_v25 }
 0x13a   :  { %v376_v27 = vpop.eup %375 }
 0x13b   :  { %v66_v28 = vmul.f32 %v376_v27, %v50_v11  ;;  %v81_v32 = vadd.f32 %v314_v30, %v73_v29 }
 0x13d   :  { %v74_v31 = vmul.f32 %v313_v26, %v66_v28  ;;  %v328_v26 = vld [vmem:[%s513_s8] ss:$0 sm:$0xff] }
 0x13f   :  { %v82_v33 = vadd.f32 %v314_v30, %v74_v31 }
 0x141   :  { %v83_v34 = vpack.c.bf16 %v82_v33, %v81_v32 }
 0x143   :  { %350 = vmatmul.mubr.msk.bf16.vlgmr.msra.gmra.mrb[0].mxu0 %vm39_vm0, %v83_v34 }
 0x216   :  { %v144_v40 = vpop.f32.mrb[0].mxu0 }
 0x217   :  { %v145_v41 = vadd.f32 %v315_v39, %v144_v40  ;;  %v351_v42 = vpop.f32.mrb[1].mxu0 }
 0x218   :  { %v147_v43 = vpop.f32.mrb[2].mxu0 }
 0x219   :  { %v319_v44 = vmul.f32 -1.442695, %v145_v41  ;;  %v148_v45 = vadd.f32 %v315_v39, %v147_v43  ;;  %v352_v46 = vpop.f32.mrb[3].mxu0 }
 0x21b   :  { %377 = vpow2.f32 %v319_v44  ;;  %v320_v47 = vmul.f32 -1.442695, %v148_v45 }
 0x21d   :  { %379 = vpow2.f32 %v320_v47 }
 0x225   :  { %v378_v48 = vpop.eup %377 }
 0x226   :  { %v157_v49 = vadd.f32 1.0, %v378_v48 }
 0x227   :  { %v380_v50 = vpop.eup %379 }
 0x228   :  { %381 = vrcp.f32 %v157_v49  ;;  %v158_v51 = vadd.f32 1.0, %v380_v50 }
 0x22a   :  { %383 = vrcp.f32 %v158_v51 }
 0x232   :  { %v382_v52 = vpop.eup %381 }
 0x233   :  { %v163_v54 = vmul.f32 %v382_v52, %v145_v41 }
 0x234   :  { %v384_v53 = vpop.eup %383 }
 0x235   :  { %v164_v55 = vmul.f32 %v384_v53, %v148_v45 }
 0x237   :  { %v165_v56 = vpack.c.bf16 %v164_v55, %v163_v54 }
 0x239   :  { %362 = vmatmul.mubr.msk.bf16.vlgmr.msra.gmra.mrb[0].mxu1 %vm205_vm2, %v165_v56 }
 0x30c   :  { %v243_v58 = vpop.f32.mrb[0].mxu1 }
 0x30d   :  { %v244_v59 = vadd.f32 %v321_v57, %v243_v58  ;;  %v363_v60 = vpop.f32.mrb[1].mxu1 }
 0x30e   :  { %v246_v61 = vpop.f32.mrb[2].mxu1 }
 0x30f   :  { %v250_v62 = vmul.f32 0.5, %v244_v59  ;;  %v247_v63 = vadd.f32 %v321_v57, %v246_v61  ;;  %v364_v0 = vpop.f32.mrb[3].mxu1 }
 0x311   :  { %v251_v3 = vmul.f32 0.5, %v247_v63  ;;  %v252_v4 = vadd.f32 %v444_v1, %v250_v62 }
 0x313   :  { %v256_v5 = vsel %vm39_vm0, %v252_v4, 0.0  ;;  %v253_v6 = vadd.f32 %v446_v2, %v251_v3 }
 0x314   :  { %257 = vadd.xlane.f32.xlu0 %v256_v5 }
 0x315   :  { %v259_v7 = vsel %vm39_vm0, %v253_v6, 0.0 }
 0x316   :  { %260 = vadd.xlane.f32.xlu1 %v259_v7 }
 0x3a1   :  { %v258_v8 = vpop.xlane.xlu0 %257 }
 0x3a2   :  { %v262_v9 = vmul.f32 0.03125, %v258_v8 }
 0x3a3   :  { %v261_v10 = vpop.xlane.xlu1 %260 }
 0x3a4   :  { %v264_v11 = vsub.f32 %v252_v4, %v262_v9  ;;  %v263_v12 = vmul.f32 0.03125, %v261_v10 }
 0x3a6   :  { %v265_v13 = vsub.f32 %v253_v6, %v263_v12  ;;  %v266_v14 = vmul.f32 %v264_v11, %v264_v11 }
 0x3a8   :  { %v268_v15 = vsel %vm39_vm0, %v266_v14, 0.0  ;;  %v267_v16 = vmul.f32 %v265_v13, %v265_v13 }
 0x3a9   :  { %269 = vadd.xlane.f32.xlu0 %v268_v15 }
 0x3aa   :  { %v271_v1 = vsel %vm39_vm0, %v267_v16, 0.0 }
 0x3ab   :  { %272 = vadd.xlane.f32.xlu1 %v271_v1 }
 0x436   :  { %v270_v17 = vpop.xlane.xlu0 %269 }
 0x437   :  { %v274_v2 = vmul.f32 0.03125, %v270_v17 }
 0x438   :  { %v273_v18 = vpop.xlane.xlu1 %272 }
 0x439   :  { %v276_v19 = vadd.f32 1e-05, %v274_v2  ;;  %v275_v20 = vmul.f32 0.03125, %v273_v18 }
 0x43b   :  { %385 = vrsqrt.f32 %v276_v19  ;;  %v277_v21 = vadd.f32 1e-05, %v275_v20 }
 0x43d   :  { %387 = vrsqrt.f32 %v277_v21 }
 0x445   :  { %v386_v22 = vpop.eup %385 }
 0x446   :  { %v280_v24 = vmul.f32 %v386_v22, %v264_v11 }
 0x447   :  { %v388_v25 = vpop.eup %387 }
 0x448   :  { %v288_v27 = vmul.f32 %v327_v23, %v280_v24  ;;  %v281_v28 = vmul.f32 %v388_v25, %v265_v13 }
 0x44a   :  { %v296_v29 = vadd.f32 %v328_v26, %v288_v27  ;;  %v289_v30 = vmul.f32 %v327_v23, %v281_v28 }
 0x44c   :  { %v331_v31 = vpack.c.bf16 %v296_v29, %v296_v29  ;;  %v297_v32 = vadd.f32 %v328_v26, %v289_v30 }
 0x44e   :  { %307 = vst.msk [vmem:[%s514_s9] sm:$0xf] %vm306_vm3, %v331_v31  ;;  %v332_v33 = vpack.c.bf16 %v297_v32, %v297_v32 }
 0x450   :  { %308 = vst.msk [vmem:[%s514_s9 + $0x4] sm:$0xf] %vm306_vm3, %v332_v33 }

// kernel: frontend_forward.30
= control target key start
LH: loop header
LB: loop body
LE: loop exit
PB: predicated region body
PF: predicated region fallthrough
CT: control target
= control target key end

     0   :  { %s1064_s21 = smov 0   ;;  %s1167_s0 = inlined_call_operand.vmem [shape: bf16[2,14,32], index: 0, kind: input, shape index: {}]   ;;  %s1168_s1 = inlined_call_operand.vmem [shape: f32[1,32], index: 1, kind: input, shape index: {}]   ;;  %s1169_s2 = inlined_call_operand.vmem [shape: f32[1,32], index: 2, kind: input, shape index: {}]   ;;  %s1170_s3 = inlined_call_operand.vmem [shape: bf16[32,32], index: 3, kind: input, shape index: {}]   ;;  %s1171_s4 = inlined_call_operand.vmem [shape: f32[1,32], index: 4, kind: input, shape index: {}]   ;;  %s1172_s5 = inlined_call_operand.vmem [shape: bf16[32,32], index: 5, kind: input, shape index: {}]   ;;  %s1173_s6 = inlined_call_operand.vmem [shape: f32[1,32], index: 6, kind: input, shape index: {}]   ;;  %s1174_s7 = inlined_call_operand.vmem [shape: f32[7,1,32], index: 7, kind: input, shape index: {}]   ;;  %s1175_s8 = inlined_call_operand.vmem [shape: f32[1,32], index: 8, kind: input, shape index: {}]   ;;  %s1176_s9 = inlined_call_operand.vmem [shape: f32[1,32], index: 9, kind: input, shape index: {}]   ;;  %s1177_s10 = inlined_call_operand.vmem [shape: bf16[32,32], index: 10, kind: input, shape index: {}]   ;;  %s1178_s11 = inlined_call_operand.vmem [shape: f32[1,32], index: 11, kind: input, shape index: {}]   ;;  %s1179_s12 = inlined_call_operand.vmem [shape: bf16[2,8,32], index: 12, kind: output, shape index: {}]  }
   0x1 LB: > { %s877_s22 = sadd.s32 4294967295, %s995_s21   ;;  %p881_p0 = scmp.ge.s32.totalorder %s995_s21, 1  ;;  %s995_s21 = sphi %s1064_s21, %s22_s21  }
   0x2   : > { %p362_p1 = scmp.lt.s32.totalorder %s995_s21, 3 }
   0x4   : > { %p363_p2 = pnand %p881_p0, %p362_p1 }
   0x5   : > { %p403_p3 = scmp.lt.s32.totalorder (!%p363_p2), %s877_s22, 1  ;;  %vm419_vm0 = vcmask (!%p363_p2), 261120   ;;  %vm423_vm1 = vcmask (!%p363_p2), 259072   ;;  %v967_v16 = vld [vmem:[%s1170_s3] sm:$0xff] (!%p363_p2)   ;;  %v997_v18 = vmov (!%p363_p2), 0.0   ;;  %v969_v19 = vld [vmem:[%s1170_s3 + $0x8] sm:$0xff] (!%p363_p2)   ;;  %v610_v56 = vlaneseq (!%p363_p2) }
   0x6   : > { %366 = sbr.rel (%p363_p2) target bundleno = 869 (0x365), region = 68  ;;  %v968_v17 = vld [vmem:[%s1172_s5] sm:$0xff] (!%p363_p2)   ;;  %933 = vmatprep.subr.bf16.mxu0 (!%p363_p2), %v997_v18  ;;  %941 = vmatprep.subr.bf16.mxu1 (!%p363_p2), %v997_v18  ;;  %v970_v20 = vld [vmem:[%s1172_s5 + $0x8] sm:$0xff] (!%p363_p2)   ;;  %vm998_vm2 = vmmov (!%p363_p2), 0   ;;  %vm800_vm5 = vsmask.f32 (!%p363_p2), 2304 }
   0x7   : > { %934 = vmatpush3.bf16.msra.mxu0 (!%p363_p2), %v967_v16  ;;  %942 = vmatpush3.bf16.msra.mxu1 (!%p363_p2), %v968_v17  ;;  %v885_v29 = vld [vmem:[%s1168_s1] ss:$0 sm:$0xff] (!%p363_p2)  ;;  %v972_v39 = vld [vmem:[%s1177_s10 + $0x8] sm:$0xff] (!%p363_p2)   ;;  %v611_v58 = vshrl.u32 (!%p363_p2), %v610_v56, 7  ;;  %v903_v16 = vld [vmem:[%s1174_s7 + $0x3] ss:$0 sm:$0xff] (!%p363_p2) }
   0x8   : > { %935 = vmatprep.subr.bf16.mxu0 (!%p363_p2), %v997_v18  ;;  %943 = vmatprep.subr.bf16.mxu1 (!%p363_p2), %v997_v18  ;;  %v886_v33 = vld [vmem:[%s1169_s2] ss:$0 sm:$0xff] (!%p363_p2)  ;;  %vm801_vm6 = vsmask.f32 (!%p363_p2), 6416  ;;  %vm822_vm8 = vcmask (!%p363_p2), 257024  }
   0x9   : > { %937 = vmatprep.mubr.msk.bf16.mxu0 (!%p363_p2), %vm998_vm2, %v997_v18  ;;  %945 = vmatprep.mubr.msk.bf16.mxu1 (!%p363_p2), %vm998_vm2, %v997_v18  ;;  %v971_v38 = vld [vmem:[%s1177_s10] sm:$0xff] (!%p363_p2)   ;;  %v612_v60 = vadd.s32 (!%p363_p2), 8, %v611_v58  ;;  %vm613_vm3 = vcmp.ge.s32.totalorder (!%p363_p2), %v611_v58, 3  ;;  %vm802_vm7 = vmor (!%p363_p2), %vm800_vm5, %vm801_vm6 }
   0xa   : > { %v891_v40 = vld [vmem:[%s1173_s6] ss:$0 sm:$0xff] (!%p363_p2) }
   0xb   : > { %936 = vmatpush3.bf16.msra.mxu0 (!%p363_p2), %v969_v19  ;;  %944 = vmatpush3.bf16.msra.mxu1 (!%p363_p2), %v970_v20  ;;  %v887_v59 = vld [vmem:[%s1171_s4] ss:$0 sm:$0xff] (!%p363_p2)  ;;  %vm616_vm4 = vcmp.lt.s32.totalorder (!%p363_p2), %v612_v60, 11  ;;  %v905_v20 = vld [vmem:[%s1174_s7 + $0x4] ss:$0 sm:$0xff] (!%p363_p2) }
   0xc   : > { %949 = vmatprep.subr.bf16.mxu0 (!%p363_p2), %v997_v18 }
   0xd   : > { %s1181_s22 = smov (!%p403_p3, %s877_s22), 1 }
   0xe   : > { %s921_s23 = sshll.u32 %s1181_s22, 3  ;;  %s884_s17 = sshll.u32 %s1181_s22, 2 }
   0xf   : > { %s407_s26 = scalar_lea.vmem %s1167_s0, %s921_s23  ;;  %s411_s20 = scalar_lea.vmem %s1179_s12, %s884_s17 }
  0x10   : > { %v413_v0 = vld [vmem:[%s407_s26] sm:$0xf]  ;;  %v414_v1 = vld [vmem:[%s407_s26 + $0x4] sm:$0x7] }
  0x11   : > { %v1078_v2 = vunpack.c.l.bf16 %v413_v0  ;;  %v1080_v3 = vunpack.c.l.bf16 %v414_v1 }
  0x13   : > { %v420_v4 = vsel %vm419_vm0, %v1078_v2, 0.0  ;;  %v424_v5 = vsel %vm423_vm1, %v1080_v3, 0.0 }
  0x14   : > { %421 = vadd.xlane.f32.xlu0 %v420_v4 }
  0x18   : > { %425 = vadd.xlane.f32.xlu0 %v424_v5 }
  0xa1   : > { %v422_v6 = vpop.xlane.xlu0 %421 }
  0xa2   : > { %v428_v7 = vmul.f32 0.03125, %v422_v6 }
  0xa4   : > { %v430_v8 = vsub.f32 %v1078_v2, %v428_v7 }
  0xa5   : > { %v426_v9 = vpop.xlane.xlu0 %425 }
  0xa6   : > { %v429_v10 = vmul.f32 0.03125, %v426_v9  ;;  %v432_v11 = vmul.f32 %v430_v8, %v430_v8  ;;  %v899_v9 = vld [vmem:[%s1174_s7 + $0x1] ss:$0 sm:$0xff] }
  0xa8   : > { %v431_v12 = vsub.f32 %v1080_v3, %v429_v10  ;;  %v434_v13 = vsel %vm419_vm0, %v432_v11, 0.0 }
  0xa9   : > { %435 = vadd.xlane.f32.xlu1 %v434_v13 }
  0xaa   : > { %v433_v14 = vmul.f32 %v431_v12, %v431_v12 }
  0xac   : > { %v437_v15 = vsel %vm423_vm1, %v433_v14, 0.0 }
  0xad   : > { %438 = vadd.xlane.f32.xlu1 %v437_v15 }
 0x136   : > { %v436_v21 = vpop.xlane.xlu1 %435 }
 0x137   : > { %v440_v22 = vmul.f32 0.03125, %v436_v21 }
 0x139   : > { %v442_v23 = vadd.f32 1e-05, %v440_v22 }
 0x13a   : > { %v439_v24 = vpop.xlane.xlu1 %438 }
 0x13b   : > { %973 = vrsqrt.f32 %v442_v23  ;;  %v441_v25 = vmul.f32 0.03125, %v439_v24  ;;  %v907_v24 = vld [vmem:[%s1174_s7 + $0x5] ss:$0 sm:$0xff] }
 0x13d   : > { %v443_v26 = vadd.f32 1e-05, %v441_v25 }
 0x13f   : > { %975 = vrsqrt.f32 %v443_v26 }
 0x145   : > { %v974_v27 = vpop.eup %973 }
 0x146   : > { %v446_v28 = vmul.f32 %v974_v27, %v430_v8  ;;  %v897_v8 = vld [vmem:[%s1174_s7] ss:$0 sm:$0xff] }
 0x148   : > { %v454_v32 = vmul.f32 %v885_v29, %v446_v28  ;;  %v909_v28 = vld [vmem:[%s1174_s7 + $0x6] ss:$0 sm:$0xff] }
 0x149   : > { %v976_v30 = vpop.eup %975 }
 0x14a   : > { %v447_v31 = vmul.f32 %v976_v30, %v431_v12  ;;  %v462_v35 = vadd.f32 %v886_v33, %v454_v32  ;;  %v901_v12 = vld [vmem:[%s1174_s7 + $0x2] ss:$0 sm:$0xff] }
 0x14c   : > { %v455_v34 = vmul.f32 %v885_v29, %v447_v31 }
 0x14e   : > { %v463_v36 = vadd.f32 %v886_v33, %v455_v34  ;;  %v910_v33 = vld [vmem:[%s1175_s8] ss:$0 sm:$0xff] }
 0x150   : > { %v464_v37 = vpack.c.bf16 %v463_v36, %v462_v35  ;;  %v911_v35 = vld [vmem:[%s1176_s9] ss:$0 sm:$0xff] }
 0x152   : > { %938 = vmatmul.mubr.msk.bf16.vlgmr.msra.gmra.mrb[0].mxu0 %vm419_vm0, %v464_v37  ;;  %946 = vmatmul.mubr.msk.bf16.vlgmr.msra.gmra.mrb[0].mxu1 %vm419_vm0, %v464_v37 }
 0x153   : > { %953 = vmatprep.mubr.msk.bf16.mxu0 %vm998_vm2, %v997_v18  ;;  %950 = vmatpush3.bf16.msra.mxu0 %v971_v38 }
 0x154   : > { %951 = vmatprep.subr.bf16.mxu0 %v997_v18 }
 0x157   : > { %952 = vmatpush3.bf16.msra.mxu0 %v972_v39 }
 0x225   : > { %v525_v41 = vpop.f32.mrb[0].mxu0  ;;  %v589_v42 = vpop.f32.mrb[0].mxu1 }
 0x226   : > { %v590_v43 = vadd.f32 %v891_v40, %v589_v42  ;;  %v939_v44 = vpop.f32.mrb[1].mxu0  ;;  %v947_v45 = vpop.f32.mrb[1].mxu1  ;;  %v526_v61 = vadd.f32 %v887_v59, %v525_v41 }
 0x227   : > { %v528_v46 = vpop.f32.mrb[2].mxu0  ;;  %v592_v47 = vpop.f32.mrb[2].mxu1  ;;  %v913_v44 = vld [vmem:[%s1178_s11] ss:$0 sm:$0xff] }
 0x228   : > { %v895_v48 = vmul.f32 -1.442695, %v590_v43  ;;  %v593_v49 = vadd.f32 %v891_v40, %v592_v47  ;;  %v940_v50 = vpop.f32.mrb[3].mxu0  ;;  %v948_v51 = vpop.f32.mrb[3].mxu1  ;;  %v529_v0 = vadd.f32 %v887_v59, %v528_v46 }
 0x22a   : > { %977 = vpow2.f32 %v895_v48  ;;  %v896_v52 = vmul.f32 -1.442695, %v593_v49 }
 0x22c   : > { %979 = vpow2.f32 %v896_v52 }
 0x234   : > { %v978_v53 = vpop.eup %977 }
 0x235   : > { %v602_v54 = vadd.f32 1.0, %v978_v53 }
 0x236   : > { %v980_v55 = vpop.eup %979 }
 0x237   : > { %981 = vrcp.f32 %v602_v54  ;;  %v603_v57 = vadd.f32 1.0, %v980_v55 }
 0x239   : > { %983 = vrcp.f32 %v603_v57 }
 0x241   : > { %v982_v62 = vpop.eup %981 }
 0x242   : > { %v608_v63 = vmul.f32 %v982_v62, %v526_v61 }
 0x243   : > { %v984_v1 = vpop.eup %983 }
 0x244   : > { %v619_v4 = vsel %vm613_vm3, %v608_v63, 0.0  ;;  %v609_v5 = vmul.f32 %v984_v1, %v529_v0 }
 0x245   : > { %621 = vst.msk [vmem:[#allocation2] sm:$0xff] %vm419_vm0, %v619_v4 }
 0x246   : > { %v620_v6 = vsel %vm616_vm4, %v609_v5, 0.0 }
 0x247   : > { %622 = vst.msk [vmem:[#allocation2 + $0x8] sm:$0x3f] %vm423_vm1, %v620_v6 }
 0x24c   : > { %v623_v7 = vld [vmem:[#allocation2] sm:$0xff] }
 0x24d   : > { %v631_v13 = vmul.f32 %v897_v8, %v623_v7 }
 0x24e   : > { %v633_v10 = vld [vmem:[#allocation2 + $0x1] sm:$0xff] }
 0x24f   : > { %v644_v11 = vld [vmem:[#allocation2 + $0x2] sm:$0xff]  ;;  %v642_v14 = vmul.f32 %v899_v9, %v633_v10 }
 0x250   : > { %v655_v15 = vld [vmem:[#allocation2 + $0x3] sm:$0xff]  ;;  %v653_v18 = vmul.f32 %v901_v12, %v644_v11 }
 0x251   : > { %v643_v17 = vadd.f32 %v642_v14, %v631_v13  ;;  %v666_v19 = vld [vmem:[#allocation2 + $0x4] sm:$0xff]  ;;  %v664_v22 = vmul.f32 %v903_v16, %v655_v15 }
 0x252   : > { %v677_v23 = vld [vmem:[#allocation2 + $0x5] sm:$0xff]  ;;  %v675_v26 = vmul.f32 %v905_v20, %v666_v19 }
 0x253   : > { %v654_v21 = vadd.f32 %v653_v18, %v643_v17  ;;  %v688_v27 = vld [vmem:[#allocation2 + $0x6] sm:$0xff]  ;;  %v686_v30 = vmul.f32 %v907_v24, %v677_v23 }
 0x254   : > { %v697_v32 = vmul.f32 %v909_v28, %v688_v27 }
 0x255   : > { %v665_v25 = vadd.f32 %v664_v22, %v654_v21 }
 0x257   : > { %v676_v29 = vadd.f32 %v675_v26, %v665_v25 }
 0x259   : > { %v687_v31 = vadd.f32 %v686_v30, %v676_v29 }
 0x25b   : > { %v698_v34 = vadd.f32 %v697_v32, %v687_v31 }
 0x25d   : > { %v706_v36 = vmul.f32 %v910_v33, %v698_v34 }
 0x25f   : > { %v714_v37 = vadd.f32 %v911_v35, %v706_v36 }
 0x261   : > { %v912_v38 = vmul.f32 -1.442695, %v714_v37 }
 0x263   : > { %985 = vpow2.f32 %v912_v38 }
 0x26d   : > { %v986_v39 = vpop.eup %985 }
 0x26e   : > { %v718_v40 = vadd.f32 1.0, %v986_v39 }
 0x270   : > { %987 = vrcp.f32 %v718_v40 }
 0x27a   : > { %v988_v41 = vpop.eup %987 }
 0x27b   : > { %v721_v42 = vmul.f32 %v988_v41, %v714_v37 }
 0x27d   : > { %v722_v43 = vpack.c.bf16 %v721_v42, %v721_v42 }
 0x27f   : > { %954 = vmatmul.mubr.msk.bf16.vlgmr.msra.gmra.mrb[4].mxu0 %vm419_vm0, %v722_v43 }
 0x352   : > { %v783_v45 = vpop.f32.mrb[4].mxu0 }
 0x353   : > { %v784_v46 = vadd.f32 %v913_v44, %v783_v45  ;;  %v955_v47 = vpop.f32.mrb[5].mxu0 }
 0x354   : > { %v786_v48 = vpop.f32.mrb[6].mxu0 }
 0x355   : > { %v790_v49 = vrot.slane %v784_v46, 5  ;;  %v956_v50 = vpop.f32.mrb[7].mxu0 }
 0x357   : > { %v792_v51 = vadd.f32 %v790_v49, %v1078_v2  ;;  %v793_v52 = vadd.f32 %v790_v49, %v1080_v3 }
 0x359   : > { %v922_v53 = vpack.c.bf16 %v792_v51, %v792_v51  ;;  %v923_v54 = vpack.c.bf16 %v793_v52, %v793_v52 }
 0x35b   : > { %v804_v55 = vshrl.u32 %v922_v53, 16  ;;  %v807_v56 = vshll.u32 %v922_v53, 16  ;;  %v813_v57 = vshrl.u32 %v923_v54, 16  ;;  %v816_v58 = vshll.u32 %v923_v54, 16 }
 0x35d   : > { %v806_v59 = vrot.slane %v804_v55, 5  ;;  %v809_v60 = vrot.slane %v807_v56, 6  ;;  %v815_v61 = vrot.slane %v813_v57, 5  ;;  %v818_v62 = vrot.slane %v816_v58, 6 }
 0x35f   : > { %v810_v63 = vor.u32 %v809_v60, %v806_v59  ;;  %v819_v3 = vor.u32 %v818_v62, %v815_v61 }
 0x361   : > { %v811_v2 = vrot.slane %v810_v63, 4 }
 0x363   : > { %v820_v0 = vsel %vm802_vm7, %v811_v2, %v819_v3 }
 0x364   : > { %823 = vst.msk [vmem:[%s411_s20] sm:$0xf] %vm822_vm8, %v820_v0 }
 0x365 PF: > { %s22_s21 = sadd.s32 1, %s995_s21  }
 0x366   : > { %p19_p4 = scmp.ge.s32.totalorder %s22_s21, 4  }
 0x368   :  { %21 = sbr.rel (!%p19_p4) target bundleno = 1 (0x1), region = 104 }

// kernel: frontend_forward.29
= control target key start
LH: loop header
LB: loop body
LE: loop exit
PB: predicated region body
PF: predicated region fallthrough
CT: control target
= control target key end

     0   :  { %s1208_s17 = smov 0   ;;  %s1328_s0 = inlined_call_operand.vmem [shape: bf16[2,8,32], index: 0, kind: input, shape index: {}]   ;;  %s1329_s1 = inlined_call_operand.vmem [shape: bf16[2,8,32], index: 1, kind: input, shape index: {}]   ;;  %s1330_s2 = inlined_call_operand.vmem [shape: f32[1,32], index: 2, kind: input, shape index: {}]   ;;  %s1331_s3 = inlined_call_operand.vmem [shape: f32[1,32], index: 3, kind: input, shape index: {}]   ;;  %s1332_s4 = inlined_call_operand.vmem [shape: bf16[32,32], index: 4, kind: input, shape index: {}]   ;;  %s1333_s5 = inlined_call_operand.vmem [shape: f32[1,32], index: 5, kind: input, shape index: {}]   ;;  %s1334_s6 = inlined_call_operand.vmem [shape: bf16[32,64], index: 6, kind: input, shape index: {}]   ;;  %s1335_s7 = inlined_call_operand.vmem [shape: f32[1,64], index: 7, kind: input, shape index: {}]   ;;  %s1336_s8 = inlined_call_operand.vmem [shape: bf16[32,32], index: 8, kind: input, shape index: {}]   ;;  %s1337_s9 = inlined_call_operand.vmem [shape: f32[1,32], index: 9, kind: input, shape index: {}]   ;;  %s1338_s10 = inlined_call_operand.vmem [shape: f32[2,1,8], index: 10, kind: input, shape index: {}]   ;;  %s1339_s11 = inlined_call_operand.vmem [shape: bf16[2,8,32], index: 11, kind: output, shape index: {}]  }
   0x1 LB: > { %s1006_s18 = sadd.s32 4294967295, %s1141_s17   ;;  %p1010_p0 = scmp.ge.s32.totalorder %s1141_s17, 1  ;;  %s1141_s17 = sphi %s1208_s17, %s21_s17  }
   0x2   : > { %p353_p1 = scmp.lt.s32.totalorder %s1141_s17, 3 }
   0x4   : > { %p354_p2 = pnand %p1010_p0, %p353_p1 }
   0x5   : > { %p398_p3 = scmp.lt.s32.totalorder (!%p354_p2), %s1006_s18, 1  ;;  %vm418_vm0 = vcmask (!%p354_p2), 261120   ;;  %v1119_v8 = vld [vmem:[%s1334_s6] sm:$0xff] (!%p354_p2)   ;;  %v1143_v9 = vmov (!%p354_p2), 0.0   ;;  %v1120_v11 = vld [vmem:[%s1334_s6 + $0x8] sm:$0xff] (!%p354_p2)   ;;  %vm1144_vm1 = vmmov (!%p354_p2), 0  }
   0x6   : > { %357 = sbr.rel (%p354_p2) target bundleno = 2055 (0x807), region = 64  ;;  %1062 = vmatprep.subr.bf16.mxu1 (!%p354_p2), %v1143_v9  ;;  %1054 = vmatprep.subr.bf16.mxu0 (!%p354_p2), %v1143_v9  ;;  %v1121_v10 = vld [vmem:[%s1332_s4] sm:$0xff] (!%p354_p2)   ;;  %v1122_v12 = vld [vmem:[%s1332_s4 + $0x8] sm:$0xff] (!%p354_p2)   ;;  %vm585_vm2 = vcmask (!%p354_p2), 130048   ;;  %s1145_s24 = smov (!%p354_p2), 96   ;;  %vm659_vm3 = vcmask (!%p354_p2), 1043456  }
   0x7   : > { %1063 = vmatpush3.bf16.msra.mxu1 (!%p354_p2), %v1119_v8  ;;  %1066 = vmatprep.mubr.msk.bf16.mxu1 (!%p354_p2), %vm1144_vm1, %v1143_v9  ;;  %v1014_v18 = vld [vmem:[%s1330_s2] ss:$0 sm:$0xff] (!%p354_p2)  ;;  %vm640_vm4 = vcmask (!%p354_p2), 64512   ;;  %s1147_s13 = smov (!%p354_p2), 80   ;;  %vm930_vm5 = vcmask (!%p354_p2), 257024  }
   0x8   : > { %1064 = vmatprep.subr.bf16.mxu1 (!%p354_p2), %v1143_v9  ;;  %1055 = vmatpush3.bf16.msra.mxu0 (!%p354_p2), %v1121_v10  ;;  %v1015_v20 = vld [vmem:[%s1331_s3] ss:$0 sm:$0xff] (!%p354_p2) }
   0x9   : > { %1056 = vmatprep.subr.bf16.mxu0 (!%p354_p2), %v1143_v9  ;;  %1058 = vmatprep.mubr.msk.bf16.mxu0 (!%p354_p2), %vm1144_vm1, %v1143_v9  ;;  %v1020_v24 = vld [vmem:[%s1335_s7] ss:$0 sm:$0xff] (!%p354_p2) }
   0xa   : > { %v1016_v34 = vld [vmem:[%s1333_s5] ss:$0 sm:$0xff] (!%p354_p2) }
   0xb   : > { %1065 = vmatpush3.bf16.msra.mxu1 (!%p354_p2), %v1120_v11  ;;  %v1123_v61 = vld [vmem:[%s1336_s8] sm:$0xff] (!%p354_p2)  }
   0xc   : > { %1057 = vmatpush3.bf16.msra.mxu0 (!%p354_p2), %v1122_v12  ;;  %1076 = vmatprep.subr.bf16.mxu1 (!%p354_p2), %v1143_v9 }
   0xd   : > { %s1341_s18 = smov (!%p398_p3, %s1006_s18), 1  ;;  %1070 = vmatprep.subr.bf16.mxu0 %v1143_v9 }
   0xe   : > { %s1219_s19 = sshll.u32 %s1341_s18, 2  ;;  %s408_s29 = scalar_lea.vmem %s1338_s10, %s1341_s18 }
   0xf   : > { %s401_s22 = scalar_lea.vmem %s1328_s0, %s1219_s19  ;;  %s405_s12 = scalar_lea.vmem %s1329_s1, %s1219_s19  ;;  %v1025_v42 = vld [vmem:[%s408_s29] ss:$0 sm:$0xff] }
  0x10   : > { %v414_v0 = vld [vmem:[%s401_s22] sm:$0xf]  ;;  %s1146_s18 = smov 112   ;;  %s412_s23 = scalar_lea.vmem %s1339_s11, %s1219_s19 }
  0x11   : > { %v1225_v1 = vunpack.c.l.bf16 %v414_v0  ;;  %v514_v13 = vld [vmem:[%s405_s12] sm:$0xf] }
  0x12   : > { %1067 = vmatmul.mubr.msk.bf16.vlgmr.msra.gmra.mrb[0].mxu1 %vm418_vm0, %v514_v13 }
  0x13   : > { %v419_v2 = vsel %vm418_vm0, %v1225_v1, 0.0  ;;  %1078 = vmatprep.mubr.msk.bf16.mxu1 %vm1144_vm1, %v1143_v9 }
  0x14   : > { %420 = vadd.xlane.f32.xlu0 %v419_v2 }
  0xa1   : > { %v421_v3 = vpop.xlane.xlu0 %420 }
  0xa2   : > { %v423_v4 = vmul.f32 0.03125, %v421_v3 }
  0xa4   : > { %v424_v5 = vsub.f32 %v1225_v1, %v423_v4 }
  0xa6   : > { %v425_v6 = vmul.f32 %v424_v5, %v424_v5 }
  0xa8   : > { %v426_v7 = vsel %vm418_vm0, %v425_v6, 0.0 }
  0xa9   : > { %427 = vadd.xlane.f32.xlu0 %v426_v7 }
  0xe5   : > { %v575_v25 = vpop.f32.mrb[0].mxu1 }
  0xe6   : > { %v576_v26 = vadd.f32 %v1020_v24, %v575_v25  ;;  %v1068_v27 = vpop.f32.mrb[1].mxu1 }
  0xe7   : > { %v578_v28 = vpop.f32.mrb[2].mxu1 }
  0xe8   : > { %v1272_v29 = vpack.c.bf16 %v576_v26, %v576_v26  ;;  %v1069_v30 = vpop.f32.mrb[3].mxu1 }
  0xea   : > { %654 = vrot.lane.b32.xlu0 %v1272_v29, %s1145_s24  ;;  %v590_v31 = vsel %vm585_vm2, %v1272_v29, 0 }
 0x136   : > { %v428_v14 = vpop.xlane.xlu0 %427 }
 0x137   : > { %v429_v15 = vmul.f32 0.03125, %v428_v14 }
 0x139   : > { %v430_v16 = vadd.f32 1e-05, %v429_v15 }
 0x13b   : > { %1125 = vrsqrt.f32 %v430_v16 }
 0x145   : > { %v1126_v17 = vpop.eup %1125 }
 0x146   : > { %v432_v19 = vmul.f32 %v1126_v17, %v424_v5 }
 0x148   : > { %v439_v21 = vmul.f32 %v1014_v18, %v432_v19 }
 0x14a   : > { %v446_v22 = vadd.f32 %v1015_v20, %v439_v21 }
 0x14c   : > { %v447_v23 = vpack.c.bf16 %v446_v22, %v446_v22 }
 0x14e   : > { %1059 = vmatmul.mubr.msk.bf16.vlgmr.msra.gmra.mrb[0].mxu0 %vm418_vm0, %v447_v23 }
 0x14f   : > { %1072 = vmatprep.mubr.msk.bf16.mxu0 %vm1144_vm1, %v1143_v9  ;;  %1071 = vmatpush3.bf16.xpose.msra.mxu0 %v590_v31 }
 0x150   : > { %1082 = vmatprep.subr.bf16.mxu0 %v1143_v9 }
 0x15c   : > { %v655_v32 = vpop.permute.xlu0 %654 }
 0x15d   : > { %v661_v33 = vsel %vm659_vm3, %v655_v32, 0  ;;  %v1029_v32 = vld [vmem:[%s1337_s9] ss:$0 sm:$0xff] }
 0x15e   : > { %1077 = vmatpush3.bf16.msra.mxu1 %v661_v33 }
 0x15f   : > { %1088 = vmatprep.subr.bf16.mxu1 %v1143_v9 }
 0x221   : > { %v508_v35 = vpop.f32.mrb[0].mxu0 }
 0x222   : > { %v509_v36 = vadd.f32 %v1016_v34, %v508_v35  ;;  %v1060_v37 = vpop.f32.mrb[1].mxu0 }
 0x223   : > { %v511_v38 = vpop.f32.mrb[2].mxu0 }
 0x224   : > { %v583_v39 = vpack.c.bf16 %v509_v36, %v509_v36  ;;  %v1061_v40 = vpop.f32.mrb[3].mxu0 }
 0x226   : > { %1073 = vmatmul.mubr.msk.bf16.vlgmr.msra.gmra.mrb[4].mxu0 %vm585_vm2, %v583_v39 }
 0x227   : > { %1084 = vmatprep.mubr.msk.bf16.mxu0 %vm1144_vm1, %v1143_v9  ;;  %1083 = vmatpush3.bf16.msra.mxu0 %v1123_v61 }
 0x228   : > { %1094 = vmatprep.subr.bf16.mxu0 %v1143_v9 }
 0x2f9   : > { %v626_v41 = vpop.f32.mrb[4].mxu0 }
 0x2fa   : > { %v632_v43 = vmul.f32 0.25, %v626_v41  ;;  %v1074_v44 = vpop.f32.mrb[5].mxu0 }
 0x2fb   : > { %v629_v45 = vpop.f32.mrb[6].mxu0 }
 0x2fc   : > { %v1075_v46 = vpop.f32.mrb[7].mxu0  ;;  %v639_v47 = vadd.f32 %v1025_v42, %v632_v43 }
 0x2fe   : > { %v641_v48 = vsel %vm640_vm4, %v639_v47, -inf }
 0x2ff   : > { %642 = vmax.xlane.f32.xlu1 %v641_v48 }
 0x38c   : > { %v643_v49 = vpop.xlane.xlu1 %642 }
 0x38d   : > { %v644_v50 = vsub.f32 %v639_v47, %v643_v49 }
 0x38f   : > { %v645_v51 = vmul.f32 1.442695, %v644_v50 }
 0x391   : > { %1127 = vpow2.f32 %v645_v51 }
 0x39b   : > { %v1128_v52 = vpop.eup %1127 }
 0x39c   : > { %v647_v53 = vsel %vm640_vm4, %v1128_v52, 0.0 }
 0x39d   : > { %648 = vadd.xlane.f32.xlu1 %v647_v53 }
 0x3ae   : > { %765 = vrot.lane.b32.xlu1 %v1272_v29, %s1146_s18 }
 0x3b2   : > { %763 = vrot.lane.b32.xlu1 %v583_v39, %s1146_s18 }
 0x42a   : > { %v649_v54 = vpop.xlane.xlu1 %648 }
 0x42b   : > { %1129 = vrcp.f32 %v649_v54 }
 0x42e   : > { %v766_v57 = vpop.permute.xlu1 %765 }
 0x42f   : > { %v771_v59 = vsel %vm585_vm2, %v766_v57, 0 }
 0x432   : > { %v764_v60 = vpop.permute.xlu1 %763 }
 0x435   : > { %v1130_v55 = vpop.eup %1129 }
 0x436   : > { %v651_v56 = vmul.f32 %v1130_v55, %v1128_v52 }
 0x438   : > { %v652_v58 = vpack.c.bf16 %v651_v56, %v651_v56 }
 0x43a   : > { %1079 = vmatmul.mubr.msk.bf16.vlgmr.msra.gmra.mrb[4].mxu1 %vm640_vm4, %v652_v58 }
 0x43b   : > { %1089 = vmatpush3.bf16.xpose.msra.mxu1 %v771_v59  ;;  %1090 = vmatprep.mubr.msk.bf16.mxu1 %vm1144_vm1, %v1143_v9 }
 0x43c   : > { %1100 = vmatprep.subr.bf16.mxu1 %v1143_v9 }
 0x442   : > { %1091 = vmatmul.mubr.msk.bf16.vlgmr.msra.gmra.mrb[8].mxu1 %vm585_vm2, %v764_v60 }
 0x443   : > { %1102 = vmatprep.mubr.msk.bf16.mxu1 %vm1144_vm1, %v1143_v9 }
 0x50d   : > { %v697_v62 = vpop.f32.mrb[4].mxu1 }
 0x50e   : > { %v703_v63 = vpack.c.bf16 %v697_v62, %v697_v62  ;;  %v1080_v0 = vpop.f32.mrb[5].mxu1 }
 0x50f   : > { %v700_v2 = vpop.f32.mrb[6].mxu1 }
 0x510   : > { %v1081_v3 = vpop.f32.mrb[7].mxu1  ;;  %1085 = vmatmul.mubr.msk.bf16.vlgmr.msra.gmra.mrb[8].mxu0 %vm585_vm2, %v703_v63 }
 0x511   : > { %1096 = vmatprep.mubr.msk.bf16.mxu0 %vm1144_vm1, %v1143_v9  ;;  %v1124_v9 = vld [vmem:[%s1336_s8 + $0x8] sm:$0xff]  }
 0x512   : > { %1101 = vmatpush3.bf16.msra.mxu1 %v1124_v9 }
 0x515   : > { %v807_v4 = vpop.f32.mrb[8].mxu1 }
 0x516   : > { %v813_v5 = vmul.f32 0.25, %v807_v4  ;;  %v1092_v6 = vpop.f32.mrb[9].mxu1 }
 0x517   : > { %v810_v7 = vpop.f32.mrb[10].mxu1 }
 0x518   : > { %v1093_v8 = vpop.f32.mrb[11].mxu1  ;;  %v814_v10 = vadd.f32 %v1025_v42, %v813_v5 }
 0x51a   : > { %v815_v11 = vsel %vm640_vm4, %v814_v10, -inf }
 0x51b   : > { %816 = vmax.xlane.f32.xlu1 %v815_v11 }
 0x5a8   : > { %v817_v12 = vpop.xlane.xlu1 %816 }
 0x5a9   : > { %v818_v13 = vsub.f32 %v814_v10, %v817_v12 }
 0x5ab   : > { %v819_v14 = vmul.f32 1.442695, %v818_v13 }
 0x5ad   : > { %1131 = vpow2.f32 %v819_v14 }
 0x5b7   : > { %v1132_v15 = vpop.eup %1131 }
 0x5b8   : > { %v821_v16 = vsel %vm640_vm4, %v1132_v15, 0.0 }
 0x5b9   : > { %822 = vadd.xlane.f32.xlu0 %v821_v16 }
 0x5cf   : > { %827 = vrot.lane.b32.xlu0 %v1272_v29, %s1147_s13 }
 0x5e3   : > { %v749_v17 = vpop.f32.mrb[8].mxu0 }
 0x5e4   : > { %v1086_v18 = vpop.f32.mrb[9].mxu0  ;;  %v761_v33 = vadd.f32 %v1029_v32, %v749_v17 }
 0x5e5   : > { %v752_v19 = vpop.f32.mrb[10].mxu0 }
 0x5e6   : > { %v1087_v20 = vpop.f32.mrb[11].mxu0 }
 0x646   : > { %v823_v21 = vpop.xlane.xlu0 %822 }
 0x647   : > { %1133 = vrcp.f32 %v823_v21 }
 0x64a   : > { %v828_v22 = vpop.permute.xlu0 %827 }
 0x64b   : > { %v833_v23 = vsel %vm659_vm3, %v828_v22, 0 }
 0x64c   : > { %1095 = vmatpush3.bf16.msra.mxu0 %v833_v23 }
 0x651   : > { %v1134_v24 = vpop.eup %1133 }
 0x652   : > { %v825_v25 = vmul.f32 %v1134_v24, %v1132_v15 }
 0x654   : > { %v826_v26 = vpack.c.bf16 %v825_v25, %v825_v25 }
 0x656   : > { %1097 = vmatmul.mubr.msk.bf16.vlgmr.msra.gmra.mrb[12].mxu0 %vm640_vm4, %v826_v26 }
 0x729   : > { %v869_v27 = vpop.f32.mrb[12].mxu0 }
 0x72a   : > { %v875_v28 = vpack.c.bf16 %v869_v27, %v869_v27  ;;  %v1098_v29 = vpop.f32.mrb[13].mxu0 }
 0x72b   : > { %v872_v30 = vpop.f32.mrb[14].mxu0 }
 0x72c   : > { %v1099_v31 = vpop.f32.mrb[15].mxu0  ;;  %1103 = vmatmul.mubr.msk.bf16.vlgmr.msra.gmra.mrb[12].mxu1 %vm585_vm2, %v875_v28 }
 0x7ff   : > { %v921_v34 = vpop.f32.mrb[12].mxu1 }
 0x800   : > { %v927_v35 = vadd.f32 %v921_v34, %v761_v33  ;;  %v1104_v36 = vpop.f32.mrb[13].mxu1 }
 0x801   : > { %v924_v37 = vpop.f32.mrb[14].mxu1 }
 0x802   : > { %v928_v38 = vadd.f32 %v927_v35, %v1225_v1  ;;  %v1105_v39 = vpop.f32.mrb[15].mxu1 }
 0x804   : > { %v929_v40 = vpack.c.bf16 %v928_v38, %v928_v38 }
 0x806   : > { %931 = vst.msk [vmem:[%s412_s23] sm:$0xf] %vm930_vm5, %v929_v40 }
 0x807 PF: > { %s21_s17 = sadd.s32 1, %s1141_s17  }
 0x808   : > { %p18_p4 = scmp.ge.s32.totalorder %s21_s17, 4  }
 0x80a   :  { %20 = sbr.rel (!%p18_p4) target bundleno = 1 (0x1), region = 100 }

// kernel: frontend_forward.37
= control target key start
LH: loop header
LB: loop body
LE: loop exit
PB: predicated region body
PF: predicated region fallthrough
CT: control target
= control target key end

     0   :  { %vm29_vm0 = vcmask 261120   ;;  %v195_v16 = vmov 0.0   ;;  %vm196_vm1 = vmmov 0   ;;  %vm81_vm2 = vcmask 257024   ;;  %s267_s0 = inlined_call_operand.vmem [shape: bf16[16,32], index: 0, kind: input, shape index: {}]   ;;  %s268_s3 = inlined_call_operand.vmem [shape: bf16[32,3], index: 3, kind: input, shape index: {}]   ;;  %s269_s1 = inlined_call_operand.vmem [shape: f32[1,32], index: 1, kind: input, shape index: {}]   ;;  %s270_s2 = inlined_call_operand.vmem [shape: f32[1,32], index: 2, kind: input, shape index: {}]   ;;  %s271_s5 = inlined_call_operand.vmem [shape: bf16[16,32], index: 5, kind: output, shape index: {0}]   ;;  %s272_s4 = inlined_call_operand.vmem [shape: f32[1,3], index: 4, kind: input, shape index: {}]   ;;  %s273_s6 = inlined_call_operand.vmem [shape: f32[16,3], index: 6, kind: output, shape index: {1}]  }
   0x1   :  { %v173_v0 = vld [vmem:[%s267_s0] sm:$0xff]   ;;  %179 = vmatprep.subr.bf16.mxu0 %v195_v16  ;;  %v190_v17 = vld [vmem:[%s268_s3 + $0x8] sm:$0xff]   ;;  %183 = vmatprep.mubr.msk.bf16.mxu0 %vm196_vm1, %v195_v16  ;;  %vm151_vm3 = vcmask 23552  }
   0x2   :  { %v174_v1 = vunpack.c.l.bf16 %v173_v0  ;;  %v175_v2 = vunpack.c.h.bf16 %v173_v0  ;;  %v189_v15 = vld [vmem:[%s268_s3] sm:$0xff]  }
   0x3   :  { %180 = vmatpush3.bf16.msra.mxu0 %v189_v15  ;;  %v162_v25 = vld [vmem:[%s269_s1] ss:$0 sm:$0xff] }
   0x4   :  { %v30_v3 = vsel %vm29_vm0, %v174_v1, 0.0  ;;  %v33_v4 = vsel %vm29_vm0, %v175_v2, 0.0  ;;  %181 = vmatprep.subr.bf16.mxu0 %v195_v16  ;;  %v163_v27 = vld [vmem:[%s270_s2] ss:$0 sm:$0xff] }
   0x5   :  { %31 = vadd.xlane.f32.xlu0 %v30_v3  ;;  %v166_v37 = vld [vmem:[%s272_s4] ss:$0 sm:$0xff] }
   0x7   :  { %182 = vmatpush3.bf16.msra.mxu0 %v190_v17 }
   0x9   :  { %34 = vadd.xlane.f32.xlu0 %v33_v4 }
  0x92   :  { %v32_v5 = vpop.xlane.xlu0 %31 }
  0x93   :  { %v37_v6 = vmul.f32 0.03125, %v32_v5 }
  0x95   :  { %v39_v7 = vsub.f32 %v174_v1, %v37_v6 }
  0x96   :  { %v35_v8 = vpop.xlane.xlu0 %34 }
  0x97   :  { %v38_v9 = vmul.f32 0.03125, %v35_v8  ;;  %v41_v10 = vmul.f32 %v39_v7, %v39_v7 }
  0x99   :  { %v40_v11 = vsub.f32 %v175_v2, %v38_v9  ;;  %v43_v12 = vsel %vm29_vm0, %v41_v10, 0.0 }
  0x9a   :  { %44 = vadd.xlane.f32.xlu1 %v43_v12 }
  0x9b   :  { %v42_v13 = vmul.f32 %v40_v11, %v40_v11 }
  0x9d   :  { %v46_v14 = vsel %vm29_vm0, %v42_v13, 0.0 }
  0x9e   :  { %47 = vadd.xlane.f32.xlu1 %v46_v14 }
 0x127   :  { %v45_v18 = vpop.xlane.xlu1 %44 }
 0x128   :  { %v49_v19 = vmul.f32 0.03125, %v45_v18 }
 0x12a   :  { %v51_v20 = vadd.f32 1e-05, %v49_v19 }
 0x12b   :  { %v48_v21 = vpop.xlane.xlu1 %47 }
 0x12c   :  { %191 = vrsqrt.f32 %v51_v20  ;;  %v50_v22 = vmul.f32 0.03125, %v48_v21 }
 0x12e   :  { %v52_v23 = vadd.f32 1e-05, %v50_v22 }
 0x130   :  { %193 = vrsqrt.f32 %v52_v23 }
 0x136   :  { %v192_v24 = vpop.eup %191 }
 0x137   :  { %v55_v26 = vmul.f32 %v192_v24, %v39_v7 }
 0x139   :  { %v63_v28 = vmul.f32 %v162_v25, %v55_v26 }
 0x13a   :  { %v194_v29 = vpop.eup %193 }
 0x13b   :  { %v56_v30 = vmul.f32 %v194_v29, %v40_v11  ;;  %v71_v31 = vadd.f32 %v163_v27, %v63_v28 }
 0x13d   :  { %v64_v32 = vmul.f32 %v162_v25, %v56_v30  ;;  %v170_v33 = vpack.c.bf16 %v71_v31, %v71_v31 }
 0x13f   :  { %v72_v34 = vadd.f32 %v163_v27, %v64_v32  ;;  %82 = vst.msk [vmem:[%s271_s5] sm:$0xf] %vm81_vm2, %v170_v33 }
 0x141   :  { %v73_v35 = vpack.c.bf16 %v72_v34, %v71_v31  ;;  %v171_v36 = vpack.c.bf16 %v72_v34, %v72_v34 }
 0x143   :  { %83 = vst.msk [vmem:[%s271_s5 + $0x4] sm:$0xf] %vm81_vm2, %v171_v36  ;;  %184 = vmatmul.mubr.msk.bf16.vlgmr.msra.gmra.mrb[0].mxu0 %vm29_vm0, %v73_v35 }
 0x216   :  { %v144_v38 = vpop.f32.mrb[0].mxu0 }
 0x217   :  { %v145_v39 = vadd.f32 %v166_v37, %v144_v38  ;;  %v185_v40 = vpop.f32.mrb[1].mxu0 }
 0x218   :  { %v147_v41 = vpop.f32.mrb[2].mxu0 }
 0x219   :  { %152 = vst.msk [vmem:[%s273_s6] sm:$0xff] %vm151_vm3, %v145_v39  ;;  %v148_v42 = vadd.f32 %v166_v37, %v147_v41  ;;  %v186_v43 = vpop.f32.mrb[3].mxu0 }
 0x21b   :  { %153 = vst.msk [vmem:[%s273_s6 + $0x8] sm:$0xff] %vm151_vm3, %v148_v42 }

// kernel: frontend_forward.49
= control target key start
LH: loop header
LB: loop body
LE: loop exit
PB: predicated region body
PF: predicated region fallthrough
CT: control target
= control target key end

     0   :  { %12 = vsyncpa [#allocation3], 0  ;;  %vm31_vm0 = vcmask 261120   ;;  %s357_s0 = inlined_call_operand.vmem [shape: bf16[16,32], index: 0, kind: input, shape index: {}]   ;;  %s358_s1 = inlined_call_operand.vmem [shape: f32[1,32], index: 1, kind: input, shape index: {}]   ;;  %s359_s2 = inlined_call_operand.vmem [shape: f32[1,32], index: 2, kind: input, shape index: {}]   ;;  %s360_s3 = inlined_call_operand.vmem [shape: bf16[32,10], index: 3, kind: input, shape index: {}]   ;;  %s361_s4 = inlined_call_operand.vmem [shape: f32[1,10], index: 4, kind: input, shape index: {}]   ;;  %s362_s5 = inlined_call_operand.hbm [shape: f32[16,32], index: 5, kind: output, shape index: {0}]   ;;  %s363_s6 = inlined_call_operand.hbm [shape: f32[16,10], index: 6, kind: output, shape index: {1}]  }
   0x1   :  { %v187_v0 = vld [vmem:[%s357_s0] sm:$0xff]  }
   0x2   :  { %v188_v1 = vunpack.c.l.bf16 %v187_v0  ;;  %v189_v2 = vunpack.c.h.bf16 %v187_v0 }
   0x3   :  { %13 = vsyncpa [#allocation5], 0  ;;  %v207_v15 = vld [vmem:[%s360_s3] sm:$0xff]   ;;  %v261_v16 = vmov 0.0   ;;  %v208_v17 = vld [vmem:[%s360_s3 + $0x8] sm:$0xff]   ;;  %vm262_vm1 = vmmov 0  }
   0x4   :  { %v32_v3 = vsel %vm31_vm0, %v188_v1, 0.0  ;;  %v35_v4 = vsel %vm31_vm0, %v189_v2, 0.0  ;;  %193 = vmatprep.subr.bf16.mxu0 %v261_v16  ;;  %197 = vmatprep.mubr.msk.bf16.mxu0 %vm262_vm1, %v261_v16  ;;  %v180_v25 = vld [vmem:[%s358_s1] ss:$0 sm:$0xff]  ;;  %s263_s29 = smov [#allocation2]  }
   0x5   :  { %33 = vadd.xlane.f32.xlu0 %v32_v3  ;;  %194 = vmatpush3.bf16.msra.mxu0 %v207_v15  ;;  %v181_v27 = vld [vmem:[%s359_s2] ss:$0 sm:$0xff]  ;;  %s153_s1 = sshll.u32 %s263_s29, 4  ;;  %s154_s1 = int_to_ptr.vmem [resolvable:$true] %s153_s1 }
   0x6   :  { %195 = vmatprep.subr.bf16.mxu0 %v261_v16  ;;  %s213_s30 = scalar_lea.vmem %s154_s1, 256  ;;  %p218_p1 = scmp.lt.s32.totalorder %s154_s1, %s154_s1 }
   0x7   :  { %p214_p0 = scmp.ne.s32.totalorder %s154_s1, %s213_s30  ;;  %p219_p2 = scmp.lt.s32.totalorder %s213_s30, %s213_s30 }
   0x9   :  { %36 = vadd.xlane.f32.xlu0 %v35_v4  ;;  %196 = vmatpush3.bf16.msra.mxu0 %v208_v17  ;;  %p220_p3 = por %p219_p2, %p218_p1 }
   0xb   :  { %p221_p4 = pnand %p220_p3, %p214_p0 }
  0x92   :  { %v34_v5 = vpop.xlane.xlu0 %33 }
  0x93   :  { %v39_v6 = vmul.f32 0.03125, %v34_v5 }
  0x95   :  { %v41_v7 = vsub.f32 %v188_v1, %v39_v6 }
  0x96   :  { %v37_v8 = vpop.xlane.xlu0 %36 }
  0x97   :  { %v40_v9 = vmul.f32 0.03125, %v37_v8  ;;  %v43_v10 = vmul.f32 %v41_v7, %v41_v7 }
  0x99   :  { %v42_v11 = vsub.f32 %v189_v2, %v40_v9  ;;  %v45_v12 = vsel %vm31_vm0, %v43_v10, 0.0 }
  0x9a   :  { %46 = vadd.xlane.f32.xlu1 %v45_v12 }
  0x9b   :  { %v44_v13 = vmul.f32 %v42_v11, %v42_v11 }
  0x9d   :  { %v48_v14 = vsel %vm31_vm0, %v44_v13, 0.0 }
  0x9e   :  { %49 = vadd.xlane.f32.xlu1 %v48_v14 }
 0x127   :  { %v47_v18 = vpop.xlane.xlu1 %46 }
 0x128   :  { %v51_v19 = vmul.f32 0.03125, %v47_v18 }
 0x12a   :  { %v53_v20 = vadd.f32 1e-05, %v51_v19 }
 0x12b   :  { %v50_v21 = vpop.xlane.xlu1 %49 }
 0x12c   :  { %209 = vrsqrt.f32 %v53_v20  ;;  %v52_v22 = vmul.f32 0.03125, %v50_v21 }
 0x12e   :  { %v54_v23 = vadd.f32 1e-05, %v52_v22 }
 0x130   :  { %211 = vrsqrt.f32 %v54_v23 }
 0x136   :  { %v210_v24 = vpop.eup %209 }
 0x137   :  { %v57_v26 = vmul.f32 %v210_v24, %v41_v7 }
 0x139   :  { %v65_v28 = vmul.f32 %v180_v25, %v57_v26 }
 0x13a   :  { %v212_v29 = vpop.eup %211 }
 0x13b   :  { %v58_v30 = vmul.f32 %v212_v29, %v42_v11  ;;  %v73_v31 = vadd.f32 %v181_v27, %v65_v28 }
 0x13d   :  { %v66_v32 = vmul.f32 %v180_v25, %v58_v30  ;;  %75 = vst.msk [vmem:[#allocation2] sm:$0xff] %vm31_vm0, %v73_v31 }
 0x13f   :  { %v74_v33 = vadd.f32 %v181_v27, %v66_v32 }
 0x141   :  { %v77_v34 = vpack.c.bf16 %v74_v33, %v73_v31  ;;  %76 = vst.msk [vmem:[#allocation2 + $0x8] sm:$0xff] %vm31_vm0, %v74_v33 }
 0x143   :  { %198 = vmatmul.mubr.msk.bf16.vlgmr.msra.gmra.mrb[0].mxu0 %vm31_vm0, %v77_v34 }
 0x144   :  { %224 = shalt.err (!%p221_p4)
}
 0x145   :  { %s225_s8 = scalar_lea.hbm %s362_s5, 256 }
 0x146   :  { %p226_p5 = scmp.ne.s32.totalorder %s362_s5, %s225_s8  ;;  %p229_p6 = scmp.lt.u32.totalorder %s225_s8, %s362_s5 }
 0x148   :  { %p231_p7 = pnand %p229_p6, %p226_p5 }
 0x14a   :  { %234 = shalt.err (!%p231_p7)
}
 0x14b   :  { %s264_s13 = smov 128   ;;  %s265_s14 = smov 8   ;;  %v182_v35 = vld [vmem:[%s361_s4] ss:$0 sm:$0xff]  ;;  %vm145_vm2 = vcmask 80896  }
 0x14c   :  { %159 = dma.vmem_to_hbm [thread:$0]  %s154_s1, 256, %s362_s5, [#allocation3], %s264_s13, %s264_s13, %s265_s14  }
 0x14d   :  { %s266_s19 = smov [#allocation4]  }
 0x14e   :  { %s165_s20 = sshll.u32 %s266_s19, 4  ;;  %s166_s20 = int_to_ptr.vmem [resolvable:$true] %s165_s20 }
 0x14f   :  { %s235_s21 = scalar_lea.vmem %s166_s20, 256  ;;  %p240_p9 = scmp.lt.s32.totalorder %s166_s20, %s166_s20 }
 0x150   :  { %p236_p8 = scmp.ne.s32.totalorder %s166_s20, %s235_s21  ;;  %p241_p10 = scmp.lt.s32.totalorder %s235_s21, %s235_s21 }
 0x152   :  { %p242_p11 = por %p241_p10, %p240_p9 }
 0x154   :  { %p243_p12 = pnand %p242_p11, %p236_p8 }
 0x216   :  { %v138_v36 = vpop.f32.mrb[0].mxu0 }
 0x217   :  { %v139_v37 = vadd.f32 %v182_v35, %v138_v36  ;;  %v199_v38 = vpop.f32.mrb[1].mxu0 }
 0x218   :  { %v141_v39 = vpop.f32.mrb[2].mxu0 }
 0x219   :  { %146 = vst.msk [vmem:[#allocation4] sm:$0xff] %vm145_vm2, %v139_v37  ;;  %v142_v40 = vadd.f32 %v182_v35, %v141_v39  ;;  %v200_v41 = vpop.f32.mrb[3].mxu0 }
 0x21b   :  { %147 = vst.msk [vmem:[#allocation4 + $0x8] sm:$0xff] %vm145_vm2, %v142_v40 }
 0x21c   :  { %246 = shalt.err (!%p243_p12)
}
 0x21d   :  { %s247_s22 = scalar_lea.hbm %s363_s6, 256 }
 0x21e   :  { %p248_p13 = scmp.ne.s32.totalorder %s363_s6, %s247_s22  ;;  %p251_p0 = scmp.lt.u32.totalorder %s247_s22, %s363_s6 }
 0x220   :  { %p253_p1 = pnand %p251_p0, %p248_p13 }
 0x222   :  { %256 = shalt.err (!%p253_p1)
}
 0x223   :  { %171 = dma.vmem_to_hbm [thread:$0]  %s166_s20, 256, %s363_s6, [#allocation5], %s264_s13, %s264_s13, %s265_s14  }
 0x224   :  { %257 = dma.done.wait [#allocation3], 256  }
 0x225   :  { %258 = vsyncadd [#allocation3], 4294967040 }
 0x226   :  { %259 = dma.done.wait [#allocation5], 256  }
 0x227   :  { %260 = vsyncadd [#allocation5], 4294967040 }
 0x228   :  { %178 = vsyncpa [#allocation3], 1 }
 0x229   :  { %179 = vsyncpa [#allocation5], 1 }

// kernel: frontend_forward.38
= control target key start
LH: loop header
LB: loop body
LE: loop exit
PB: predicated region body
PF: predicated region fallthrough
CT: control target
= control target key end

     0   :  { %s842_s21 = smov 0   ;;  %s921_s0 = inlined_call_operand.vmem [shape: bf16[2,8,32], index: 0, kind: input, shape index: {}]   ;;  %s922_s1 = inlined_call_operand.vmem [shape: bf16[2,12,3], index: 1, kind: input, shape index: {}]   ;;  %s923_s2 = inlined_call_operand.vmem [shape: bf16[32,32], index: 2, kind: input, shape index: {}]   ;;  %s924_s3 = inlined_call_operand.vmem [shape: f32[1,32], index: 3, kind: input, shape index: {}]   ;;  %s925_s4 = inlined_call_operand.vmem [shape: bf16[5,3,32], index: 4, kind: input, shape index: {}]   ;;  %s926_s5 = inlined_call_operand.vmem [shape: f32[1,32], index: 5, kind: input, shape index: {}]   ;;  %s927_s6 = inlined_call_operand.vmem [shape: bf16[2,8,32], index: 6, kind: output, shape index: {}]  }
   0x1 LB: > { %s698_s22 = sadd.s32 4294967295, %s802_s21   ;;  %p702_p0 = scmp.ge.s32.totalorder %s802_s21, 1  ;;  %s802_s21 = sphi %s842_s21, %s16_s21  }
   0x2   : > { %p221_p1 = scmp.lt.s32.totalorder %s802_s21, 3 }
   0x4   : > { %p222_p2 = pnand %p702_p0, %p221_p1 }
   0x5   : > { %v790_v0 = vld [vmem:[%s923_s2] sm:$0xff] (!%p222_p2)   ;;  %v804_v1 = vmov (!%p222_p2), 0.0   ;;  %vm279_vm0 = vcmask (!%p222_p2), 1040384   ;;  %vm280_vm1 = vcmask (!%p222_p2), 1041408   ;;  %v805_v3 = vmov (!%p222_p2), 65535   ;;  %v791_v5 = vld [vmem:[%s923_s2 + $0x8] sm:$0xff] (!%p222_p2)  }
   0x6   : > { %225 = sbr.rel (%p222_p2) target bundleno = 258 (0x102), region = 44  ;;  %747 = vmatprep.subr.bf16.mxu1 (!%p222_p2), %v804_v1  ;;  %741 = vmatprep.subr.bf16.mxu0 (!%p222_p2), %v804_v1  ;;  %v274_v2 = vld [vmem:[%s925_s4] sm:$0x3] (!%p222_p2)  ;;  %v281_v4 = vsel (!%p222_p2), %vm279_vm0, 4294967295, %v805_v3  ;;  %vm806_vm2 = vmmov (!%p222_p2), 0   ;;  %p254_p3 = scmp.lt.s32.totalorder (!%p222_p2), %s698_s22, 1 }
   0x7   : > { %748 = vmatpush3.bf16.msra.mxu1 (!%p222_p2), %v790_v0  ;;  %743 = vmatprep.mubr.msk.bf16.mxu0 (!%p222_p2), %vm806_vm2, %v804_v1  ;;  %v282_v6 = vsel (!%p222_p2), %vm280_vm1, %v281_v4, 0  ;;  %v711_v8 = vld [vmem:[%s925_s4 + $0x2] sm:$0x3] (!%p222_p2)  ;;  %v714_v9 = vld [vmem:[%s925_s4 + $0x4] sm:$0x3] (!%p222_p2)  ;;  %vm275_vm3 = vcmask (!%p222_p2), 23552  }
   0x8   : > { %749 = vmatprep.subr.bf16.mxu1 (!%p222_p2), %v804_v1  ;;  %751 = vmatprep.mubr.msk.bf16.mxu1 (!%p222_p2), %vm806_vm2, %v804_v1  ;;  %v284_v7 = vand.u32 (!%p222_p2), %v282_v6, %v274_v2  ;;  %v402_v10 = vand.u32 (!%p222_p2), %v711_v8, %v282_v6  ;;  %vm338_vm4 = vcmask (!%p222_p2), 261120   ;;  %v456_v11 = vand.u32 (!%p222_p2), %v714_v9, %v282_v6  ;;  %v720_v21 = vld [vmem:[%s925_s4 + $0x8] sm:$0x3] (!%p222_p2)  ;;  %v717_v24 = vld [vmem:[%s925_s4 + $0x6] sm:$0x3] (!%p222_p2) }
   0x9   : > { %v571_v27 = vand.u32 (!%p222_p2), %v720_v21, %v282_v6  ;;  %v517_v31 = vand.u32 (!%p222_p2), %v717_v24, %v282_v6  ;;  %v723_v0 = vld [vmem:[%s924_s3] ss:$0 sm:$0xff] (!%p222_p2)  ;;  %vm631_vm5 = vcmask (!%p222_p2), 257024  }
   0xa   : > { %742 = vmatpush3.bf16.msra.mxu0 (!%p222_p2), %v284_v7  ;;  %v724_v4 = vld [vmem:[%s926_s5] ss:$0 sm:$0xff] (!%p222_p2) }
   0xb   : > { %750 = vmatpush3.bf16.msra.mxu1 (!%p222_p2), %v791_v5  ;;  %755 = vmatprep.subr.bf16.mxu0 (!%p222_p2), %v804_v1 }
   0xc   : > { %761 = vmatprep.subr.bf16.mxu1 (!%p222_p2), %v804_v1 }
   0xd   : > { %s929_s22 = smov (!%p254_p3, %s698_s22), 1 }
   0xe   : > { %s727_s9 = sshll.u32 %s929_s22, 3  ;;  %s703_s10 = sshll.u32 %s929_s22, 2 }
   0xf   : > { %s262_s13 = scalar_lea.vmem %s922_s1, %s727_s9  ;;  %s257_s16 = scalar_lea.vmem %s921_s0, %s703_s10 }
  0x10   : > { %v273_v12 = vld [vmem:[%s262_s13] sm:$0xf]  ;;  %v383_v15 = vld [vmem:[%s262_s13 + $0x4] sm:$0x1]  ;;  %s266_s29 = scalar_lea.vmem %s927_s6, %s703_s10 }
  0x11   : > { %v268_v13 = vld [vmem:[%s257_s16] sm:$0xf]  ;;  %744 = vmatmul.mubr.msk.bf16.vlgmr.msra.gmra.mrb[0].mxu0 %vm275_vm3, %v273_v12  ;;  %v499_v17 = vld [vmem:[%s262_s13 + $0x4] sm:$0x3] }
  0x12   : > { %v382_v14 = vld [vmem:[%s262_s13] sm:$0xf]  ;;  %752 = vmatmul.mubr.msk.bf16.vlgmr.msra.gmra.mrb[0].mxu1 %vm338_vm4, %v268_v13  ;;  %756 = vmatpush3.bf16.msra.mxu0 %v402_v10 }
  0x13   : > { %v445_v16 = vld [vmem:[%s262_s13] sm:$0xe]  ;;  %762 = vmatpush3.bf16.msra.mxu1 %v456_v11  ;;  %v712_v18 = vcombine.low %v382_v14, %v383_v15  ;;  %757 = vmatprep.mubr.msk.bf16.mxu0 %vm806_vm2, %v804_v1 }
  0x14   : > { %v715_v19 = vcombine.low %v445_v16, %v383_v15  ;;  %v718_v20 = vcombine.low %v445_v16, %v499_v17  ;;  %767 = vmatprep.subr.bf16.mxu0 %v804_v1  ;;  %763 = vmatprep.mubr.msk.bf16.mxu1 %vm806_vm2, %v804_v1  ;;  %v560_v30 = vld [vmem:[%s262_s13] sm:$0xc] }
  0x15   : > { %v392_v22 = vshrl.u32 %v712_v18, 16  ;;  %v394_v23 = vshll.u32 %v712_v18, 16  ;;  %773 = vmatprep.subr.bf16.mxu1 %v804_v1  ;;  %v721_v33 = vcombine.low %v560_v30, %v499_v17 }
  0x16   : > { %v451_v25 = vrot.slane %v715_v19, 1  ;;  %v506_v28 = vshrl.u32 %v718_v20, 16  ;;  %v509_v29 = vshll.u32 %v718_v20, 16 }
  0x17   : > { %v396_v26 = vrot.slane %v394_v23, 1  ;;  %v566_v36 = vrot.slane %v721_v33, 2 }
  0x18   : > { %v508_v34 = vrot.slane %v506_v28, 1  ;;  %v511_v35 = vrot.slane %v509_v29, 2 }
  0x19   : > { %v397_v32 = vor.u32 %v396_v26, %v392_v22 }
  0x1a   : > { %764 = vmatmul.mubr.msk.bf16.vlgmr.msra.gmra.mrb[4].mxu1 %vm275_vm3, %v451_v25  ;;  %v512_v37 = vor.u32 %v511_v35, %v508_v34 }
  0x1b   : > { %758 = vmatmul.mubr.msk.bf16.vlgmr.msra.gmra.mrb[4].mxu0 %vm275_vm3, %v397_v32  ;;  %774 = vmatpush3.bf16.msra.mxu1 %v571_v27 }
  0x1c   : > { %768 = vmatpush3.bf16.msra.mxu0 %v517_v31  ;;  %769 = vmatprep.mubr.msk.bf16.mxu0 %vm806_vm2, %v804_v1 }
  0x1d   : > { %775 = vmatprep.mubr.msk.bf16.mxu1 %vm806_vm2, %v804_v1 }
  0x22   : > { %776 = vmatmul.mubr.msk.bf16.vlgmr.msra.gmra.mrb[8].mxu1 %vm275_vm3, %v566_v36 }
  0x23   : > { %770 = vmatmul.mubr.msk.bf16.vlgmr.msra.gmra.mrb[8].mxu0 %vm275_vm3, %v512_v37 }
  0xe4   : > { %v320_v38 = vpop.f32.mrb[0].mxu0 }
  0xe5   : > { %v376_v39 = vpop.f32.mrb[0].mxu1  ;;  %v745_v40 = vpop.f32.mrb[1].mxu0 }
  0xe6   : > { %v377_v41 = vadd.f32 %v376_v39, %v320_v38  ;;  %v753_v42 = vpop.f32.mrb[1].mxu1  ;;  %v323_v43 = vpop.f32.mrb[2].mxu0 }
  0xe7   : > { %v379_v44 = vpop.f32.mrb[2].mxu1  ;;  %v746_v45 = vpop.f32.mrb[3].mxu0 }
  0xe8   : > { %v754_v46 = vpop.f32.mrb[3].mxu1 }
  0xed   : > { %v492_v47 = vpop.f32.mrb[4].mxu1 }
  0xee   : > { %v438_v48 = vpop.f32.mrb[4].mxu0  ;;  %v765_v49 = vpop.f32.mrb[5].mxu1 }
  0xef   : > { %v444_v50 = vadd.f32 %v438_v48, %v377_v41  ;;  %v759_v51 = vpop.f32.mrb[5].mxu0  ;;  %v495_v52 = vpop.f32.mrb[6].mxu1 }
  0xf0   : > { %v441_v53 = vpop.f32.mrb[6].mxu0  ;;  %v766_v54 = vpop.f32.mrb[7].mxu1 }
  0xf1   : > { %v498_v55 = vadd.f32 %v492_v47, %v444_v50  ;;  %v760_v56 = vpop.f32.mrb[7].mxu0 }
  0xf5   : > { %v607_v57 = vpop.f32.mrb[8].mxu1 }
  0xf6   : > { %v553_v58 = vpop.f32.mrb[8].mxu0  ;;  %v777_v59 = vpop.f32.mrb[9].mxu1 }
  0xf7   : > { %v559_v60 = vadd.f32 %v553_v58, %v498_v55  ;;  %v771_v61 = vpop.f32.mrb[9].mxu0  ;;  %v610_v62 = vpop.f32.mrb[10].mxu1 }
  0xf8   : > { %v556_v63 = vpop.f32.mrb[10].mxu0  ;;  %v778_v1 = vpop.f32.mrb[11].mxu1 }
  0xf9   : > { %v613_v2 = vadd.f32 %v607_v57, %v559_v60  ;;  %v772_v3 = vpop.f32.mrb[11].mxu0 }
  0xfb   : > { %v621_v5 = vadd.f32 %v723_v0, %v613_v2 }
  0xfd   : > { %v629_v6 = vadd.f32 %v724_v4, %v621_v5 }
  0xff   : > { %v630_v7 = vpack.c.bf16 %v629_v6, %v629_v6 }
 0x101   : > { %632 = vst.msk [vmem:[%s266_s29] sm:$0xf] %vm631_vm5, %v630_v7 }
 0x102 PF: > { %s16_s21 = sadd.s32 1, %s802_s21  }
 0x103   : > { %p13_p4 = scmp.ge.s32.totalorder %s16_s21, 4  }
 0x105   :  { %15 = sbr.rel (!%p13_p4) target bundleno = 1 (0x1), region = 81 }

</bundles_post_ra>
